<compile_context>
chip_gen: v7x
topology: tpu7x:2x2x1
jax: 0.10.0
libtpu: 0.0.40
codegen_flags: <defaults>
</compile_context>

<pallas_src>
import numpy as np
import jax
import jax.numpy as jnp
from jax import lax
from jax.experimental import pallas as pl
from jax.experimental.pallas import tpu as pltpu

# ---- model sizes (consistent with the module's __init__; small demo config) --
H = 32        # config.hidden_size (enc_hid_dim == dec_hid_dim)
E = 16        # config.emb_dim
V_ENC = 20    # len(enc_vocab)
V_DEC = 24    # len(dec_vocab)
S = 8         # src_len
B = 2         # batch
T = 6         # config.max_length (greedy decode steps)
BOS = 1       # dec_vocab.bos_idx

BP = 8            # batch padded to a full sublane group
VP = 128          # decoder vocab padded to a full lane group (dense logits)
GW = 6 * H        # fused encoder gate width: [r_f r_b | z_f z_b | n_f n_b] = 192
NW = 3 * H + VP   # fused decoder [GRU-input gates | fc columns] width = 224
DW = VP + S * H + 3 * H   # fused decoder-hidden output width = 480

# bf16 weight-slab row offsets (multiples of 16 for packed-sublane alignment)
R_GI, R_GH, R_RED, R_VBK, R_OH, R_CTX, R_DH, R_TOT = 0, 48, 112, 176, 432, 560, 624, 656
WW = DW           # slab width (480 lanes)

F32 = jnp.float32
BF16 = jnp.bfloat16


def _gru(gi, gh, h, w):
    """PyTorch GRU update from precomputed input/hidden gate projections
    (gate-major layout [r | z | n], each of width `w`)."""
    r = jax.nn.sigmoid(gi[:, :w] + gh[:, :w])
    z = jax.nn.sigmoid(gi[:, w:2 * w] + gh[:, w:2 * w])
    n = jnp.tanh(gi[:, 2 * w:3 * w] + r * gh[:, 2 * w:3 * w])
    return (1.0 - z) * n + z * h


def seq2seq_kernel(src_ref, w_ref, b_ref, out_ref, gi_ref, enc_ref, bencd_ref):
    # -------- encoder input projections hoisted out of the recurrence ----------
    # one-hot(time i)|one-hot(time S-1-i) @ block-diag(emb@Wih_f, emb@Wih_b)
    gi_ref[...] = (jnp.dot(src_ref[...], w_ref[R_GI:R_GI + 2 * V_ENC, :GW],
                           preferred_element_type=F32) + b_ref[0:1, :GW])

    # -------- fused fwd|bwd GRU recurrence, fully unrolled ----------------------
    w_gh = w_ref[R_GH:R_GH + 2 * H, :GW]           # block-diag [64, 192] bf16
    b_gh = b_ref[1:2, :GW]
    h = jnp.zeros((BP, 2 * H), F32)                # lanes [h_fwd(32) | h_bwd(32)]
    for i in range(S):
        gi = gi_ref[i * BP:(i + 1) * BP, :]
        gh = jnp.dot(h.astype(BF16), w_gh, preferred_element_type=F32) + b_gh
        h = _gru(gi, gh, h, 2 * H)
        enc_ref[i * BP:(i + 1) * BP, :H] = h[:, :H]                 # fwd out, t=i
        enc_ref[(S - 1 - i) * BP:(S - i) * BP, H:] = h[:, H:]       # bwd out, t=S-1-i

    # -------- decoder initial hidden: reduce_hidden([h_fwd_last ; h_bwd_last]) --
    dh = (jnp.dot(h.astype(BF16), w_ref[R_RED:R_RED + 2 * H, :H],
                  preferred_element_type=F32) + b_ref[2:3, :H])     # [BP, H]

    # -------- encoder-side attention term, rearranged lane-dense [BP, S*H] ------
    benc = (jnp.dot(enc_ref[...].astype(BF16),
                    w_ref[R_RED:R_RED + 2 * H, H:2 * H],
                    preferred_element_type=F32) + b_ref[3:4, :H])   # [S*BP, H]
    for s in range(S):
        bencd_ref[:, s * H:(s + 1) * H] = benc[s * BP:(s + 1) * BP, :]

    # -------- greedy decode (trg=None path), fully unrolled ---------------------
    iota_v = lax.broadcasted_iota(jnp.int32, (BP, VP), 1)
    oh = (iota_v == BOS).astype(F32)               # one-hot(bos_idx), VP lanes
    b_dh = b_ref[5:6, :DW]                         # [fc_b|-1e9 pad | 0 | dec_bhh]
    dh_all = jnp.dot(dh.astype(BF16), w_ref[R_DH:R_DH + H, :DW],
                     preferred_element_type=F32) + b_dh
    for t in range(T):
        # additive attention: batched tanh tile + one tiny MXU reduction vs v
        tt = jnp.tanh(bencd_ref[...] + dh_all[:, VP:VP + S * H])    # [BP, S*H]
        sc = jnp.dot(tt.astype(BF16), w_ref[R_VBK:R_VBK + S * H, :S],
                     preferred_element_type=F32)                    # [BP, S]
        m = jnp.max(sc, axis=1, keepdims=True)
        e = jnp.exp(sc - m)
        denom = jnp.sum(e, axis=1, keepdims=True)
        # context = softmax-weighted sum of encoder outputs (depth-3 tree)
        blk = [e[:, s:s + 1] * enc_ref[s * BP:(s + 1) * BP, :] for s in range(S)]
        while len(blk) > 1:
            blk = [blk[k] + blk[k + 1] for k in range(0, len(blk), 2)]
        ctx = blk[0] / denom                                        # [BP, 2H]

        # fused [GRU-input gates | fc columns] matmuls for token and context
        oh_out = jnp.dot(oh.astype(BF16), w_ref[R_OH:R_OH + VP, :NW],
                         preferred_element_type=F32)                # [BP, 3H+VP]
        ctx_out = jnp.dot(ctx.astype(BF16), w_ref[R_CTX:R_CTX + 2 * H, :NW],
                          preferred_element_type=F32)               # [BP, 3H+VP]
        gi = oh_out[:, :3 * H] + ctx_out[:, :3 * H] + b_ref[4:5, :3 * H]
        dh = _gru(gi, dh_all[:, VP + S * H:], dh, H)                # new hidden

        # fused [fc | attn-dec(rep x8) | GRU-hidden] matmul on the new hidden
        dh_all = jnp.dot(dh.astype(BF16), w_ref[R_DH:R_DH + H, :DW],
                         preferred_element_type=F32) + b_dh
        pred = dh_all[:, :VP] + oh_out[:, 3 * H:] + ctx_out[:, 3 * H:]
        out_ref[t] = pred                                           # lane-dense store

        # greedy argmax (first-occurrence tie-break) -> next one-hot input
        mx = jnp.max(pred, axis=1, keepdims=True)
        idx = jnp.min(jnp.where(pred == mx, iota_v, VP), axis=1, keepdims=True)
        oh = (iota_v == idx).astype(F32)


# ------------------------------ host-side packing ------------------------------
def _pack_operands(src, params):
    p = {k: np.asarray(v, np.float32) for k, v in params.items()}

    # encoder: fused fwd|bwd, gate-major layout; embedding folded into W_ih
    A_f = p["enc_emb"] @ p["enc_wih_f"].T          # [V_ENC, 3H]
    A_b = p["enc_emb"] @ p["enc_wih_b"].T
    Hf, Hb = p["enc_whh_f"].T, p["enc_whh_b"].T    # [H, 3H]
    W_gi = np.zeros((2 * V_ENC, GW), np.float32)
    W_gh = np.zeros((2 * H, GW), np.float32)
    b_gi = np.zeros((GW,), np.float32)
    b_gh = np.zeros((GW,), np.float32)
    for g in range(3):                             # r, z, n
        fsl = slice(2 * g * H, (2 * g + 1) * H)
        bsl = slice((2 * g + 1) * H, (2 * g + 2) * H)
        ssl = slice(g * H, (g + 1) * H)
        W_gi[:V_ENC, fsl] = A_f[:, ssl]
        W_gi[V_ENC:, bsl] = A_b[:, ssl]
        W_gh[:H, fsl] = Hf[:, ssl]
        W_gh[H:, bsl] = Hb[:, ssl]
        b_gi[fsl] = p["enc_bih_f"][ssl]
        b_gi[bsl] = p["enc_bih_b"][ssl]
        b_gh[fsl] = p["enc_bhh_f"][ssl]
        b_gh[bsl] = p["enc_bhh_b"][ssl]

    # reduce_hidden / attention
    wred = p["reduce_w"].T                         # [2H, H]  rows [fwd ; bwd]
    wat = p["attn_w"].T                            # [3H, H]  rows [dec ; enc_f ; enc_b]
    wa_dec_rep = np.tile(wat[:H], (1, S))          # [H, S*H]
    wa_enc = wat[H:]                               # [2H, H]
    v_blk = np.zeros((S * H, S), np.float32)       # block-diagonal v
    for s in range(S):
        v_blk[s * H:(s + 1) * H, s] = p["v_w"][0]

    # decoder: N-stacked fused weights; dec embedding folded into W_ih / fc
    dwi = p["dec_wih"].T                           # [E+2H, 3H] rows [emb ; ctx]
    demb_wi = p["dec_emb"] @ dwi[:E]               # [V_DEC, 3H]
    wfc = p["fc_w"].T                              # [H+2H+E, V_DEC] rows [dh;ctx;emb]
    demb_fc = p["dec_emb"] @ wfc[3 * H:]           # [V_DEC, V_DEC]
    W_oh = np.zeros((VP, NW), np.float32)
    W_oh[:V_DEC, :3 * H] = demb_wi
    W_oh[:V_DEC, 3 * H:3 * H + V_DEC] = demb_fc
    W_ctx = np.zeros((2 * H, NW), np.float32)
    W_ctx[:, :3 * H] = dwi[E:]
    W_ctx[:, 3 * H:3 * H + V_DEC] = wfc[H:3 * H]
    W_dh = np.zeros((H, DW), np.float32)
    W_dh[:, :V_DEC] = wfc[:H]
    W_dh[:, VP:VP + S * H] = wa_dec_rep
    W_dh[:, VP + S * H:] = p["dec_whh"].T
    b_dh = np.zeros((DW,), np.float32)
    b_dh[:V_DEC] = p["fc_b"]
    b_dh[V_DEC:VP] = -1e9                          # padded vocab lanes never win argmax
    b_dh[VP + S * H:] = p["dec_bhh"]

    # packed slabs: 1 bf16 weight DMA + 1 f32 bias DMA (instead of ~30 args)
    wslab = np.zeros((R_TOT, WW), np.float32)
    wslab[R_GI:R_GI + 2 * V_ENC, :GW] = W_gi
    wslab[R_GH:R_GH + 2 * H, :GW] = W_gh
    wslab[R_RED:R_RED + 2 * H, :H] = wred
    wslab[R_RED:R_RED + 2 * H, H:2 * H] = wa_enc
    wslab[R_VBK:R_VBK + S * H, :S] = v_blk
    wslab[R_OH:R_OH + VP, :NW] = W_oh
    wslab[R_CTX:R_CTX + 2 * H, :NW] = W_ctx
    wslab[R_DH:R_DH + H, :DW] = W_dh

    bslab = np.zeros((8, WW), np.float32)
    bslab[0, :GW] = b_gi
    bslab[1, :GW] = b_gh
    bslab[2, :H] = p["reduce_b"]
    bslab[3, :H] = p["attn_b"]
    bslab[4, :3 * H] = p["dec_bih"]
    bslab[5, :DW] = b_dh

    # time-major one-hot pairs (fwd time i | bwd time S-1-i), batch padded to 8
    src_np = np.asarray(src)
    src_pair = np.zeros((S, BP, 2 * V_ENC), np.float32)
    for b in range(B):
        for i in range(S):
            src_pair[i, b, src_np[b, i]] = 1.0
            src_pair[i, b, V_ENC + src_np[b, S - 1 - i]] = 1.0
    src_pair = src_pair.reshape(S * BP, 2 * V_ENC)

    return (jnp.asarray(src_pair, BF16), jnp.asarray(wslab, BF16),
            jnp.asarray(bslab, F32))


# ------------------------------ wrapper ---------------------------------------
def init_params(key):
    ks = jax.random.split(key, 21)
    w = lambda k, shape: jax.random.normal(k, shape, F32) * 0.1
    return dict(
        enc_emb=w(ks[0], (V_ENC, E)),
        enc_wih_f=w(ks[1], (3 * H, E)), enc_whh_f=w(ks[2], (3 * H, H)),
        enc_bih_f=w(ks[3], (3 * H,)),   enc_bhh_f=w(ks[4], (3 * H,)),
        enc_wih_b=w(ks[5], (3 * H, E)), enc_whh_b=w(ks[6], (3 * H, H)),
        enc_bih_b=w(ks[7], (3 * H,)),   enc_bhh_b=w(ks[8], (3 * H,)),
        reduce_w=w(ks[9], (H, 2 * H)),  reduce_b=w(ks[10], (H,)),
        attn_w=w(ks[11], (H, 3 * H)),   attn_b=w(ks[12], (H,)),
        v_w=w(ks[13], (1, H)),
        dec_emb=w(ks[14], (V_DEC, E)),
        dec_wih=w(ks[15], (3 * H, E + 2 * H)), dec_whh=w(ks[16], (3 * H, H)),
        dec_bih=w(ks[17], (3 * H,)),    dec_bhh=w(ks[18], (3 * H,)),
        fc_w=w(ks[19], (V_DEC, H + 2 * H + E)), fc_b=w(ks[20], (V_DEC,)),
    )


def seq2seq_forward(src, params):
    """src: [batch, src_len] int32 -> logits [batch, max_len, dec_vocab]."""
    src_pair, wslab, bslab = _pack_operands(src, params)
    vmem = pl.BlockSpec(memory_space=pltpu.MemorySpace.VMEM)
    out_tm = pl.pallas_call(
        seq2seq_kernel,
        out_shape=jax.ShapeDtypeStruct((T, BP, VP), F32),
        in_specs=[vmem, vmem, vmem],
        out_specs=vmem,
        scratch_shapes=[
            pltpu.VMEM((S * BP, GW), F32),      # hoisted encoder input projections
            pltpu.VMEM((S * BP, 2 * H), F32),   # encoder outputs [fwd | bwd]
            pltpu.VMEM((BP, S * H), F32),       # lane-dense attention enc term
        ],
    )(src_pair, wslab, bslab)
    # strip batch / vocab padding, back to PyTorch [batch, max_len, dec_vocab]
    return jnp.transpose(out_tm[:, :B, :V_DEC], (1, 0, 2))


if __name__ == "__main__":
    key = jax.random.PRNGKey(0)
    pkey, skey = jax.random.split(key)
    params = init_params(pkey)
    src = jax.random.randint(skey, (B, S), 0, V_ENC, dtype=jnp.int32)

    out = seq2seq_forward(src, params)
    out = jax.block_until_ready(out)

    assert out.shape == (B, T, V_DEC), out.shape
    assert bool(jnp.all(jnp.isfinite(out)))
    print("KERNEL_OK")
</pallas_src>

<mosaic_0001>
module attributes {stable_mosaic.version = 11 : i64} {
  func.func @seq2seq_kernel(%arg0: memref<64x40xbf16, #tpu.memory_space<vmem>>, %arg1: memref<656x480xbf16, #tpu.memory_space<vmem>>, %arg2: memref<8x480xf32, #tpu.memory_space<vmem>>, %arg3: memref<6x8x128xf32, #tpu.memory_space<vmem>>, %arg4: memref<64x192xf32, #tpu.memory_space<vmem>>, %arg5: memref<64x64xf32, #tpu.memory_space<vmem>>, %arg6: memref<8x256xf32, #tpu.memory_space<vmem>>) attributes {dimension_semantics = [], scalar_prefetch = 0 : i64, scratch_operands = 3 : i64, tpu.core_type = #tpu.core_type<tc>} {
    %c0 = arith.constant 0 : index
    %c0_0 = arith.constant 0 : index
    %0 = vector.load %arg0[%c0, %c0_0] : memref<64x40xbf16, #tpu.memory_space<vmem>>, vector<64x40xbf16>
    %c0_1 = arith.constant 0 : index
    %c0_2 = arith.constant 0 : index
    %1 = vector.load %arg1[%c0_1, %c0_2] : memref<656x480xbf16, #tpu.memory_space<vmem>>, vector<40x192xbf16>
    %cst = arith.constant dense<0.000000e+00> : vector<64x192xf32>
    %2 = tpu.matmul %0, %1, %cst {dimension_numbers = #tpu.dot_dimension_numbers<[1], [0], [0], [1], [0, 0, 1, 1], [], []>} : vector<64x40xbf16>, vector<40x192xbf16>, vector<64x192xf32> -> vector<64x192xf32>
    %c0_3 = arith.constant 0 : index
    %c0_4 = arith.constant 0 : index
    %3 = vector.load %arg2[%c0_3, %c0_4] : memref<8x480xf32, #tpu.memory_space<vmem>>, vector<1x192xf32>
    %4 = vector.broadcast %3 : vector<1x192xf32> to vector<64x192xf32>
    %5 = arith.addf %2, %4 : vector<64x192xf32>
    %c0_5 = arith.constant 0 : index
    %c0_6 = arith.constant 0 : index
    %6 = vector.load %arg4[%c0_5, %c0_6] : memref<64x192xf32, #tpu.memory_space<vmem>>, vector<64x192xf32>
    tpu.vector_store %arg4[%c0_5, %c0_6], %5 {strides = array<i32>} : memref<64x192xf32, #tpu.memory_space<vmem>>, vector<64x192xf32>,
    %c48 = arith.constant 48 : index
    %c0_7 = arith.constant 0 : index
    %7 = vector.load %arg1[%c48, %c0_7] : memref<656x480xbf16, #tpu.memory_space<vmem>>, vector<64x192xbf16>
    %c1 = arith.constant 1 : index
    %c0_8 = arith.constant 0 : index
    %8 = vector.load %arg2[%c1, %c0_8] : memref<8x480xf32, #tpu.memory_space<vmem>>, vector<1x192xf32>
    %cst_9 = arith.constant 0.000000e+00 : f32
    %9 = vector.broadcast %cst_9 : f32 to vector<8x64xf32>
    %c0_10 = arith.constant 0 : index
    %c0_11 = arith.constant 0 : index
    %10 = vector.load %arg4[%c0_10, %c0_11] : memref<64x192xf32, #tpu.memory_space<vmem>>, vector<8x192xf32>
    %11 = arith.truncf %9 : vector<8x64xf32> to vector<8x64xbf16>
    %cst_12 = arith.constant dense<0.000000e+00> : vector<8x192xf32>
    %12 = tpu.matmul %11, %7, %cst_12 {dimension_numbers = #tpu.dot_dimension_numbers<[1], [0], [0], [1], [0, 0, 1, 1], [], []>} : vector<8x64xbf16>, vector<64x192xbf16>, vector<8x192xf32> -> vector<8x192xf32>
    %13 = vector.broadcast %8 : vector<1x192xf32> to vector<8x192xf32>
    %14 = arith.addf %12, %13 : vector<8x192xf32>
    %15 = vector.extract_strided_slice %10 {offsets = [0, 0], sizes = [8, 64], strides = [1, 1]} : vector<8x192xf32> to vector<8x64xf32>
    %16 = vector.extract_strided_slice %14 {offsets = [0, 0], sizes = [8, 64], strides = [1, 1]} : vector<8x192xf32> to vector<8x64xf32>
    %17 = arith.addf %15, %16 : vector<8x64xf32>
    %18 = arith.negf %17 : vector<8x64xf32>
    %19 = math.exp %18 : vector<8x64xf32>
    %cst_13 = arith.constant 1.000000e+00 : f32
    %20 = vector.broadcast %cst_13 : f32 to vector<8x64xf32>
    %21 = arith.addf %20, %19 : vector<8x64xf32>
    %22 = arith.divf %20, %21 : vector<8x64xf32>
    %23 = vector.extract_strided_slice %10 {offsets = [0, 64], sizes = [8, 64], strides = [1, 1]} : vector<8x192xf32> to vector<8x64xf32>
    %24 = vector.extract_strided_slice %14 {offsets = [0, 64], sizes = [8, 64], strides = [1, 1]} : vector<8x192xf32> to vector<8x64xf32>
    %25 = arith.addf %23, %24 : vector<8x64xf32>
    %26 = arith.negf %25 : vector<8x64xf32>
    %27 = math.exp %26 : vector<8x64xf32>
    %cst_14 = arith.constant 1.000000e+00 : f32
    %28 = vector.broadcast %cst_14 : f32 to vector<8x64xf32>
    %29 = arith.addf %28, %27 : vector<8x64xf32>
    %30 = arith.divf %28, %29 : vector<8x64xf32>
    %31 = vector.extract_strided_slice %10 {offsets = [0, 128], sizes = [8, 64], strides = [1, 1]} : vector<8x192xf32> to vector<8x64xf32>
    %32 = vector.extract_strided_slice %14 {offsets = [0, 128], sizes = [8, 64], strides = [1, 1]} : vector<8x192xf32> to vector<8x64xf32>
    %33 = arith.mulf %22, %32 : vector<8x64xf32>
    %34 = arith.addf %31, %33 : vector<8x64xf32>
    %35 = math.tanh %34 : vector<8x64xf32>
    %cst_15 = arith.constant 1.000000e+00 : f32
    %36 = vector.broadcast %cst_15 : f32 to vector<8x64xf32>
    %37 = arith.subf %36, %30 : vector<8x64xf32>
    %38 = arith.mulf %37, %35 : vector<8x64xf32>
    %39 = arith.mulf %30, %9 : vector<8x64xf32>
    %40 = arith.addf %38, %39 : vector<8x64xf32>
    %41 = vector.extract_strided_slice %40 {offsets = [0, 0], sizes = [8, 32], strides = [1, 1]} : vector<8x64xf32> to vector<8x32xf32>
    %c0_16 = arith.constant 0 : index
    %c0_17 = arith.constant 0 : index
    %42 = vector.load %arg5[%c0_16, %c0_17] : memref<64x64xf32, #tpu.memory_space<vmem>>, vector<8x32xf32>
    tpu.vector_store %arg5[%c0_16, %c0_17], %41 {strides = array<i32>} : memref<64x64xf32, #tpu.memory_space<vmem>>, vector<8x32xf32>,
    %43 = vector.extract_strided_slice %40 {offsets = [0, 32], sizes = [8, 32], strides = [1, 1]} : vector<8x64xf32> to vector<8x32xf32>
    %c56 = arith.constant 56 : index
    %c32 = arith.constant 32 : index
    %44 = vector.load %arg5[%c56, %c32] : memref<64x64xf32, #tpu.memory_space<vmem>>, vector<8x32xf32>
    tpu.vector_store %arg5[%c56, %c32], %43 {strides = array<i32>} : memref<64x64xf32, #tpu.memory_space<vmem>>, vector<8x32xf32>,
    %c8 = arith.constant 8 : index
    %c0_18 = arith.constant 0 : index
    %45 = vector.load %arg4[%c8, %c0_18] : memref<64x192xf32, #tpu.memory_space<vmem>>, vector<8x192xf32>
    %46 = arith.truncf %40 : vector<8x64xf32> to vector<8x64xbf16>
    %cst_19 = arith.constant dense<0.000000e+00> : vector<8x192xf32>
    %47 = tpu.matmul %46, %7, %cst_19 {dimension_numbers = #tpu.dot_dimension_numbers<[1], [0], [0], [1], [0, 0, 1, 1], [], []>} : vector<8x64xbf16>, vector<64x192xbf16>, vector<8x192xf32> -> vector<8x192xf32>
    %48 = vector.broadcast %8 : vector<1x192xf32> to vector<8x192xf32>
    %49 = arith.addf %47, %48 : vector<8x192xf32>
    %50 = vector.extract_strided_slice %45 {offsets = [0, 0], sizes = [8, 64], strides = [1, 1]} : vector<8x192xf32> to vector<8x64xf32>
    %51 = vector.extract_strided_slice %49 {offsets = [0, 0], sizes = [8, 64], strides = [1, 1]} : vector<8x192xf32> to vector<8x64xf32>
    %52 = arith.addf %50, %51 : vector<8x64xf32>
    %53 = arith.negf %52 : vector<8x64xf32>
    %54 = math.exp %53 : vector<8x64xf32>
    %cst_20 = arith.constant 1.000000e+00 : f32
    %55 = vector.broadcast %cst_20 : f32 to vector<8x64xf32>
    %56 = arith.addf %55, %54 : vector<8x64xf32>
    %57 = arith.divf %55, %56 : vector<8x64xf32>
    %58 = vector.extract_strided_slice %45 {offsets = [0, 64], sizes = [8, 64], strides = [1, 1]} : vector<8x192xf32> to vector<8x64xf32>
    %59 = vector.extract_strided_slice %49 {offsets = [0, 64], sizes = [8, 64], strides = [1, 1]} : vector<8x192xf32> to vector<8x64xf32>
    %60 = arith.addf %58, %59 : vector<8x64xf32>
    %61 = arith.negf %60 : vector<8x64xf32>
    %62 = math.exp %61 : vector<8x64xf32>
    %cst_21 = arith.constant 1.000000e+00 : f32
    %63 = vector.broadcast %cst_21 : f32 to vector<8x64xf32>
    %64 = arith.addf %63, %62 : vector<8x64xf32>
    %65 = arith.divf %63, %64 : vector<8x64xf32>
    %66 = vector.extract_strided_slice %45 {offsets = [0, 128], sizes = [8, 64], strides = [1, 1]} : vector<8x192xf32> to vector<8x64xf32>
    %67 = vector.extract_strided_slice %49 {offsets = [0, 128], sizes = [8, 64], strides = [1, 1]} : vector<8x192xf32> to vector<8x64xf32>
    %68 = arith.mulf %57, %67 : vector<8x64xf32>
    %69 = arith.addf %66, %68 : vector<8x64xf32>
    %70 = math.tanh %69 : vector<8x64xf32>
    %cst_22 = arith.constant 1.000000e+00 : f32
    %71 = vector.broadcast %cst_22 : f32 to vector<8x64xf32>
    %72 = arith.subf %71, %65 : vector<8x64xf32>
    %73 = arith.mulf %72, %70 : vector<8x64xf32>
    %74 = arith.mulf %65, %40 : vector<8x64xf32>
    %75 = arith.addf %73, %74 : vector<8x64xf32>
    %76 = vector.extract_strided_slice %75 {offsets = [0, 0], sizes = [8, 32], strides = [1, 1]} : vector<8x64xf32> to vector<8x32xf32>
    %c8_23 = arith.constant 8 : index
    %c0_24 = arith.constant 0 : index
    %77 = vector.load %arg5[%c8_23, %c0_24] : memref<64x64xf32, #tpu.memory_space<vmem>>, vector<8x32xf32>
    tpu.vector_store %arg5[%c8_23, %c0_24], %76 {strides = array<i32>} : memref<64x64xf32, #tpu.memory_space<vmem>>, vector<8x32xf32>,
    %78 = vector.extract_strided_slice %75 {offsets = [0, 32], sizes = [8, 32], strides = [1, 1]} : vector<8x64xf32> to vector<8x32xf32>
    %c48_25 = arith.constant 48 : index
    %c32_26 = arith.constant 32 : index
    %79 = vector.load %arg5[%c48_25, %c32_26] : memref<64x64xf32, #tpu.memory_space<vmem>>, vector<8x32xf32>
    tpu.vector_store %arg5[%c48_25, %c32_26], %78 {strides = array<i32>} : memref<64x64xf32, #tpu.memory_space<vmem>>, vector<8x32xf32>,
    %c16 = arith.constant 16 : index
    %c0_27 = arith.constant 0 : index
    %80 = vector.load %arg4[%c16, %c0_27] : memref<64x192xf32, #tpu.memory_space<vmem>>, vector<8x192xf32>
    %81 = arith.truncf %75 : vector<8x64xf32> to vector<8x64xbf16>
    %cst_28 = arith.constant dense<0.000000e+00> : vector<8x192xf32>
    %82 = tpu.matmul %81, %7, %cst_28 {dimension_numbers = #tpu.dot_dimension_numbers<[1], [0], [0], [1], [0, 0, 1, 1], [], []>} : vector<8x64xbf16>, vector<64x192xbf16>, vector<8x192xf32> -> vector<8x192xf32>
    %83 = vector.broadcast %8 : vector<1x192xf32> to vector<8x192xf32>
    %84 = arith.addf %82, %83 : vector<8x192xf32>
    %85 = vector.extract_strided_slice %80 {offsets = [0, 0], sizes = [8, 64], strides = [1, 1]} : vector<8x192xf32> to vector<8x64xf32>
    %86 = vector.extract_strided_slice %84 {offsets = [0, 0], sizes = [8, 64], strides = [1, 1]} : vector<8x192xf32> to vector<8x64xf32>
    %87 = arith.addf %85, %86 : vector<8x64xf32>
    %88 = arith.negf %87 : vector<8x64xf32>
    %89 = math.exp %88 : vector<8x64xf32>
    %cst_29 = arith.constant 1.000000e+00 : f32
    %90 = vector.broadcast %cst_29 : f32 to vector<8x64xf32>
    %91 = arith.addf %90, %89 : vector<8x64xf32>
    %92 = arith.divf %90, %91 : vector<8x64xf32>
    %93 = vector.extract_strided_slice %80 {offsets = [0, 64], sizes = [8, 64], strides = [1, 1]} : vector<8x192xf32> to vector<8x64xf32>
    %94 = vector.extract_strided_slice %84 {offsets = [0, 64], sizes = [8, 64], strides = [1, 1]} : vector<8x192xf32> to vector<8x64xf32>
    %95 = arith.addf %93, %94 : vector<8x64xf32>
    %96 = arith.negf %95 : vector<8x64xf32>
    %97 = math.exp %96 : vector<8x64xf32>
    %cst_30 = arith.constant 1.000000e+00 : f32
    %98 = vector.broadcast %cst_30 : f32 to vector<8x64xf32>
    %99 = arith.addf %98, %97 : vector<8x64xf32>
    %100 = arith.divf %98, %99 : vector<8x64xf32>
    %101 = vector.extract_strided_slice %80 {offsets = [0, 128], sizes = [8, 64], strides = [1, 1]} : vector<8x192xf32> to vector<8x64xf32>
    %102 = vector.extract_strided_slice %84 {offsets = [0, 128], sizes = [8, 64], strides = [1, 1]} : vector<8x192xf32> to vector<8x64xf32>
    %103 = arith.mulf %92, %102 : vector<8x64xf32>
    %104 = arith.addf %101, %103 : vector<8x64xf32>
    %105 = math.tanh %104 : vector<8x64xf32>
    %cst_31 = arith.constant 1.000000e+00 : f32
    %106 = vector.broadcast %cst_31 : f32 to vector<8x64xf32>
    %107 = arith.subf %106, %100 : vector<8x64xf32>
    %108 = arith.mulf %107, %105 : vector<8x64xf32>
    %109 = arith.mulf %100, %75 : vector<8x64xf32>
    %110 = arith.addf %108, %109 : vector<8x64xf32>
    %111 = vector.extract_strided_slice %110 {offsets = [0, 0], sizes = [8, 32], strides = [1, 1]} : vector<8x64xf32> to vector<8x32xf32>
    %c16_32 = arith.constant 16 : index
    %c0_33 = arith.constant 0 : index
    %112 = vector.load %arg5[%c16_32, %c0_33] : memref<64x64xf32, #tpu.memory_space<vmem>>, vector<8x32xf32>
    tpu.vector_store %arg5[%c16_32, %c0_33], %111 {strides = array<i32>} : memref<64x64xf32, #tpu.memory_space<vmem>>, vector<8x32xf32>,
    %113 = vector.extract_strided_slice %110 {offsets = [0, 32], sizes = [8, 32], strides = [1, 1]} : vector<8x64xf32> to vector<8x32xf32>
    %c40 = arith.constant 40 : index
    %c32_34 = arith.constant 32 : index
    %114 = vector.load %arg5[%c40, %c32_34] : memref<64x64xf32, #tpu.memory_space<vmem>>, vector<8x32xf32>
    tpu.vector_store %arg5[%c40, %c32_34], %113 {strides = array<i32>} : memref<64x64xf32, #tpu.memory_space<vmem>>, vector<8x32xf32>,
    %c24 = arith.constant 24 : index
    %c0_35 = arith.constant 0 : index
    %115 = vector.load %arg4[%c24, %c0_35] : memref<64x192xf32, #tpu.memory_space<vmem>>, vector<8x192xf32>
    %116 = arith.truncf %110 : vector<8x64xf32> to vector<8x64xbf16>
    %cst_36 = arith.constant dense<0.000000e+00> : vector<8x192xf32>
    %117 = tpu.matmul %116, %7, %cst_36 {dimension_numbers = #tpu.dot_dimension_numbers<[1], [0], [0], [1], [0, 0, 1, 1], [], []>} : vector<8x64xbf16>, vector<64x192xbf16>, vector<8x192xf32> -> vector<8x192xf32>
    %118 = vector.broadcast %8 : vector<1x192xf32> to vector<8x192xf32>
    %119 = arith.addf %117, %118 : vector<8x192xf32>
    %120 = vector.extract_strided_slice %115 {offsets = [0, 0], sizes = [8, 64], strides = [1, 1]} : vector<8x192xf32> to vector<8x64xf32>
    %121 = vector.extract_strided_slice %119 {offsets = [0, 0], sizes = [8, 64], strides = [1, 1]} : vector<8x192xf32> to vector<8x64xf32>
    %122 = arith.addf %120, %121 : vector<8x64xf32>
    %123 = arith.negf %122 : vector<8x64xf32>
    %124 = math.exp %123 : vector<8x64xf32>
    %cst_37 = arith.constant 1.000000e+00 : f32
    %125 = vector.broadcast %cst_37 : f32 to vector<8x64xf32>
    %126 = arith.addf %125, %124 : vector<8x64xf32>
    %127 = arith.divf %125, %126 : vector<8x64xf32>
    %128 = vector.extract_strided_slice %115 {offsets = [0, 64], sizes = [8, 64], strides = [1, 1]} : vector<8x192xf32> to vector<8x64xf32>
    %129 = vector.extract_strided_slice %119 {offsets = [0, 64], sizes = [8, 64], strides = [1, 1]} : vector<8x192xf32> to vector<8x64xf32>
    %130 = arith.addf %128, %129 : vector<8x64xf32>
    %131 = arith.negf %130 : vector<8x64xf32>
    %132 = math.exp %131 : vector<8x64xf32>
    %cst_38 = arith.constant 1.000000e+00 : f32
    %133 = vector.broadcast %cst_38 : f32 to vector<8x64xf32>
    %134 = arith.addf %133, %132 : vector<8x64xf32>
    %135 = arith.divf %133, %134 : vector<8x64xf32>
    %136 = vector.extract_strided_slice %115 {offsets = [0, 128], sizes = [8, 64], strides = [1, 1]} : vector<8x192xf32> to vector<8x64xf32>
    %137 = vector.extract_strided_slice %119 {offsets = [0, 128], sizes = [8, 64], strides = [1, 1]} : vector<8x192xf32> to vector<8x64xf32>
    %138 = arith.mulf %127, %137 : vector<8x64xf32>
    %139 = arith.addf %136, %138 : vector<8x64xf32>
    %140 = math.tanh %139 : vector<8x64xf32>
    %cst_39 = arith.constant 1.000000e+00 : f32
    %141 = vector.broadcast %cst_39 : f32 to vector<8x64xf32>
    %142 = arith.subf %141, %135 : vector<8x64xf32>
    %143 = arith.mulf %142, %140 : vector<8x64xf32>
    %144 = arith.mulf %135, %110 : vector<8x64xf32>
    %145 = arith.addf %143, %144 : vector<8x64xf32>
    %146 = vector.extract_strided_slice %145 {offsets = [0, 0], sizes = [8, 32], strides = [1, 1]} : vector<8x64xf32> to vector<8x32xf32>
    %c24_40 = arith.constant 24 : index
    %c0_41 = arith.constant 0 : index
    %147 = vector.load %arg5[%c24_40, %c0_41] : memref<64x64xf32, #tpu.memory_space<vmem>>, vector<8x32xf32>
    tpu.vector_store %arg5[%c24_40, %c0_41], %146 {strides = array<i32>} : memref<64x64xf32, #tpu.memory_space<vmem>>, vector<8x32xf32>,
    %148 = vector.extract_strided_slice %145 {offsets = [0, 32], sizes = [8, 32], strides = [1, 1]} : vector<8x64xf32> to vector<8x32xf32>
    %c32_42 = arith.constant 32 : index
    %c32_43 = arith.constant 32 : index
    %149 = vector.load %arg5[%c32_42, %c32_43] : memref<64x64xf32, #tpu.memory_space<vmem>>, vector<8x32xf32>
    tpu.vector_store %arg5[%c32_42, %c32_43], %148 {strides = array<i32>} : memref<64x64xf32, #tpu.memory_space<vmem>>, vector<8x32xf32>,
    %c32_44 = arith.constant 32 : index
    %c0_45 = arith.constant 0 : index
    %150 = vector.load %arg4[%c32_44, %c0_45] : memref<64x192xf32, #tpu.memory_space<vmem>>, vector<8x192xf32>
    %151 = arith.truncf %145 : vector<8x64xf32> to vector<8x64xbf16>
    %cst_46 = arith.constant dense<0.000000e+00> : vector<8x192xf32>
    %152 = tpu.matmul %151, %7, %cst_46 {dimension_numbers = #tpu.dot_dimension_numbers<[1], [0], [0], [1], [0, 0, 1, 1], [], []>} : vector<8x64xbf16>, vector<64x192xbf16>, vector<8x192xf32> -> vector<8x192xf32>
    %153 = vector.broadcast %8 : vector<1x192xf32> to vector<8x192xf32>
    %154 = arith.addf %152, %153 : vector<8x192xf32>
    %155 = vector.extract_strided_slice %150 {offsets = [0, 0], sizes = [8, 64], strides = [1, 1]} : vector<8x192xf32> to vector<8x64xf32>
    %156 = vector.extract_strided_slice %154 {offsets = [0, 0], sizes = [8, 64], strides = [1, 1]} : vector<8x192xf32> to vector<8x64xf32>
    %157 = arith.addf %155, %156 : vector<8x64xf32>
    %158 = arith.negf %157 : vector<8x64xf32>
    %159 = math.exp %158 : vector<8x64xf32>
    %cst_47 = arith.constant 1.000000e+00 : f32
    %160 = vector.broadcast %cst_47 : f32 to vector<8x64xf32>
    %161 = arith.addf %160, %159 : vector<8x64xf32>
    %162 = arith.divf %160, %161 : vector<8x64xf32>
    %163 = vector.extract_strided_slice %150 {offsets = [0, 64], sizes = [8, 64], strides = [1, 1]} : vector<8x192xf32> to vector<8x64xf32>
    %164 = vector.extract_strided_slice %154 {offsets = [0, 64], sizes = [8, 64], strides = [1, 1]} : vector<8x192xf32> to vector<8x64xf32>
    %165 = arith.addf %163, %164 : vector<8x64xf32>
    %166 = arith.negf %165 : vector<8x64xf32>
    %167 = math.exp %166 : vector<8x64xf32>
    %cst_48 = arith.constant 1.000000e+00 : f32
    %168 = vector.broadcast %cst_48 : f32 to vector<8x64xf32>
    %169 = arith.addf %168, %167 : vector<8x64xf32>
    %170 = arith.divf %168, %169 : vector<8x64xf32>
    %171 = vector.extract_strided_slice %150 {offsets = [0, 128], sizes = [8, 64], strides = [1, 1]} : vector<8x192xf32> to vector<8x64xf32>
    %172 = vector.extract_strided_slice %154 {offsets = [0, 128], sizes = [8, 64], strides = [1, 1]} : vector<8x192xf32> to vector<8x64xf32>
    %173 = arith.mulf %162, %172 : vector<8x64xf32>
    %174 = arith.addf %171, %173 : vector<8x64xf32>
    %175 = math.tanh %174 : vector<8x64xf32>
    %cst_49 = arith.constant 1.000000e+00 : f32
    %176 = vector.broadcast %cst_49 : f32 to vector<8x64xf32>
    %177 = arith.subf %176, %170 : vector<8x64xf32>
    %178 = arith.mulf %177, %175 : vector<8x64xf32>
    %179 = arith.mulf %170, %145 : vector<8x64xf32>
    %180 = arith.addf %178, %179 : vector<8x64xf32>
    %181 = vector.extract_strided_slice %180 {offsets = [0, 0], sizes = [8, 32], strides = [1, 1]} : vector<8x64xf32> to vector<8x32xf32>
    %c32_50 = arith.constant 32 : index
    %c0_51 = arith.constant 0 : index
    %182 = vector.load %arg5[%c32_50, %c0_51] : memref<64x64xf32, #tpu.memory_space<vmem>>, vector<8x32xf32>
    tpu.vector_store %arg5[%c32_50, %c0_51], %181 {strides = array<i32>} : memref<64x64xf32, #tpu.memory_space<vmem>>, vector<8x32xf32>,
    %183 = vector.extract_strided_slice %180 {offsets = [0, 32], sizes = [8, 32], strides = [1, 1]} : vector<8x64xf32> to vector<8x32xf32>
    %c24_52 = arith.constant 24 : index
    %c32_53 = arith.constant 32 : index
    %184 = vector.load %arg5[%c24_52, %c32_53] : memref<64x64xf32, #tpu.memory_space<vmem>>, vector<8x32xf32>
    tpu.vector_store %arg5[%c24_52, %c32_53], %183 {strides = array<i32>} : memref<64x64xf32, #tpu.memory_space<vmem>>, vector<8x32xf32>,
    %c40_54 = arith.constant 40 : index
    %c0_55 = arith.constant 0 : index
    %185 = vector.load %arg4[%c40_54, %c0_55] : memref<64x192xf32, #tpu.memory_space<vmem>>, vector<8x192xf32>
    %186 = arith.truncf %180 : vector<8x64xf32> to vector<8x64xbf16>
    %cst_56 = arith.constant dense<0.000000e+00> : vector<8x192xf32>
    %187 = tpu.matmul %186, %7, %cst_56 {dimension_numbers = #tpu.dot_dimension_numbers<[1], [0], [0], [1], [0, 0, 1, 1], [], []>} : vector<8x64xbf16>, vector<64x192xbf16>, vector<8x192xf32> -> vector<8x192xf32>
    %188 = vector.broadcast %8 : vector<1x192xf32> to vector<8x192xf32>
    %189 = arith.addf %187, %188 : vector<8x192xf32>
    %190 = vector.extract_strided_slice %185 {offsets = [0, 0], sizes = [8, 64], strides = [1, 1]} : vector<8x192xf32> to vector<8x64xf32>
    %191 = vector.extract_strided_slice %189 {offsets = [0, 0], sizes = [8, 64], strides = [1, 1]} : vector<8x192xf32> to vector<8x64xf32>
    %192 = arith.addf %190, %191 : vector<8x64xf32>
    %193 = arith.negf %192 : vector<8x64xf32>
    %194 = math.exp %193 : vector<8x64xf32>
    %cst_57 = arith.constant 1.000000e+00 : f32
    %195 = vector.broadcast %cst_57 : f32 to vector<8x64xf32>
    %196 = arith.addf %195, %194 : vector<8x64xf32>
    %197 = arith.divf %195, %196 : vector<8x64xf32>
    %198 = vector.extract_strided_slice %185 {offsets = [0, 64], sizes = [8, 64], strides = [1, 1]} : vector<8x192xf32> to vector<8x64xf32>
    %199 = vector.extract_strided_slice %189 {offsets = [0, 64], sizes = [8, 64], strides = [1, 1]} : vector<8x192xf32> to vector<8x64xf32>
    %200 = arith.addf %198, %199 : vector<8x64xf32>
    %201 = arith.negf %200 : vector<8x64xf32>
    %202 = math.exp %201 : vector<8x64xf32>
    %cst_58 = arith.constant 1.000000e+00 : f32
    %203 = vector.broadcast %cst_58 : f32 to vector<8x64xf32>
    %204 = arith.addf %203, %202 : vector<8x64xf32>
    %205 = arith.divf %203, %204 : vector<8x64xf32>
    %206 = vector.extract_strided_slice %185 {offsets = [0, 128], sizes = [8, 64], strides = [1, 1]} : vector<8x192xf32> to vector<8x64xf32>
    %207 = vector.extract_strided_slice %189 {offsets = [0, 128], sizes = [8, 64], strides = [1, 1]} : vector<8x192xf32> to vector<8x64xf32>
    %208 = arith.mulf %197, %207 : vector<8x64xf32>
    %209 = arith.addf %206, %208 : vector<8x64xf32>
    %210 = math.tanh %209 : vector<8x64xf32>
    %cst_59 = arith.constant 1.000000e+00 : f32
    %211 = vector.broadcast %cst_59 : f32 to vector<8x64xf32>
    %212 = arith.subf %211, %205 : vector<8x64xf32>
    %213 = arith.mulf %212, %210 : vector<8x64xf32>
    %214 = arith.mulf %205, %180 : vector<8x64xf32>
    %215 = arith.addf %213, %214 : vector<8x64xf32>
    %216 = vector.extract_strided_slice %215 {offsets = [0, 0], sizes = [8, 32], strides = [1, 1]} : vector<8x64xf32> to vector<8x32xf32>
    %c40_60 = arith.constant 40 : index
    %c0_61 = arith.constant 0 : index
    %217 = vector.load %arg5[%c40_60, %c0_61] : memref<64x64xf32, #tpu.memory_space<vmem>>, vector<8x32xf32>
    tpu.vector_store %arg5[%c40_60, %c0_61], %216 {strides = array<i32>} : memref<64x64xf32, #tpu.memory_space<vmem>>, vector<8x32xf32>,
    %218 = vector.extract_strided_slice %215 {offsets = [0, 32], sizes = [8, 32], strides = [1, 1]} : vector<8x64xf32> to vector<8x32xf32>
    %c16_62 = arith.constant 16 : index
    %c32_63 = arith.constant 32 : index
    %219 = vector.load %arg5[%c16_62, %c32_63] : memref<64x64xf32, #tpu.memory_space<vmem>>, vector<8x32xf32>
    tpu.vector_store %arg5[%c16_62, %c32_63], %218 {strides = array<i32>} : memref<64x64xf32, #tpu.memory_space<vmem>>, vector<8x32xf32>,
    %c48_64 = arith.constant 48 : index
    %c0_65 = arith.constant 0 : index
    %220 = vector.load %arg4[%c48_64, %c0_65] : memref<64x192xf32, #tpu.memory_space<vmem>>, vector<8x192xf32>
    %221 = arith.truncf %215 : vector<8x64xf32> to vector<8x64xbf16>
    %cst_66 = arith.constant dense<0.000000e+00> : vector<8x192xf32>
    %222 = tpu.matmul %221, %7, %cst_66 {dimension_numbers = #tpu.dot_dimension_numbers<[1], [0], [0], [1], [0, 0, 1, 1], [], []>} : vector<8x64xbf16>, vector<64x192xbf16>, vector<8x192xf32> -> vector<8x192xf32>
    %223 = vector.broadcast %8 : vector<1x192xf32> to vector<8x192xf32>
    %224 = arith.addf %222, %223 : vector<8x192xf32>
    %225 = vector.extract_strided_slice %220 {offsets = [0, 0], sizes = [8, 64], strides = [1, 1]} : vector<8x192xf32> to vector<8x64xf32>
    %226 = vector.extract_strided_slice %224 {offsets = [0, 0], sizes = [8, 64], strides = [1, 1]} : vector<8x192xf32> to vector<8x64xf32>
    %227 = arith.addf %225, %226 : vector<8x64xf32>
    %228 = arith.negf %227 : vector<8x64xf32>
    %229 = math.exp %228 : vector<8x64xf32>
    %cst_67 = arith.constant 1.000000e+00 : f32
    %230 = vector.broadcast %cst_67 : f32 to vector<8x64xf32>
    %231 = arith.addf %230, %229 : vector<8x64xf32>
    %232 = arith.divf %230, %231 : vector<8x64xf32>
    %233 = vector.extract_strided_slice %220 {offsets = [0, 64], sizes = [8, 64], strides = [1, 1]} : vector<8x192xf32> to vector<8x64xf32>
    %234 = vector.extract_strided_slice %224 {offsets = [0, 64], sizes = [8, 64], strides = [1, 1]} : vector<8x192xf32> to vector<8x64xf32>
    %235 = arith.addf %233, %234 : vector<8x64xf32>
    %236 = arith.negf %235 : vector<8x64xf32>
    %237 = math.exp %236 : vector<8x64xf32>
    %cst_68 = arith.constant 1.000000e+00 : f32
    %238 = vector.broadcast %cst_68 : f32 to vector<8x64xf32>
    %239 = arith.addf %238, %237 : vector<8x64xf32>
    %240 = arith.divf %238, %239 : vector<8x64xf32>
    %241 = vector.extract_strided_slice %220 {offsets = [0, 128], sizes = [8, 64], strides = [1, 1]} : vector<8x192xf32> to vector<8x64xf32>
    %242 = vector.extract_strided_slice %224 {offsets = [0, 128], sizes = [8, 64], strides = [1, 1]} : vector<8x192xf32> to vector<8x64xf32>
    %243 = arith.mulf %232, %242 : vector<8x64xf32>
    %244 = arith.addf %241, %243 : vector<8x64xf32>
    %245 = math.tanh %244 : vector<8x64xf32>
    %cst_69 = arith.constant 1.000000e+00 : f32
    %246 = vector.broadcast %cst_69 : f32 to vector<8x64xf32>
    %247 = arith.subf %246, %240 : vector<8x64xf32>
    %248 = arith.mulf %247, %245 : vector<8x64xf32>
    %249 = arith.mulf %240, %215 : vector<8x64xf32>
    %250 = arith.addf %248, %249 : vector<8x64xf32>
    %251 = vector.extract_strided_slice %250 {offsets = [0, 0], sizes = [8, 32], strides = [1, 1]} : vector<8x64xf32> to vector<8x32xf32>
    %c48_70 = arith.constant 48 : index
    %c0_71 = arith.constant 0 : index
    %252 = vector.load %arg5[%c48_70, %c0_71] : memref<64x64xf32, #tpu.memory_space<vmem>>, vector<8x32xf32>
    tpu.vector_store %arg5[%c48_70, %c0_71], %251 {strides = array<i32>} : memref<64x64xf32, #tpu.memory_space<vmem>>, vector<8x32xf32>,
    %253 = vector.extract_strided_slice %250 {offsets = [0, 32], sizes = [8, 32], strides = [1, 1]} : vector<8x64xf32> to vector<8x32xf32>
    %c8_72 = arith.constant 8 : index
    %c32_73 = arith.constant 32 : index
    %254 = vector.load %arg5[%c8_72, %c32_73] : memref<64x64xf32, #tpu.memory_space<vmem>>, vector<8x32xf32>
    tpu.vector_store %arg5[%c8_72, %c32_73], %253 {strides = array<i32>} : memref<64x64xf32, #tpu.memory_space<vmem>>, vector<8x32xf32>,
    %c56_74 = arith.constant 56 : index
    %c0_75 = arith.constant 0 : index
    %255 = vector.load %arg4[%c56_74, %c0_75] : memref<64x192xf32, #tpu.memory_space<vmem>>, vector<8x192xf32>
    %256 = arith.truncf %250 : vector<8x64xf32> to vector<8x64xbf16>
    %cst_76 = arith.constant dense<0.000000e+00> : vector<8x192xf32>
    %257 = tpu.matmul %256, %7, %cst_76 {dimension_numbers = #tpu.dot_dimension_numbers<[1], [0], [0], [1], [0, 0, 1, 1], [], []>} : vector<8x64xbf16>, vector<64x192xbf16>, vector<8x192xf32> -> vector<8x192xf32>
    %258 = vector.broadcast %8 : vector<1x192xf32> to vector<8x192xf32>
    %259 = arith.addf %257, %258 : vector<8x192xf32>
    %260 = vector.extract_strided_slice %255 {offsets = [0, 0], sizes = [8, 64], strides = [1, 1]} : vector<8x192xf32> to vector<8x64xf32>
    %261 = vector.extract_strided_slice %259 {offsets = [0, 0], sizes = [8, 64], strides = [1, 1]} : vector<8x192xf32> to vector<8x64xf32>
    %262 = arith.addf %260, %261 : vector<8x64xf32>
    %263 = arith.negf %262 : vector<8x64xf32>
    %264 = math.exp %263 : vector<8x64xf32>
    %cst_77 = arith.constant 1.000000e+00 : f32
    %265 = vector.broadcast %cst_77 : f32 to vector<8x64xf32>
    %266 = arith.addf %265, %264 : vector<8x64xf32>
    %267 = arith.divf %265, %266 : vector<8x64xf32>
    %268 = vector.extract_strided_slice %255 {offsets = [0, 64], sizes = [8, 64], strides = [1, 1]} : vector<8x192xf32> to vector<8x64xf32>
    %269 = vector.extract_strided_slice %259 {offsets = [0, 64], sizes = [8, 64], strides = [1, 1]} : vector<8x192xf32> to vector<8x64xf32>
    %270 = arith.addf %268, %269 : vector<8x64xf32>
    %271 = arith.negf %270 : vector<8x64xf32>
    %272 = math.exp %271 : vector<8x64xf32>
    %cst_78 = arith.constant 1.000000e+00 : f32
    %273 = vector.broadcast %cst_78 : f32 to vector<8x64xf32>
    %274 = arith.addf %273, %272 : vector<8x64xf32>
    %275 = arith.divf %273, %274 : vector<8x64xf32>
    %276 = vector.extract_strided_slice %255 {offsets = [0, 128], sizes = [8, 64], strides = [1, 1]} : vector<8x192xf32> to vector<8x64xf32>
    %277 = vector.extract_strided_slice %259 {offsets = [0, 128], sizes = [8, 64], strides = [1, 1]} : vector<8x192xf32> to vector<8x64xf32>
    %278 = arith.mulf %267, %277 : vector<8x64xf32>
    %279 = arith.addf %276, %278 : vector<8x64xf32>
    %280 = math.tanh %279 : vector<8x64xf32>
    %cst_79 = arith.constant 1.000000e+00 : f32
    %281 = vector.broadcast %cst_79 : f32 to vector<8x64xf32>
    %282 = arith.subf %281, %275 : vector<8x64xf32>
    %283 = arith.mulf %282, %280 : vector<8x64xf32>
    %284 = arith.mulf %275, %250 : vector<8x64xf32>
    %285 = arith.addf %283, %284 : vector<8x64xf32>
    %286 = vector.extract_strided_slice %285 {offsets = [0, 0], sizes = [8, 32], strides = [1, 1]} : vector<8x64xf32> to vector<8x32xf32>
    %c56_80 = arith.constant 56 : index
    %c0_81 = arith.constant 0 : index
    %287 = vector.load %arg5[%c56_80, %c0_81] : memref<64x64xf32, #tpu.memory_space<vmem>>, vector<8x32xf32>
    tpu.vector_store %arg5[%c56_80, %c0_81], %286 {strides = array<i32>} : memref<64x64xf32, #tpu.memory_space<vmem>>, vector<8x32xf32>,
    %288 = vector.extract_strided_slice %285 {offsets = [0, 32], sizes = [8, 32], strides = [1, 1]} : vector<8x64xf32> to vector<8x32xf32>
    %c0_82 = arith.constant 0 : index
    %c32_83 = arith.constant 32 : index
    %289 = vector.load %arg5[%c0_82, %c32_83] : memref<64x64xf32, #tpu.memory_space<vmem>>, vector<8x32xf32>
    tpu.vector_store %arg5[%c0_82, %c32_83], %288 {strides = array<i32>} : memref<64x64xf32, #tpu.memory_space<vmem>>, vector<8x32xf32>,
    %290 = arith.truncf %285 : vector<8x64xf32> to vector<8x64xbf16>
    %c112 = arith.constant 112 : index
    %c0_84 = arith.constant 0 : index
    %291 = vector.load %arg1[%c112, %c0_84] : memref<656x480xbf16, #tpu.memory_space<vmem>>, vector<64x32xbf16>
    %cst_85 = arith.constant dense<0.000000e+00> : vector<8x32xf32>
    %292 = tpu.matmul %290, %291, %cst_85 {dimension_numbers = #tpu.dot_dimension_numbers<[1], [0], [0], [1], [0, 0, 1, 1], [], []>} : vector<8x64xbf16>, vector<64x32xbf16>, vector<8x32xf32> -> vector<8x32xf32>
    %c2 = arith.constant 2 : index
    %c0_86 = arith.constant 0 : index
    %293 = vector.load %arg2[%c2, %c0_86] : memref<8x480xf32, #tpu.memory_space<vmem>>, vector<1x32xf32>
    %294 = vector.broadcast %293 : vector<1x32xf32> to vector<8x32xf32>
    %295 = arith.addf %292, %294 : vector<8x32xf32>
    %c0_87 = arith.constant 0 : index
    %c0_88 = arith.constant 0 : index
    %296 = vector.load %arg5[%c0_87, %c0_88] : memref<64x64xf32, #tpu.memory_space<vmem>>, vector<64x64xf32>
    %297 = arith.truncf %296 : vector<64x64xf32> to vector<64x64xbf16>
    %c112_89 = arith.constant 112 : index
    %c32_90 = arith.constant 32 : index
    %298 = vector.load %arg1[%c112_89, %c32_90] : memref<656x480xbf16, #tpu.memory_space<vmem>>, vector<64x32xbf16>
    %cst_91 = arith.constant dense<0.000000e+00> : vector<64x32xf32>
    %299 = tpu.matmul %297, %298, %cst_91 {dimension_numbers = #tpu.dot_dimension_numbers<[1], [0], [0], [1], [0, 0, 1, 1], [], []>} : vector<64x64xbf16>, vector<64x32xbf16>, vector<64x32xf32> -> vector<64x32xf32>
    %c3 = arith.constant 3 : index
    %c0_92 = arith.constant 0 : index
    %300 = vector.load %arg2[%c3, %c0_92] : memref<8x480xf32, #tpu.memory_space<vmem>>, vector<1x32xf32>
    %301 = vector.broadcast %300 : vector<1x32xf32> to vector<64x32xf32>
    %302 = arith.addf %299, %301 : vector<64x32xf32>
    %303 = vector.extract_strided_slice %302 {offsets = [0, 0], sizes = [8, 32], strides = [1, 1]} : vector<64x32xf32> to vector<8x32xf32>
    %c0_93 = arith.constant 0 : index
    %c0_94 = arith.constant 0 : index
    %304 = vector.load %arg6[%c0_93, %c0_94] : memref<8x256xf32, #tpu.memory_space<vmem>>, vector<8x32xf32>
    tpu.vector_store %arg6[%c0_93, %c0_94], %303 {strides = array<i32>} : memref<8x256xf32, #tpu.memory_space<vmem>>, vector<8x32xf32>,
    %305 = vector.extract_strided_slice %302 {offsets = [8, 0], sizes = [8, 32], strides = [1, 1]} : vector<64x32xf32> to vector<8x32xf32>
    %c0_95 = arith.constant 0 : index
    %c32_96 = arith.constant 32 : index
    %306 = vector.load %arg6[%c0_95, %c32_96] : memref<8x256xf32, #tpu.memory_space<vmem>>, vector<8x32xf32>
    tpu.vector_store %arg6[%c0_95, %c32_96], %305 {strides = array<i32>} : memref<8x256xf32, #tpu.memory_space<vmem>>, vector<8x32xf32>,
    %307 = vector.extract_strided_slice %302 {offsets = [16, 0], sizes = [8, 32], strides = [1, 1]} : vector<64x32xf32> to vector<8x32xf32>
    %c0_97 = arith.constant 0 : index
    %c64 = arith.constant 64 : index
    %308 = vector.load %arg6[%c0_97, %c64] : memref<8x256xf32, #tpu.memory_space<vmem>>, vector<8x32xf32>
    tpu.vector_store %arg6[%c0_97, %c64], %307 {strides = array<i32>} : memref<8x256xf32, #tpu.memory_space<vmem>>, vector<8x32xf32>,
    %309 = vector.extract_strided_slice %302 {offsets = [24, 0], sizes = [8, 32], strides = [1, 1]} : vector<64x32xf32> to vector<8x32xf32>
    %c0_98 = arith.constant 0 : index
    %c96 = arith.constant 96 : index
    %310 = vector.load %arg6[%c0_98, %c96] : memref<8x256xf32, #tpu.memory_space<vmem>>, vector<8x32xf32>
    tpu.vector_store %arg6[%c0_98, %c96], %309 {strides = array<i32>} : memref<8x256xf32, #tpu.memory_space<vmem>>, vector<8x32xf32>,
    %311 = vector.extract_strided_slice %302 {offsets = [32, 0], sizes = [8, 32], strides = [1, 1]} : vector<64x32xf32> to vector<8x32xf32>
    %c0_99 = arith.constant 0 : index
    %c128 = arith.constant 128 : index
    %312 = vector.load %arg6[%c0_99, %c128] : memref<8x256xf32, #tpu.memory_space<vmem>>, vector<8x32xf32>
    tpu.vector_store %arg6[%c0_99, %c128], %311 {strides = array<i32>} : memref<8x256xf32, #tpu.memory_space<vmem>>, vector<8x32xf32>,
    %313 = vector.extract_strided_slice %302 {offsets = [40, 0], sizes = [8, 32], strides = [1, 1]} : vector<64x32xf32> to vector<8x32xf32>
    %c0_100 = arith.constant 0 : index
    %c160 = arith.constant 160 : index
    %314 = vector.load %arg6[%c0_100, %c160] : memref<8x256xf32, #tpu.memory_space<vmem>>, vector<8x32xf32>
    tpu.vector_store %arg6[%c0_100, %c160], %313 {strides = array<i32>} : memref<8x256xf32, #tpu.memory_space<vmem>>, vector<8x32xf32>,
    %315 = vector.extract_strided_slice %302 {offsets = [48, 0], sizes = [8, 32], strides = [1, 1]} : vector<64x32xf32> to vector<8x32xf32>
    %c0_101 = arith.constant 0 : index
    %c192 = arith.constant 192 : index
    %316 = vector.load %arg6[%c0_101, %c192] : memref<8x256xf32, #tpu.memory_space<vmem>>, vector<8x32xf32>
    tpu.vector_store %arg6[%c0_101, %c192], %315 {strides = array<i32>} : memref<8x256xf32, #tpu.memory_space<vmem>>, vector<8x32xf32>,
    %317 = vector.extract_strided_slice %302 {offsets = [56, 0], sizes = [8, 32], strides = [1, 1]} : vector<64x32xf32> to vector<8x32xf32>
    %c0_102 = arith.constant 0 : index
    %c224 = arith.constant 224 : index
    %318 = vector.load %arg6[%c0_102, %c224] : memref<8x256xf32, #tpu.memory_space<vmem>>, vector<8x32xf32>
    tpu.vector_store %arg6[%c0_102, %c224], %317 {strides = array<i32>} : memref<8x256xf32, #tpu.memory_space<vmem>>, vector<8x32xf32>,
    %319 = tpu.iota {dimensions = array<i32: 1>} : vector<8x128xi32>
    %c1_i32 = arith.constant 1 : i32
    %320 = vector.broadcast %c1_i32 : i32 to vector<8x128xi32>
    %321 = arith.cmpi eq, %319, %320 : vector<8x128xi32>
    %322 = arith.extui %321 : vector<8x128xi1> to vector<8x128xi32>
    %323 = arith.sitofp %322 : vector<8x128xi32> to vector<8x128xf32>
    %c5 = arith.constant 5 : index
    %c0_103 = arith.constant 0 : index
    %324 = vector.load %arg2[%c5, %c0_103] : memref<8x480xf32, #tpu.memory_space<vmem>>, vector<1x480xf32>
    %325 = arith.truncf %295 : vector<8x32xf32> to vector<8x32xbf16>
    %c624 = arith.constant 624 : index
    %c0_104 = arith.constant 0 : index
    %326 = vector.load %arg1[%c624, %c0_104] : memref<656x480xbf16, #tpu.memory_space<vmem>>, vector<32x480xbf16>
    %cst_105 = arith.constant dense<0.000000e+00> : vector<8x480xf32>
    %327 = tpu.matmul %325, %326, %cst_105 {dimension_numbers = #tpu.dot_dimension_numbers<[1], [0], [0], [1], [0, 0, 1, 1], [], []>} : vector<8x32xbf16>, vector<32x480xbf16>, vector<8x480xf32> -> vector<8x480xf32>
    %328 = vector.broadcast %324 : vector<1x480xf32> to vector<8x480xf32>
    %329 = arith.addf %327, %328 : vector<8x480xf32>
    %c0_106 = arith.constant 0 : index
    %c0_107 = arith.constant 0 : index
    %330 = vector.load %arg6[%c0_106, %c0_107] : memref<8x256xf32, #tpu.memory_space<vmem>>, vector<8x256xf32>
    %331 = vector.extract_strided_slice %329 {offsets = [0, 128], sizes = [8, 256], strides = [1, 1]} : vector<8x480xf32> to vector<8x256xf32>
    %332 = arith.addf %330, %331 : vector<8x256xf32>
    %333 = math.tanh %332 : vector<8x256xf32>
    %334 = arith.truncf %333 : vector<8x256xf32> to vector<8x256xbf16>
    %c176 = arith.constant 176 : index
    %c0_108 = arith.constant 0 : index
    %335 = vector.load %arg1[%c176, %c0_108] : memref<656x480xbf16, #tpu.memory_space<vmem>>, vector<256x8xbf16>
    %cst_109 = arith.constant dense<0.000000e+00> : vector<8x8xf32>
    %336 = tpu.matmul %334, %335, %cst_109 {dimension_numbers = #tpu.dot_dimension_numbers<[1], [0], [0], [1], [0, 0, 1, 1], [], []>} : vector<8x256xbf16>, vector<256x8xbf16>, vector<8x8xf32> -> vector<8x8xf32>
    %cst_110 = arith.constant dense<0xFF800000> : vector<8xf32>
    %337 = vector.multi_reduction <maximumf>, %336, %cst_110 [1] : vector<8x8xf32> to vector<8xf32>
    %338 = vector.shape_cast %337 : vector<8xf32> to vector<8x1xf32>
    %339 = vector.broadcast %338 : vector<8x1xf32> to vector<8x8xf32>
    %340 = arith.subf %336, %339 : vector<8x8xf32>
    %341 = math.exp %340 : vector<8x8xf32>
    %cst_111 = arith.constant dense<0.000000e+00> : vector<8xf32>
    %342 = vector.multi_reduction <add>, %341, %cst_111 [1] : vector<8x8xf32> to vector<8xf32>
    %343 = vector.shape_cast %342 : vector<8xf32> to vector<8x1xf32>
    %344 = vector.extract_strided_slice %341 {offsets = [0, 0], sizes = [8, 1], strides = [1, 1]} : vector<8x8xf32> to vector<8x1xf32>
    %c0_112 = arith.constant 0 : index
    %c0_113 = arith.constant 0 : index
    %345 = vector.load %arg5[%c0_112, %c0_113] : memref<64x64xf32, #tpu.memory_space<vmem>>, vector<8x64xf32>
    %346 = vector.broadcast %344 : vector<8x1xf32> to vector<8x64xf32>
    %347 = arith.mulf %346, %345 : vector<8x64xf32>
    %348 = vector.extract_strided_slice %341 {offsets = [0, 1], sizes = [8, 1], strides = [1, 1]} : vector<8x8xf32> to vector<8x1xf32>
    %c8_114 = arith.constant 8 : index
    %c0_115 = arith.constant 0 : index
    %349 = vector.load %arg5[%c8_114, %c0_115] : memref<64x64xf32, #tpu.memory_space<vmem>>, vector<8x64xf32>
    %350 = vector.broadcast %348 : vector<8x1xf32> to vector<8x64xf32>
    %351 = arith.mulf %350, %349 : vector<8x64xf32>
    %352 = vector.extract_strided_slice %341 {offsets = [0, 2], sizes = [8, 1], strides = [1, 1]} : vector<8x8xf32> to vector<8x1xf32>
    %c16_116 = arith.constant 16 : index
    %c0_117 = arith.constant 0 : index
    %353 = vector.load %arg5[%c16_116, %c0_117] : memref<64x64xf32, #tpu.memory_space<vmem>>, vector<8x64xf32>
    %354 = vector.broadcast %352 : vector<8x1xf32> to vector<8x64xf32>
    %355 = arith.mulf %354, %353 : vector<8x64xf32>
    %356 = vector.extract_strided_slice %341 {offsets = [0, 3], sizes = [8, 1], strides = [1, 1]} : vector<8x8xf32> to vector<8x1xf32>
    %c24_118 = arith.constant 24 : index
    %c0_119 = arith.constant 0 : index
    %357 = vector.load %arg5[%c24_118, %c0_119] : memref<64x64xf32, #tpu.memory_space<vmem>>, vector<8x64xf32>
    %358 = vector.broadcast %356 : vector<8x1xf32> to vector<8x64xf32>
    %359 = arith.mulf %358, %357 : vector<8x64xf32>
    %360 = vector.extract_strided_slice %341 {offsets = [0, 4], sizes = [8, 1], strides = [1, 1]} : vector<8x8xf32> to vector<8x1xf32>
    %c32_120 = arith.constant 32 : index
    %c0_121 = arith.constant 0 : index
    %361 = vector.load %arg5[%c32_120, %c0_121] : memref<64x64xf32, #tpu.memory_space<vmem>>, vector<8x64xf32>
    %362 = vector.broadcast %360 : vector<8x1xf32> to vector<8x64xf32>
    %363 = arith.mulf %362, %361 : vector<8x64xf32>
    %364 = vector.extract_strided_slice %341 {offsets = [0, 5], sizes = [8, 1], strides = [1, 1]} : vector<8x8xf32> to vector<8x1xf32>
    %c40_122 = arith.constant 40 : index
    %c0_123 = arith.constant 0 : index
    %365 = vector.load %arg5[%c40_122, %c0_123] : memref<64x64xf32, #tpu.memory_space<vmem>>, vector<8x64xf32>
    %366 = vector.broadcast %364 : vector<8x1xf32> to vector<8x64xf32>
    %367 = arith.mulf %366, %365 : vector<8x64xf32>
    %368 = vector.extract_strided_slice %341 {offsets = [0, 6], sizes = [8, 1], strides = [1, 1]} : vector<8x8xf32> to vector<8x1xf32>
    %c48_124 = arith.constant 48 : index
    %c0_125 = arith.constant 0 : index
    %369 = vector.load %arg5[%c48_124, %c0_125] : memref<64x64xf32, #tpu.memory_space<vmem>>, vector<8x64xf32>
    %370 = vector.broadcast %368 : vector<8x1xf32> to vector<8x64xf32>
    %371 = arith.mulf %370, %369 : vector<8x64xf32>
    %372 = vector.extract_strided_slice %341 {offsets = [0, 7], sizes = [8, 1], strides = [1, 1]} : vector<8x8xf32> to vector<8x1xf32>
    %c56_126 = arith.constant 56 : index
    %c0_127 = arith.constant 0 : index
    %373 = vector.load %arg5[%c56_126, %c0_127] : memref<64x64xf32, #tpu.memory_space<vmem>>, vector<8x64xf32>
    %374 = vector.broadcast %372 : vector<8x1xf32> to vector<8x64xf32>
    %375 = arith.mulf %374, %373 : vector<8x64xf32>
    %376 = arith.addf %347, %351 : vector<8x64xf32>
    %377 = arith.addf %355, %359 : vector<8x64xf32>
    %378 = arith.addf %363, %367 : vector<8x64xf32>
    %379 = arith.addf %371, %375 : vector<8x64xf32>
    %380 = arith.addf %376, %377 : vector<8x64xf32>
    %381 = arith.addf %378, %379 : vector<8x64xf32>
    %382 = arith.addf %380, %381 : vector<8x64xf32>
    %383 = vector.broadcast %343 : vector<8x1xf32> to vector<8x64xf32>
    %384 = arith.divf %382, %383 : vector<8x64xf32>
    %385 = arith.truncf %323 : vector<8x128xf32> to vector<8x128xbf16>
    %c432 = arith.constant 432 : index
    %c0_128 = arith.constant 0 : index
    %386 = vector.load %arg1[%c432, %c0_128] : memref<656x480xbf16, #tpu.memory_space<vmem>>, vector<128x224xbf16>
    %cst_129 = arith.constant dense<0.000000e+00> : vector<8x224xf32>
    %387 = tpu.matmul %385, %386, %cst_129 {dimension_numbers = #tpu.dot_dimension_numbers<[1], [0], [0], [1], [0, 0, 1, 1], [], []>} : vector<8x128xbf16>, vector<128x224xbf16>, vector<8x224xf32> -> vector<8x224xf32>
    %388 = arith.truncf %384 : vector<8x64xf32> to vector<8x64xbf16>
    %c560 = arith.constant 560 : index
    %c0_130 = arith.constant 0 : index
    %389 = vector.load %arg1[%c560, %c0_130] : memref<656x480xbf16, #tpu.memory_space<vmem>>, vector<64x224xbf16>
    %cst_131 = arith.constant dense<0.000000e+00> : vector<8x224xf32>
    %390 = tpu.matmul %388, %389, %cst_131 {dimension_numbers = #tpu.dot_dimension_numbers<[1], [0], [0], [1], [0, 0, 1, 1], [], []>} : vector<8x64xbf16>, vector<64x224xbf16>, vector<8x224xf32> -> vector<8x224xf32>
    %391 = vector.extract_strided_slice %387 {offsets = [0, 0], sizes = [8, 96], strides = [1, 1]} : vector<8x224xf32> to vector<8x96xf32>
    %392 = vector.extract_strided_slice %390 {offsets = [0, 0], sizes = [8, 96], strides = [1, 1]} : vector<8x224xf32> to vector<8x96xf32>
    %393 = arith.addf %391, %392 : vector<8x96xf32>
    %c4 = arith.constant 4 : index
    %c0_132 = arith.constant 0 : index
    %394 = vector.load %arg2[%c4, %c0_132] : memref<8x480xf32, #tpu.memory_space<vmem>>, vector<1x96xf32>
    %395 = vector.broadcast %394 : vector<1x96xf32> to vector<8x96xf32>
    %396 = arith.addf %393, %395 : vector<8x96xf32>
    %397 = vector.extract_strided_slice %329 {offsets = [0, 384], sizes = [8, 96], strides = [1, 1]} : vector<8x480xf32> to vector<8x96xf32>
    %398 = vector.extract_strided_slice %396 {offsets = [0, 0], sizes = [8, 32], strides = [1, 1]} : vector<8x96xf32> to vector<8x32xf32>
    %399 = vector.extract_strided_slice %397 {offsets = [0, 0], sizes = [8, 32], strides = [1, 1]} : vector<8x96xf32> to vector<8x32xf32>
    %400 = arith.addf %398, %399 : vector<8x32xf32>
    %401 = arith.negf %400 : vector<8x32xf32>
    %402 = math.exp %401 : vector<8x32xf32>
    %cst_133 = arith.constant 1.000000e+00 : f32
    %403 = vector.broadcast %cst_133 : f32 to vector<8x32xf32>
    %404 = arith.addf %403, %402 : vector<8x32xf32>
    %405 = arith.divf %403, %404 : vector<8x32xf32>
    %406 = vector.extract_strided_slice %396 {offsets = [0, 32], sizes = [8, 32], strides = [1, 1]} : vector<8x96xf32> to vector<8x32xf32>
    %407 = vector.extract_strided_slice %397 {offsets = [0, 32], sizes = [8, 32], strides = [1, 1]} : vector<8x96xf32> to vector<8x32xf32>
    %408 = arith.addf %406, %407 : vector<8x32xf32>
    %409 = arith.negf %408 : vector<8x32xf32>
    %410 = math.exp %409 : vector<8x32xf32>
    %cst_134 = arith.constant 1.000000e+00 : f32
    %411 = vector.broadcast %cst_134 : f32 to vector<8x32xf32>
    %412 = arith.addf %411, %410 : vector<8x32xf32>
    %413 = arith.divf %411, %412 : vector<8x32xf32>
    %414 = vector.extract_strided_slice %396 {offsets = [0, 64], sizes = [8, 32], strides = [1, 1]} : vector<8x96xf32> to vector<8x32xf32>
    %415 = vector.extract_strided_slice %397 {offsets = [0, 64], sizes = [8, 32], strides = [1, 1]} : vector<8x96xf32> to vector<8x32xf32>
    %416 = arith.mulf %405, %415 : vector<8x32xf32>
    %417 = arith.addf %414, %416 : vector<8x32xf32>
    %418 = math.tanh %417 : vector<8x32xf32>
    %cst_135 = arith.constant 1.000000e+00 : f32
    %419 = vector.broadcast %cst_135 : f32 to vector<8x32xf32>
    %420 = arith.subf %419, %413 : vector<8x32xf32>
    %421 = arith.mulf %420, %418 : vector<8x32xf32>
    %422 = arith.mulf %413, %295 : vector<8x32xf32>
    %423 = arith.addf %421, %422 : vector<8x32xf32>
    %424 = arith.truncf %423 : vector<8x32xf32> to vector<8x32xbf16>
    %c624_136 = arith.constant 624 : index
    %c0_137 = arith.constant 0 : index
    %425 = vector.load %arg1[%c624_136, %c0_137] : memref<656x480xbf16, #tpu.memory_space<vmem>>, vector<32x480xbf16>
    %cst_138 = arith.constant dense<0.000000e+00> : vector<8x480xf32>
    %426 = tpu.matmul %424, %425, %cst_138 {dimension_numbers = #tpu.dot_dimension_numbers<[1], [0], [0], [1], [0, 0, 1, 1], [], []>} : vector<8x32xbf16>, vector<32x480xbf16>, vector<8x480xf32> -> vector<8x480xf32>
    %427 = vector.broadcast %324 : vector<1x480xf32> to vector<8x480xf32>
    %428 = arith.addf %426, %427 : vector<8x480xf32>
    %429 = vector.extract_strided_slice %428 {offsets = [0, 0], sizes = [8, 128], strides = [1, 1]} : vector<8x480xf32> to vector<8x128xf32>
    %430 = vector.extract_strided_slice %387 {offsets = [0, 96], sizes = [8, 128], strides = [1, 1]} : vector<8x224xf32> to vector<8x128xf32>
    %431 = arith.addf %429, %430 : vector<8x128xf32>
    %432 = vector.extract_strided_slice %390 {offsets = [0, 96], sizes = [8, 128], strides = [1, 1]} : vector<8x224xf32> to vector<8x128xf32>
    %433 = arith.addf %431, %432 : vector<8x128xf32>
    %c0_139 = arith.constant 0 : index
    %c0_140 = arith.constant 0 : index
    %c0_141 = arith.constant 0 : index
    %434 = vector.load %arg3[%c0_139, %c0_140, %c0_141] : memref<6x8x128xf32, #tpu.memory_space<vmem>>, vector<1x8x128xf32>
    %435 = vector.shape_cast %434 : vector<1x8x128xf32> to vector<8x128xf32>
    %436 = vector.shape_cast %433 : vector<8x128xf32> to vector<1x8x128xf32>
    tpu.vector_store %arg3[%c0_139, %c0_140, %c0_141], %436 {strides = array<i32>} : memref<6x8x128xf32, #tpu.memory_space<vmem>>, vector<1x8x128xf32>,
    %cst_142 = arith.constant dense<0xFF800000> : vector<8xf32>
    %437 = vector.multi_reduction <maximumf>, %433, %cst_142 [1] : vector<8x128xf32> to vector<8xf32>
    %438 = vector.shape_cast %437 : vector<8xf32> to vector<8x1xf32>
    %439 = vector.broadcast %438 : vector<8x1xf32> to vector<8x128xf32>
    %440 = arith.cmpf oeq, %433, %439 : vector<8x128xf32>
    %c128_i32 = arith.constant 128 : i32
    %441 = vector.broadcast %c128_i32 : i32 to vector<8x128xi32>
    %442 = arith.select %440, %319, %441 : vector<8x128xi1>, vector<8x128xi32>
    %cst_143 = arith.constant dense<2147483647> : vector<8xi32>
    %443 = vector.multi_reduction <minsi>, %442, %cst_143 [1] : vector<8x128xi32> to vector<8xi32>
    %444 = vector.shape_cast %443 : vector<8xi32> to vector<8x1xi32>
    %445 = vector.broadcast %444 : vector<8x1xi32> to vector<8x128xi32>
    %446 = arith.cmpi eq, %319, %445 : vector<8x128xi32>
    %447 = arith.extui %446 : vector<8x128xi1> to vector<8x128xi32>
    %448 = arith.sitofp %447 : vector<8x128xi32> to vector<8x128xf32>
    %c0_144 = arith.constant 0 : index
    %c0_145 = arith.constant 0 : index
    %449 = vector.load %arg6[%c0_144, %c0_145] : memref<8x256xf32, #tpu.memory_space<vmem>>, vector<8x256xf32>
    %450 = vector.extract_strided_slice %428 {offsets = [0, 128], sizes = [8, 256], strides = [1, 1]} : vector<8x480xf32> to vector<8x256xf32>
    %451 = arith.addf %449, %450 : vector<8x256xf32>
    %452 = math.tanh %451 : vector<8x256xf32>
    %453 = arith.truncf %452 : vector<8x256xf32> to vector<8x256xbf16>
    %c176_146 = arith.constant 176 : index
    %c0_147 = arith.constant 0 : index
    %454 = vector.load %arg1[%c176_146, %c0_147] : memref<656x480xbf16, #tpu.memory_space<vmem>>, vector<256x8xbf16>
    %cst_148 = arith.constant dense<0.000000e+00> : vector<8x8xf32>
    %455 = tpu.matmul %453, %454, %cst_148 {dimension_numbers = #tpu.dot_dimension_numbers<[1], [0], [0], [1], [0, 0, 1, 1], [], []>} : vector<8x256xbf16>, vector<256x8xbf16>, vector<8x8xf32> -> vector<8x8xf32>
    %cst_149 = arith.constant dense<0xFF800000> : vector<8xf32>
    %456 = vector.multi_reduction <maximumf>, %455, %cst_149 [1] : vector<8x8xf32> to vector<8xf32>
    %457 = vector.shape_cast %456 : vector<8xf32> to vector<8x1xf32>
    %458 = vector.broadcast %457 : vector<8x1xf32> to vector<8x8xf32>
    %459 = arith.subf %455, %458 : vector<8x8xf32>
    %460 = math.exp %459 : vector<8x8xf32>
    %cst_150 = arith.constant dense<0.000000e+00> : vector<8xf32>
    %461 = vector.multi_reduction <add>, %460, %cst_150 [1] : vector<8x8xf32> to vector<8xf32>
    %462 = vector.shape_cast %461 : vector<8xf32> to vector<8x1xf32>
    %463 = vector.extract_strided_slice %460 {offsets = [0, 0], sizes = [8, 1], strides = [1, 1]} : vector<8x8xf32> to vector<8x1xf32>
    %c0_151 = arith.constant 0 : index
    %c0_152 = arith.constant 0 : index
    %464 = vector.load %arg5[%c0_151, %c0_152] : memref<64x64xf32, #tpu.memory_space<vmem>>, vector<8x64xf32>
    %465 = vector.broadcast %463 : vector<8x1xf32> to vector<8x64xf32>
    %466 = arith.mulf %465, %464 : vector<8x64xf32>
    %467 = vector.extract_strided_slice %460 {offsets = [0, 1], sizes = [8, 1], strides = [1, 1]} : vector<8x8xf32> to vector<8x1xf32>
    %c8_153 = arith.constant 8 : index
    %c0_154 = arith.constant 0 : index
    %468 = vector.load %arg5[%c8_153, %c0_154] : memref<64x64xf32, #tpu.memory_space<vmem>>, vector<8x64xf32>
    %469 = vector.broadcast %467 : vector<8x1xf32> to vector<8x64xf32>
    %470 = arith.mulf %469, %468 : vector<8x64xf32>
    %471 = vector.extract_strided_slice %460 {offsets = [0, 2], sizes = [8, 1], strides = [1, 1]} : vector<8x8xf32> to vector<8x1xf32>
    %c16_155 = arith.constant 16 : index
    %c0_156 = arith.constant 0 : index
    %472 = vector.load %arg5[%c16_155, %c0_156] : memref<64x64xf32, #tpu.memory_space<vmem>>, vector<8x64xf32>
    %473 = vector.broadcast %471 : vector<8x1xf32> to vector<8x64xf32>
    %474 = arith.mulf %473, %472 : vector<8x64xf32>
    %475 = vector.extract_strided_slice %460 {offsets = [0, 3], sizes = [8, 1], strides = [1, 1]} : vector<8x8xf32> to vector<8x1xf32>
    %c24_157 = arith.constant 24 : index
    %c0_158 = arith.constant 0 : index
    %476 = vector.load %arg5[%c24_157, %c0_158] : memref<64x64xf32, #tpu.memory_space<vmem>>, vector<8x64xf32>
    %477 = vector.broadcast %475 : vector<8x1xf32> to vector<8x64xf32>
    %478 = arith.mulf %477, %476 : vector<8x64xf32>
    %479 = vector.extract_strided_slice %460 {offsets = [0, 4], sizes = [8, 1], strides = [1, 1]} : vector<8x8xf32> to vector<8x1xf32>
    %c32_159 = arith.constant 32 : index
    %c0_160 = arith.constant 0 : index
    %480 = vector.load %arg5[%c32_159, %c0_160] : memref<64x64xf32, #tpu.memory_space<vmem>>, vector<8x64xf32>
    %481 = vector.broadcast %479 : vector<8x1xf32> to vector<8x64xf32>
    %482 = arith.mulf %481, %480 : vector<8x64xf32>
    %483 = vector.extract_strided_slice %460 {offsets = [0, 5], sizes = [8, 1], strides = [1, 1]} : vector<8x8xf32> to vector<8x1xf32>
    %c40_161 = arith.constant 40 : index
    %c0_162 = arith.constant 0 : index
    %484 = vector.load %arg5[%c40_161, %c0_162] : memref<64x64xf32, #tpu.memory_space<vmem>>, vector<8x64xf32>
    %485 = vector.broadcast %483 : vector<8x1xf32> to vector<8x64xf32>
    %486 = arith.mulf %485, %484 : vector<8x64xf32>
    %487 = vector.extract_strided_slice %460 {offsets = [0, 6], sizes = [8, 1], strides = [1, 1]} : vector<8x8xf32> to vector<8x1xf32>
    %c48_163 = arith.constant 48 : index
    %c0_164 = arith.constant 0 : index
    %488 = vector.load %arg5[%c48_163, %c0_164] : memref<64x64xf32, #tpu.memory_space<vmem>>, vector<8x64xf32>
    %489 = vector.broadcast %487 : vector<8x1xf32> to vector<8x64xf32>
    %490 = arith.mulf %489, %488 : vector<8x64xf32>
    %491 = vector.extract_strided_slice %460 {offsets = [0, 7], sizes = [8, 1], strides = [1, 1]} : vector<8x8xf32> to vector<8x1xf32>
    %c56_165 = arith.constant 56 : index
    %c0_166 = arith.constant 0 : index
    %492 = vector.load %arg5[%c56_165, %c0_166] : memref<64x64xf32, #tpu.memory_space<vmem>>, vector<8x64xf32>
    %493 = vector.broadcast %491 : vector<8x1xf32> to vector<8x64xf32>
    %494 = arith.mulf %493, %492 : vector<8x64xf32>
    %495 = arith.addf %466, %470 : vector<8x64xf32>
    %496 = arith.addf %474, %478 : vector<8x64xf32>
    %497 = arith.addf %482, %486 : vector<8x64xf32>
    %498 = arith.addf %490, %494 : vector<8x64xf32>
    %499 = arith.addf %495, %496 : vector<8x64xf32>
    %500 = arith.addf %497, %498 : vector<8x64xf32>
    %501 = arith.addf %499, %500 : vector<8x64xf32>
    %502 = vector.broadcast %462 : vector<8x1xf32> to vector<8x64xf32>
    %503 = arith.divf %501, %502 : vector<8x64xf32>
    %504 = arith.truncf %448 : vector<8x128xf32> to vector<8x128xbf16>
    %c432_167 = arith.constant 432 : index
    %c0_168 = arith.constant 0 : index
    %505 = vector.load %arg1[%c432_167, %c0_168] : memref<656x480xbf16, #tpu.memory_space<vmem>>, vector<128x224xbf16>
    %cst_169 = arith.constant dense<0.000000e+00> : vector<8x224xf32>
    %506 = tpu.matmul %504, %505, %cst_169 {dimension_numbers = #tpu.dot_dimension_numbers<[1], [0], [0], [1], [0, 0, 1, 1], [], []>} : vector<8x128xbf16>, vector<128x224xbf16>, vector<8x224xf32> -> vector<8x224xf32>
    %507 = arith.truncf %503 : vector<8x64xf32> to vector<8x64xbf16>
    %c560_170 = arith.constant 560 : index
    %c0_171 = arith.constant 0 : index
    %508 = vector.load %arg1[%c560_170, %c0_171] : memref<656x480xbf16, #tpu.memory_space<vmem>>, vector<64x224xbf16>
    %cst_172 = arith.constant dense<0.000000e+00> : vector<8x224xf32>
    %509 = tpu.matmul %507, %508, %cst_172 {dimension_numbers = #tpu.dot_dimension_numbers<[1], [0], [0], [1], [0, 0, 1, 1], [], []>} : vector<8x64xbf16>, vector<64x224xbf16>, vector<8x224xf32> -> vector<8x224xf32>
    %510 = vector.extract_strided_slice %506 {offsets = [0, 0], sizes = [8, 96], strides = [1, 1]} : vector<8x224xf32> to vector<8x96xf32>
    %511 = vector.extract_strided_slice %509 {offsets = [0, 0], sizes = [8, 96], strides = [1, 1]} : vector<8x224xf32> to vector<8x96xf32>
    %512 = arith.addf %510, %511 : vector<8x96xf32>
    %c4_173 = arith.constant 4 : index
    %c0_174 = arith.constant 0 : index
    %513 = vector.load %arg2[%c4_173, %c0_174] : memref<8x480xf32, #tpu.memory_space<vmem>>, vector<1x96xf32>
    %514 = vector.broadcast %513 : vector<1x96xf32> to vector<8x96xf32>
    %515 = arith.addf %512, %514 : vector<8x96xf32>
    %516 = vector.extract_strided_slice %428 {offsets = [0, 384], sizes = [8, 96], strides = [1, 1]} : vector<8x480xf32> to vector<8x96xf32>
    %517 = vector.extract_strided_slice %515 {offsets = [0, 0], sizes = [8, 32], strides = [1, 1]} : vector<8x96xf32> to vector<8x32xf32>
    %518 = vector.extract_strided_slice %516 {offsets = [0, 0], sizes = [8, 32], strides = [1, 1]} : vector<8x96xf32> to vector<8x32xf32>
    %519 = arith.addf %517, %518 : vector<8x32xf32>
    %520 = arith.negf %519 : vector<8x32xf32>
    %521 = math.exp %520 : vector<8x32xf32>
    %cst_175 = arith.constant 1.000000e+00 : f32
    %522 = vector.broadcast %cst_175 : f32 to vector<8x32xf32>
    %523 = arith.addf %522, %521 : vector<8x32xf32>
    %524 = arith.divf %522, %523 : vector<8x32xf32>
    %525 = vector.extract_strided_slice %515 {offsets = [0, 32], sizes = [8, 32], strides = [1, 1]} : vector<8x96xf32> to vector<8x32xf32>
    %526 = vector.extract_strided_slice %516 {offsets = [0, 32], sizes = [8, 32], strides = [1, 1]} : vector<8x96xf32> to vector<8x32xf32>
    %527 = arith.addf %525, %526 : vector<8x32xf32>
    %528 = arith.negf %527 : vector<8x32xf32>
    %529 = math.exp %528 : vector<8x32xf32>
    %cst_176 = arith.constant 1.000000e+00 : f32
    %530 = vector.broadcast %cst_176 : f32 to vector<8x32xf32>
    %531 = arith.addf %530, %529 : vector<8x32xf32>
    %532 = arith.divf %530, %531 : vector<8x32xf32>
    %533 = vector.extract_strided_slice %515 {offsets = [0, 64], sizes = [8, 32], strides = [1, 1]} : vector<8x96xf32> to vector<8x32xf32>
    %534 = vector.extract_strided_slice %516 {offsets = [0, 64], sizes = [8, 32], strides = [1, 1]} : vector<8x96xf32> to vector<8x32xf32>
    %535 = arith.mulf %524, %534 : vector<8x32xf32>
    %536 = arith.addf %533, %535 : vector<8x32xf32>
    %537 = math.tanh %536 : vector<8x32xf32>
    %cst_177 = arith.constant 1.000000e+00 : f32
    %538 = vector.broadcast %cst_177 : f32 to vector<8x32xf32>
    %539 = arith.subf %538, %532 : vector<8x32xf32>
    %540 = arith.mulf %539, %537 : vector<8x32xf32>
    %541 = arith.mulf %532, %423 : vector<8x32xf32>
    %542 = arith.addf %540, %541 : vector<8x32xf32>
    %543 = arith.truncf %542 : vector<8x32xf32> to vector<8x32xbf16>
    %c624_178 = arith.constant 624 : index
    %c0_179 = arith.constant 0 : index
    %544 = vector.load %arg1[%c624_178, %c0_179] : memref<656x480xbf16, #tpu.memory_space<vmem>>, vector<32x480xbf16>
    %cst_180 = arith.constant dense<0.000000e+00> : vector<8x480xf32>
    %545 = tpu.matmul %543, %544, %cst_180 {dimension_numbers = #tpu.dot_dimension_numbers<[1], [0], [0], [1], [0, 0, 1, 1], [], []>} : vector<8x32xbf16>, vector<32x480xbf16>, vector<8x480xf32> -> vector<8x480xf32>
    %546 = vector.broadcast %324 : vector<1x480xf32> to vector<8x480xf32>
    %547 = arith.addf %545, %546 : vector<8x480xf32>
    %548 = vector.extract_strided_slice %547 {offsets = [0, 0], sizes = [8, 128], strides = [1, 1]} : vector<8x480xf32> to vector<8x128xf32>
    %549 = vector.extract_strided_slice %506 {offsets = [0, 96], sizes = [8, 128], strides = [1, 1]} : vector<8x224xf32> to vector<8x128xf32>
    %550 = arith.addf %548, %549 : vector<8x128xf32>
    %551 = vector.extract_strided_slice %509 {offsets = [0, 96], sizes = [8, 128], strides = [1, 1]} : vector<8x224xf32> to vector<8x128xf32>
    %552 = arith.addf %550, %551 : vector<8x128xf32>
    %c1_181 = arith.constant 1 : index
    %c0_182 = arith.constant 0 : index
    %c0_183 = arith.constant 0 : index
    %553 = vector.load %arg3[%c1_181, %c0_182, %c0_183] : memref<6x8x128xf32, #tpu.memory_space<vmem>>, vector<1x8x128xf32>
    %554 = vector.shape_cast %553 : vector<1x8x128xf32> to vector<8x128xf32>
    %555 = vector.shape_cast %552 : vector<8x128xf32> to vector<1x8x128xf32>
    tpu.vector_store %arg3[%c1_181, %c0_182, %c0_183], %555 {strides = array<i32>} : memref<6x8x128xf32, #tpu.memory_space<vmem>>, vector<1x8x128xf32>,
    %cst_184 = arith.constant dense<0xFF800000> : vector<8xf32>
    %556 = vector.multi_reduction <maximumf>, %552, %cst_184 [1] : vector<8x128xf32> to vector<8xf32>
    %557 = vector.shape_cast %556 : vector<8xf32> to vector<8x1xf32>
    %558 = vector.broadcast %557 : vector<8x1xf32> to vector<8x128xf32>
    %559 = arith.cmpf oeq, %552, %558 : vector<8x128xf32>
    %c128_i32_185 = arith.constant 128 : i32
    %560 = vector.broadcast %c128_i32_185 : i32 to vector<8x128xi32>
    %561 = arith.select %559, %319, %560 : vector<8x128xi1>, vector<8x128xi32>
    %cst_186 = arith.constant dense<2147483647> : vector<8xi32>
    %562 = vector.multi_reduction <minsi>, %561, %cst_186 [1] : vector<8x128xi32> to vector<8xi32>
    %563 = vector.shape_cast %562 : vector<8xi32> to vector<8x1xi32>
    %564 = vector.broadcast %563 : vector<8x1xi32> to vector<8x128xi32>
    %565 = arith.cmpi eq, %319, %564 : vector<8x128xi32>
    %566 = arith.extui %565 : vector<8x128xi1> to vector<8x128xi32>
    %567 = arith.sitofp %566 : vector<8x128xi32> to vector<8x128xf32>
    %c0_187 = arith.constant 0 : index
    %c0_188 = arith.constant 0 : index
    %568 = vector.load %arg6[%c0_187, %c0_188] : memref<8x256xf32, #tpu.memory_space<vmem>>, vector<8x256xf32>
    %569 = vector.extract_strided_slice %547 {offsets = [0, 128], sizes = [8, 256], strides = [1, 1]} : vector<8x480xf32> to vector<8x256xf32>
    %570 = arith.addf %568, %569 : vector<8x256xf32>
    %571 = math.tanh %570 : vector<8x256xf32>
    %572 = arith.truncf %571 : vector<8x256xf32> to vector<8x256xbf16>
    %c176_189 = arith.constant 176 : index
    %c0_190 = arith.constant 0 : index
    %573 = vector.load %arg1[%c176_189, %c0_190] : memref<656x480xbf16, #tpu.memory_space<vmem>>, vector<256x8xbf16>
    %cst_191 = arith.constant dense<0.000000e+00> : vector<8x8xf32>
    %574 = tpu.matmul %572, %573, %cst_191 {dimension_numbers = #tpu.dot_dimension_numbers<[1], [0], [0], [1], [0, 0, 1, 1], [], []>} : vector<8x256xbf16>, vector<256x8xbf16>, vector<8x8xf32> -> vector<8x8xf32>
    %cst_192 = arith.constant dense<0xFF800000> : vector<8xf32>
    %575 = vector.multi_reduction <maximumf>, %574, %cst_192 [1] : vector<8x8xf32> to vector<8xf32>
    %576 = vector.shape_cast %575 : vector<8xf32> to vector<8x1xf32>
    %577 = vector.broadcast %576 : vector<8x1xf32> to vector<8x8xf32>
    %578 = arith.subf %574, %577 : vector<8x8xf32>
    %579 = math.exp %578 : vector<8x8xf32>
    %cst_193 = arith.constant dense<0.000000e+00> : vector<8xf32>
    %580 = vector.multi_reduction <add>, %579, %cst_193 [1] : vector<8x8xf32> to vector<8xf32>
    %581 = vector.shape_cast %580 : vector<8xf32> to vector<8x1xf32>
    %582 = vector.extract_strided_slice %579 {offsets = [0, 0], sizes = [8, 1], strides = [1, 1]} : vector<8x8xf32> to vector<8x1xf32>
    %c0_194 = arith.constant 0 : index
    %c0_195 = arith.constant 0 : index
    %583 = vector.load %arg5[%c0_194, %c0_195] : memref<64x64xf32, #tpu.memory_space<vmem>>, vector<8x64xf32>
    %584 = vector.broadcast %582 : vector<8x1xf32> to vector<8x64xf32>
    %585 = arith.mulf %584, %583 : vector<8x64xf32>
    %586 = vector.extract_strided_slice %579 {offsets = [0, 1], sizes = [8, 1], strides = [1, 1]} : vector<8x8xf32> to vector<8x1xf32>
    %c8_196 = arith.constant 8 : index
    %c0_197 = arith.constant 0 : index
    %587 = vector.load %arg5[%c8_196, %c0_197] : memref<64x64xf32, #tpu.memory_space<vmem>>, vector<8x64xf32>
    %588 = vector.broadcast %586 : vector<8x1xf32> to vector<8x64xf32>
    %589 = arith.mulf %588, %587 : vector<8x64xf32>
    %590 = vector.extract_strided_slice %579 {offsets = [0, 2], sizes = [8, 1], strides = [1, 1]} : vector<8x8xf32> to vector<8x1xf32>
    %c16_198 = arith.constant 16 : index
    %c0_199 = arith.constant 0 : index
    %591 = vector.load %arg5[%c16_198, %c0_199] : memref<64x64xf32, #tpu.memory_space<vmem>>, vector<8x64xf32>
    %592 = vector.broadcast %590 : vector<8x1xf32> to vector<8x64xf32>
    %593 = arith.mulf %592, %591 : vector<8x64xf32>
    %594 = vector.extract_strided_slice %579 {offsets = [0, 3], sizes = [8, 1], strides = [1, 1]} : vector<8x8xf32> to vector<8x1xf32>
    %c24_200 = arith.constant 24 : index
    %c0_201 = arith.constant 0 : index
    %595 = vector.load %arg5[%c24_200, %c0_201] : memref<64x64xf32, #tpu.memory_space<vmem>>, vector<8x64xf32>
    %596 = vector.broadcast %594 : vector<8x1xf32> to vector<8x64xf32>
    %597 = arith.mulf %596, %595 : vector<8x64xf32>
    %598 = vector.extract_strided_slice %579 {offsets = [0, 4], sizes = [8, 1], strides = [1, 1]} : vector<8x8xf32> to vector<8x1xf32>
    %c32_202 = arith.constant 32 : index
    %c0_203 = arith.constant 0 : index
    %599 = vector.load %arg5[%c32_202, %c0_203] : memref<64x64xf32, #tpu.memory_space<vmem>>, vector<8x64xf32>
    %600 = vector.broadcast %598 : vector<8x1xf32> to vector<8x64xf32>
    %601 = arith.mulf %600, %599 : vector<8x64xf32>
    %602 = vector.extract_strided_slice %579 {offsets = [0, 5], sizes = [8, 1], strides = [1, 1]} : vector<8x8xf32> to vector<8x1xf32>
    %c40_204 = arith.constant 40 : index
    %c0_205 = arith.constant 0 : index
    %603 = vector.load %arg5[%c40_204, %c0_205] : memref<64x64xf32, #tpu.memory_space<vmem>>, vector<8x64xf32>
    %604 = vector.broadcast %602 : vector<8x1xf32> to vector<8x64xf32>
    %605 = arith.mulf %604, %603 : vector<8x64xf32>
    %606 = vector.extract_strided_slice %579 {offsets = [0, 6], sizes = [8, 1], strides = [1, 1]} : vector<8x8xf32> to vector<8x1xf32>
    %c48_206 = arith.constant 48 : index
    %c0_207 = arith.constant 0 : index
    %607 = vector.load %arg5[%c48_206, %c0_207] : memref<64x64xf32, #tpu.memory_space<vmem>>, vector<8x64xf32>
    %608 = vector.broadcast %606 : vector<8x1xf32> to vector<8x64xf32>
    %609 = arith.mulf %608, %607 : vector<8x64xf32>
    %610 = vector.extract_strided_slice %579 {offsets = [0, 7], sizes = [8, 1], strides = [1, 1]} : vector<8x8xf32> to vector<8x1xf32>
    %c56_208 = arith.constant 56 : index
    %c0_209 = arith.constant 0 : index
    %611 = vector.load %arg5[%c56_208, %c0_209] : memref<64x64xf32, #tpu.memory_space<vmem>>, vector<8x64xf32>
    %612 = vector.broadcast %610 : vector<8x1xf32> to vector<8x64xf32>
    %613 = arith.mulf %612, %611 : vector<8x64xf32>
    %614 = arith.addf %585, %589 : vector<8x64xf32>
    %615 = arith.addf %593, %597 : vector<8x64xf32>
    %616 = arith.addf %601, %605 : vector<8x64xf32>
    %617 = arith.addf %609, %613 : vector<8x64xf32>
    %618 = arith.addf %614, %615 : vector<8x64xf32>
    %619 = arith.addf %616, %617 : vector<8x64xf32>
    %620 = arith.addf %618, %619 : vector<8x64xf32>
    %621 = vector.broadcast %581 : vector<8x1xf32> to vector<8x64xf32>
    %622 = arith.divf %620, %621 : vector<8x64xf32>
    %623 = arith.truncf %567 : vector<8x128xf32> to vector<8x128xbf16>
    %c432_210 = arith.constant 432 : index
    %c0_211 = arith.constant 0 : index
    %624 = vector.load %arg1[%c432_210, %c0_211] : memref<656x480xbf16, #tpu.memory_space<vmem>>, vector<128x224xbf16>
    %cst_212 = arith.constant dense<0.000000e+00> : vector<8x224xf32>
    %625 = tpu.matmul %623, %624, %cst_212 {dimension_numbers = #tpu.dot_dimension_numbers<[1], [0], [0], [1], [0, 0, 1, 1], [], []>} : vector<8x128xbf16>, vector<128x224xbf16>, vector<8x224xf32> -> vector<8x224xf32>
    %626 = arith.truncf %622 : vector<8x64xf32> to vector<8x64xbf16>
    %c560_213 = arith.constant 560 : index
    %c0_214 = arith.constant 0 : index
    %627 = vector.load %arg1[%c560_213, %c0_214] : memref<656x480xbf16, #tpu.memory_space<vmem>>, vector<64x224xbf16>
    %cst_215 = arith.constant dense<0.000000e+00> : vector<8x224xf32>
    %628 = tpu.matmul %626, %627, %cst_215 {dimension_numbers = #tpu.dot_dimension_numbers<[1], [0], [0], [1], [0, 0, 1, 1], [], []>} : vector<8x64xbf16>, vector<64x224xbf16>, vector<8x224xf32> -> vector<8x224xf32>
    %629 = vector.extract_strided_slice %625 {offsets = [0, 0], sizes = [8, 96], strides = [1, 1]} : vector<8x224xf32> to vector<8x96xf32>
    %630 = vector.extract_strided_slice %628 {offsets = [0, 0], sizes = [8, 96], strides = [1, 1]} : vector<8x224xf32> to vector<8x96xf32>
    %631 = arith.addf %629, %630 : vector<8x96xf32>
    %c4_216 = arith.constant 4 : index
    %c0_217 = arith.constant 0 : index
    %632 = vector.load %arg2[%c4_216, %c0_217] : memref<8x480xf32, #tpu.memory_space<vmem>>, vector<1x96xf32>
    %633 = vector.broadcast %632 : vector<1x96xf32> to vector<8x96xf32>
    %634 = arith.addf %631, %633 : vector<8x96xf32>
    %635 = vector.extract_strided_slice %547 {offsets = [0, 384], sizes = [8, 96], strides = [1, 1]} : vector<8x480xf32> to vector<8x96xf32>
    %636 = vector.extract_strided_slice %634 {offsets = [0, 0], sizes = [8, 32], strides = [1, 1]} : vector<8x96xf32> to vector<8x32xf32>
    %637 = vector.extract_strided_slice %635 {offsets = [0, 0], sizes = [8, 32], strides = [1, 1]} : vector<8x96xf32> to vector<8x32xf32>
    %638 = arith.addf %636, %637 : vector<8x32xf32>
    %639 = arith.negf %638 : vector<8x32xf32>
    %640 = math.exp %639 : vector<8x32xf32>
    %cst_218 = arith.constant 1.000000e+00 : f32
    %641 = vector.broadcast %cst_218 : f32 to vector<8x32xf32>
    %642 = arith.addf %641, %640 : vector<8x32xf32>
    %643 = arith.divf %641, %642 : vector<8x32xf32>
    %644 = vector.extract_strided_slice %634 {offsets = [0, 32], sizes = [8, 32], strides = [1, 1]} : vector<8x96xf32> to vector<8x32xf32>
    %645 = vector.extract_strided_slice %635 {offsets = [0, 32], sizes = [8, 32], strides = [1, 1]} : vector<8x96xf32> to vector<8x32xf32>
    %646 = arith.addf %644, %645 : vector<8x32xf32>
    %647 = arith.negf %646 : vector<8x32xf32>
    %648 = math.exp %647 : vector<8x32xf32>
    %cst_219 = arith.constant 1.000000e+00 : f32
    %649 = vector.broadcast %cst_219 : f32 to vector<8x32xf32>
    %650 = arith.addf %649, %648 : vector<8x32xf32>
    %651 = arith.divf %649, %650 : vector<8x32xf32>
    %652 = vector.extract_strided_slice %634 {offsets = [0, 64], sizes = [8, 32], strides = [1, 1]} : vector<8x96xf32> to vector<8x32xf32>
    %653 = vector.extract_strided_slice %635 {offsets = [0, 64], sizes = [8, 32], strides = [1, 1]} : vector<8x96xf32> to vector<8x32xf32>
    %654 = arith.mulf %643, %653 : vector<8x32xf32>
    %655 = arith.addf %652, %654 : vector<8x32xf32>
    %656 = math.tanh %655 : vector<8x32xf32>
    %cst_220 = arith.constant 1.000000e+00 : f32
    %657 = vector.broadcast %cst_220 : f32 to vector<8x32xf32>
    %658 = arith.subf %657, %651 : vector<8x32xf32>
    %659 = arith.mulf %658, %656 : vector<8x32xf32>
    %660 = arith.mulf %651, %542 : vector<8x32xf32>
    %661 = arith.addf %659, %660 : vector<8x32xf32>
    %662 = arith.truncf %661 : vector<8x32xf32> to vector<8x32xbf16>
    %c624_221 = arith.constant 624 : index
    %c0_222 = arith.constant 0 : index
    %663 = vector.load %arg1[%c624_221, %c0_222] : memref<656x480xbf16, #tpu.memory_space<vmem>>, vector<32x480xbf16>
    %cst_223 = arith.constant dense<0.000000e+00> : vector<8x480xf32>
    %664 = tpu.matmul %662, %663, %cst_223 {dimension_numbers = #tpu.dot_dimension_numbers<[1], [0], [0], [1], [0, 0, 1, 1], [], []>} : vector<8x32xbf16>, vector<32x480xbf16>, vector<8x480xf32> -> vector<8x480xf32>
    %665 = vector.broadcast %324 : vector<1x480xf32> to vector<8x480xf32>
    %666 = arith.addf %664, %665 : vector<8x480xf32>
    %667 = vector.extract_strided_slice %666 {offsets = [0, 0], sizes = [8, 128], strides = [1, 1]} : vector<8x480xf32> to vector<8x128xf32>
    %668 = vector.extract_strided_slice %625 {offsets = [0, 96], sizes = [8, 128], strides = [1, 1]} : vector<8x224xf32> to vector<8x128xf32>
    %669 = arith.addf %667, %668 : vector<8x128xf32>
    %670 = vector.extract_strided_slice %628 {offsets = [0, 96], sizes = [8, 128], strides = [1, 1]} : vector<8x224xf32> to vector<8x128xf32>
    %671 = arith.addf %669, %670 : vector<8x128xf32>
    %c2_224 = arith.constant 2 : index
    %c0_225 = arith.constant 0 : index
    %c0_226 = arith.constant 0 : index
    %672 = vector.load %arg3[%c2_224, %c0_225, %c0_226] : memref<6x8x128xf32, #tpu.memory_space<vmem>>, vector<1x8x128xf32>
    %673 = vector.shape_cast %672 : vector<1x8x128xf32> to vector<8x128xf32>
    %674 = vector.shape_cast %671 : vector<8x128xf32> to vector<1x8x128xf32>
    tpu.vector_store %arg3[%c2_224, %c0_225, %c0_226], %674 {strides = array<i32>} : memref<6x8x128xf32, #tpu.memory_space<vmem>>, vector<1x8x128xf32>,
    %cst_227 = arith.constant dense<0xFF800000> : vector<8xf32>
    %675 = vector.multi_reduction <maximumf>, %671, %cst_227 [1] : vector<8x128xf32> to vector<8xf32>
    %676 = vector.shape_cast %675 : vector<8xf32> to vector<8x1xf32>
    %677 = vector.broadcast %676 : vector<8x1xf32> to vector<8x128xf32>
    %678 = arith.cmpf oeq, %671, %677 : vector<8x128xf32>
    %c128_i32_228 = arith.constant 128 : i32
    %679 = vector.broadcast %c128_i32_228 : i32 to vector<8x128xi32>
    %680 = arith.select %678, %319, %679 : vector<8x128xi1>, vector<8x128xi32>
    %cst_229 = arith.constant dense<2147483647> : vector<8xi32>
    %681 = vector.multi_reduction <minsi>, %680, %cst_229 [1] : vector<8x128xi32> to vector<8xi32>
    %682 = vector.shape_cast %681 : vector<8xi32> to vector<8x1xi32>
    %683 = vector.broadcast %682 : vector<8x1xi32> to vector<8x128xi32>
    %684 = arith.cmpi eq, %319, %683 : vector<8x128xi32>
    %685 = arith.extui %684 : vector<8x128xi1> to vector<8x128xi32>
    %686 = arith.sitofp %685 : vector<8x128xi32> to vector<8x128xf32>
    %c0_230 = arith.constant 0 : index
    %c0_231 = arith.constant 0 : index
    %687 = vector.load %arg6[%c0_230, %c0_231] : memref<8x256xf32, #tpu.memory_space<vmem>>, vector<8x256xf32>
    %688 = vector.extract_strided_slice %666 {offsets = [0, 128], sizes = [8, 256], strides = [1, 1]} : vector<8x480xf32> to vector<8x256xf32>
    %689 = arith.addf %687, %688 : vector<8x256xf32>
    %690 = math.tanh %689 : vector<8x256xf32>
    %691 = arith.truncf %690 : vector<8x256xf32> to vector<8x256xbf16>
    %c176_232 = arith.constant 176 : index
    %c0_233 = arith.constant 0 : index
    %692 = vector.load %arg1[%c176_232, %c0_233] : memref<656x480xbf16, #tpu.memory_space<vmem>>, vector<256x8xbf16>
    %cst_234 = arith.constant dense<0.000000e+00> : vector<8x8xf32>
    %693 = tpu.matmul %691, %692, %cst_234 {dimension_numbers = #tpu.dot_dimension_numbers<[1], [0], [0], [1], [0, 0, 1, 1], [], []>} : vector<8x256xbf16>, vector<256x8xbf16>, vector<8x8xf32> -> vector<8x8xf32>
    %cst_235 = arith.constant dense<0xFF800000> : vector<8xf32>
    %694 = vector.multi_reduction <maximumf>, %693, %cst_235 [1] : vector<8x8xf32> to vector<8xf32>
    %695 = vector.shape_cast %694 : vector<8xf32> to vector<8x1xf32>
    %696 = vector.broadcast %695 : vector<8x1xf32> to vector<8x8xf32>
    %697 = arith.subf %693, %696 : vector<8x8xf32>
    %698 = math.exp %697 : vector<8x8xf32>
    %cst_236 = arith.constant dense<0.000000e+00> : vector<8xf32>
    %699 = vector.multi_reduction <add>, %698, %cst_236 [1] : vector<8x8xf32> to vector<8xf32>
    %700 = vector.shape_cast %699 : vector<8xf32> to vector<8x1xf32>
    %701 = vector.extract_strided_slice %698 {offsets = [0, 0], sizes = [8, 1], strides = [1, 1]} : vector<8x8xf32> to vector<8x1xf32>
    %c0_237 = arith.constant 0 : index
    %c0_238 = arith.constant 0 : index
    %702 = vector.load %arg5[%c0_237, %c0_238] : memref<64x64xf32, #tpu.memory_space<vmem>>, vector<8x64xf32>
    %703 = vector.broadcast %701 : vector<8x1xf32> to vector<8x64xf32>
    %704 = arith.mulf %703, %702 : vector<8x64xf32>
    %705 = vector.extract_strided_slice %698 {offsets = [0, 1], sizes = [8, 1], strides = [1, 1]} : vector<8x8xf32> to vector<8x1xf32>
    %c8_239 = arith.constant 8 : index
    %c0_240 = arith.constant 0 : index
    %706 = vector.load %arg5[%c8_239, %c0_240] : memref<64x64xf32, #tpu.memory_space<vmem>>, vector<8x64xf32>
    %707 = vector.broadcast %705 : vector<8x1xf32> to vector<8x64xf32>
    %708 = arith.mulf %707, %706 : vector<8x64xf32>
    %709 = vector.extract_strided_slice %698 {offsets = [0, 2], sizes = [8, 1], strides = [1, 1]} : vector<8x8xf32> to vector<8x1xf32>
    %c16_241 = arith.constant 16 : index
    %c0_242 = arith.constant 0 : index
    %710 = vector.load %arg5[%c16_241, %c0_242] : memref<64x64xf32, #tpu.memory_space<vmem>>, vector<8x64xf32>
    %711 = vector.broadcast %709 : vector<8x1xf32> to vector<8x64xf32>
    %712 = arith.mulf %711, %710 : vector<8x64xf32>
    %713 = vector.extract_strided_slice %698 {offsets = [0, 3], sizes = [8, 1], strides = [1, 1]} : vector<8x8xf32> to vector<8x1xf32>
    %c24_243 = arith.constant 24 : index
    %c0_244 = arith.constant 0 : index
    %714 = vector.load %arg5[%c24_243, %c0_244] : memref<64x64xf32, #tpu.memory_space<vmem>>, vector<8x64xf32>
    %715 = vector.broadcast %713 : vector<8x1xf32> to vector<8x64xf32>
    %716 = arith.mulf %715, %714 : vector<8x64xf32>
    %717 = vector.extract_strided_slice %698 {offsets = [0, 4], sizes = [8, 1], strides = [1, 1]} : vector<8x8xf32> to vector<8x1xf32>
    %c32_245 = arith.constant 32 : index
    %c0_246 = arith.constant 0 : index
    %718 = vector.load %arg5[%c32_245, %c0_246] : memref<64x64xf32, #tpu.memory_space<vmem>>, vector<8x64xf32>
    %719 = vector.broadcast %717 : vector<8x1xf32> to vector<8x64xf32>
    %720 = arith.mulf %719, %718 : vector<8x64xf32>
    %721 = vector.extract_strided_slice %698 {offsets = [0, 5], sizes = [8, 1], strides = [1, 1]} : vector<8x8xf32> to vector<8x1xf32>
    %c40_247 = arith.constant 40 : index
    %c0_248 = arith.constant 0 : index
    %722 = vector.load %arg5[%c40_247, %c0_248] : memref<64x64xf32, #tpu.memory_space<vmem>>, vector<8x64xf32>
    %723 = vector.broadcast %721 : vector<8x1xf32> to vector<8x64xf32>
    %724 = arith.mulf %723, %722 : vector<8x64xf32>
    %725 = vector.extract_strided_slice %698 {offsets = [0, 6], sizes = [8, 1], strides = [1, 1]} : vector<8x8xf32> to vector<8x1xf32>
    %c48_249 = arith.constant 48 : index
    %c0_250 = arith.constant 0 : index
    %726 = vector.load %arg5[%c48_249, %c0_250] : memref<64x64xf32, #tpu.memory_space<vmem>>, vector<8x64xf32>
    %727 = vector.broadcast %725 : vector<8x1xf32> to vector<8x64xf32>
    %728 = arith.mulf %727, %726 : vector<8x64xf32>
    %729 = vector.extract_strided_slice %698 {offsets = [0, 7], sizes = [8, 1], strides = [1, 1]} : vector<8x8xf32> to vector<8x1xf32>
    %c56_251 = arith.constant 56 : index
    %c0_252 = arith.constant 0 : index
    %730 = vector.load %arg5[%c56_251, %c0_252] : memref<64x64xf32, #tpu.memory_space<vmem>>, vector<8x64xf32>
    %731 = vector.broadcast %729 : vector<8x1xf32> to vector<8x64xf32>
    %732 = arith.mulf %731, %730 : vector<8x64xf32>
    %733 = arith.addf %704, %708 : vector<8x64xf32>
    %734 = arith.addf %712, %716 : vector<8x64xf32>
    %735 = arith.addf %720, %724 : vector<8x64xf32>
    %736 = arith.addf %728, %732 : vector<8x64xf32>
    %737 = arith.addf %733, %734 : vector<8x64xf32>
    %738 = arith.addf %735, %736 : vector<8x64xf32>
    %739 = arith.addf %737, %738 : vector<8x64xf32>
    %740 = vector.broadcast %700 : vector<8x1xf32> to vector<8x64xf32>
    %741 = arith.divf %739, %740 : vector<8x64xf32>
    %742 = arith.truncf %686 : vector<8x128xf32> to vector<8x128xbf16>
    %c432_253 = arith.constant 432 : index
    %c0_254 = arith.constant 0 : index
    %743 = vector.load %arg1[%c432_253, %c0_254] : memref<656x480xbf16, #tpu.memory_space<vmem>>, vector<128x224xbf16>
    %cst_255 = arith.constant dense<0.000000e+00> : vector<8x224xf32>
    %744 = tpu.matmul %742, %743, %cst_255 {dimension_numbers = #tpu.dot_dimension_numbers<[1], [0], [0], [1], [0, 0, 1, 1], [], []>} : vector<8x128xbf16>, vector<128x224xbf16>, vector<8x224xf32> -> vector<8x224xf32>
    %745 = arith.truncf %741 : vector<8x64xf32> to vector<8x64xbf16>
    %c560_256 = arith.constant 560 : index
    %c0_257 = arith.constant 0 : index
    %746 = vector.load %arg1[%c560_256, %c0_257] : memref<656x480xbf16, #tpu.memory_space<vmem>>, vector<64x224xbf16>
    %cst_258 = arith.constant dense<0.000000e+00> : vector<8x224xf32>
    %747 = tpu.matmul %745, %746, %cst_258 {dimension_numbers = #tpu.dot_dimension_numbers<[1], [0], [0], [1], [0, 0, 1, 1], [], []>} : vector<8x64xbf16>, vector<64x224xbf16>, vector<8x224xf32> -> vector<8x224xf32>
    %748 = vector.extract_strided_slice %744 {offsets = [0, 0], sizes = [8, 96], strides = [1, 1]} : vector<8x224xf32> to vector<8x96xf32>
    %749 = vector.extract_strided_slice %747 {offsets = [0, 0], sizes = [8, 96], strides = [1, 1]} : vector<8x224xf32> to vector<8x96xf32>
    %750 = arith.addf %748, %749 : vector<8x96xf32>
    %c4_259 = arith.constant 4 : index
    %c0_260 = arith.constant 0 : index
    %751 = vector.load %arg2[%c4_259, %c0_260] : memref<8x480xf32, #tpu.memory_space<vmem>>, vector<1x96xf32>
    %752 = vector.broadcast %751 : vector<1x96xf32> to vector<8x96xf32>
    %753 = arith.addf %750, %752 : vector<8x96xf32>
    %754 = vector.extract_strided_slice %666 {offsets = [0, 384], sizes = [8, 96], strides = [1, 1]} : vector<8x480xf32> to vector<8x96xf32>
    %755 = vector.extract_strided_slice %753 {offsets = [0, 0], sizes = [8, 32], strides = [1, 1]} : vector<8x96xf32> to vector<8x32xf32>
    %756 = vector.extract_strided_slice %754 {offsets = [0, 0], sizes = [8, 32], strides = [1, 1]} : vector<8x96xf32> to vector<8x32xf32>
    %757 = arith.addf %755, %756 : vector<8x32xf32>
    %758 = arith.negf %757 : vector<8x32xf32>
    %759 = math.exp %758 : vector<8x32xf32>
    %cst_261 = arith.constant 1.000000e+00 : f32
    %760 = vector.broadcast %cst_261 : f32 to vector<8x32xf32>
    %761 = arith.addf %760, %759 : vector<8x32xf32>
    %762 = arith.divf %760, %761 : vector<8x32xf32>
    %763 = vector.extract_strided_slice %753 {offsets = [0, 32], sizes = [8, 32], strides = [1, 1]} : vector<8x96xf32> to vector<8x32xf32>
    %764 = vector.extract_strided_slice %754 {offsets = [0, 32], sizes = [8, 32], strides = [1, 1]} : vector<8x96xf32> to vector<8x32xf32>
    %765 = arith.addf %763, %764 : vector<8x32xf32>
    %766 = arith.negf %765 : vector<8x32xf32>
    %767 = math.exp %766 : vector<8x32xf32>
    %cst_262 = arith.constant 1.000000e+00 : f32
    %768 = vector.broadcast %cst_262 : f32 to vector<8x32xf32>
    %769 = arith.addf %768, %767 : vector<8x32xf32>
    %770 = arith.divf %768, %769 : vector<8x32xf32>
    %771 = vector.extract_strided_slice %753 {offsets = [0, 64], sizes = [8, 32], strides = [1, 1]} : vector<8x96xf32> to vector<8x32xf32>
    %772 = vector.extract_strided_slice %754 {offsets = [0, 64], sizes = [8, 32], strides = [1, 1]} : vector<8x96xf32> to vector<8x32xf32>
    %773 = arith.mulf %762, %772 : vector<8x32xf32>
    %774 = arith.addf %771, %773 : vector<8x32xf32>
    %775 = math.tanh %774 : vector<8x32xf32>
    %cst_263 = arith.constant 1.000000e+00 : f32
    %776 = vector.broadcast %cst_263 : f32 to vector<8x32xf32>
    %777 = arith.subf %776, %770 : vector<8x32xf32>
    %778 = arith.mulf %777, %775 : vector<8x32xf32>
    %779 = arith.mulf %770, %661 : vector<8x32xf32>
    %780 = arith.addf %778, %779 : vector<8x32xf32>
    %781 = arith.truncf %780 : vector<8x32xf32> to vector<8x32xbf16>
    %c624_264 = arith.constant 624 : index
    %c0_265 = arith.constant 0 : index
    %782 = vector.load %arg1[%c624_264, %c0_265] : memref<656x480xbf16, #tpu.memory_space<vmem>>, vector<32x480xbf16>
    %cst_266 = arith.constant dense<0.000000e+00> : vector<8x480xf32>
    %783 = tpu.matmul %781, %782, %cst_266 {dimension_numbers = #tpu.dot_dimension_numbers<[1], [0], [0], [1], [0, 0, 1, 1], [], []>} : vector<8x32xbf16>, vector<32x480xbf16>, vector<8x480xf32> -> vector<8x480xf32>
    %784 = vector.broadcast %324 : vector<1x480xf32> to vector<8x480xf32>
    %785 = arith.addf %783, %784 : vector<8x480xf32>
    %786 = vector.extract_strided_slice %785 {offsets = [0, 0], sizes = [8, 128], strides = [1, 1]} : vector<8x480xf32> to vector<8x128xf32>
    %787 = vector.extract_strided_slice %744 {offsets = [0, 96], sizes = [8, 128], strides = [1, 1]} : vector<8x224xf32> to vector<8x128xf32>
    %788 = arith.addf %786, %787 : vector<8x128xf32>
    %789 = vector.extract_strided_slice %747 {offsets = [0, 96], sizes = [8, 128], strides = [1, 1]} : vector<8x224xf32> to vector<8x128xf32>
    %790 = arith.addf %788, %789 : vector<8x128xf32>
    %c3_267 = arith.constant 3 : index
    %c0_268 = arith.constant 0 : index
    %c0_269 = arith.constant 0 : index
    %791 = vector.load %arg3[%c3_267, %c0_268, %c0_269] : memref<6x8x128xf32, #tpu.memory_space<vmem>>, vector<1x8x128xf32>
    %792 = vector.shape_cast %791 : vector<1x8x128xf32> to vector<8x128xf32>
    %793 = vector.shape_cast %790 : vector<8x128xf32> to vector<1x8x128xf32>
    tpu.vector_store %arg3[%c3_267, %c0_268, %c0_269], %793 {strides = array<i32>} : memref<6x8x128xf32, #tpu.memory_space<vmem>>, vector<1x8x128xf32>,
    %cst_270 = arith.constant dense<0xFF800000> : vector<8xf32>
    %794 = vector.multi_reduction <maximumf>, %790, %cst_270 [1] : vector<8x128xf32> to vector<8xf32>
    %795 = vector.shape_cast %794 : vector<8xf32> to vector<8x1xf32>
    %796 = vector.broadcast %795 : vector<8x1xf32> to vector<8x128xf32>
    %797 = arith.cmpf oeq, %790, %796 : vector<8x128xf32>
    %c128_i32_271 = arith.constant 128 : i32
    %798 = vector.broadcast %c128_i32_271 : i32 to vector<8x128xi32>
    %799 = arith.select %797, %319, %798 : vector<8x128xi1>, vector<8x128xi32>
    %cst_272 = arith.constant dense<2147483647> : vector<8xi32>
    %800 = vector.multi_reduction <minsi>, %799, %cst_272 [1] : vector<8x128xi32> to vector<8xi32>
    %801 = vector.shape_cast %800 : vector<8xi32> to vector<8x1xi32>
    %802 = vector.broadcast %801 : vector<8x1xi32> to vector<8x128xi32>
    %803 = arith.cmpi eq, %319, %802 : vector<8x128xi32>
    %804 = arith.extui %803 : vector<8x128xi1> to vector<8x128xi32>
    %805 = arith.sitofp %804 : vector<8x128xi32> to vector<8x128xf32>
    %c0_273 = arith.constant 0 : index
    %c0_274 = arith.constant 0 : index
    %806 = vector.load %arg6[%c0_273, %c0_274] : memref<8x256xf32, #tpu.memory_space<vmem>>, vector<8x256xf32>
    %807 = vector.extract_strided_slice %785 {offsets = [0, 128], sizes = [8, 256], strides = [1, 1]} : vector<8x480xf32> to vector<8x256xf32>
    %808 = arith.addf %806, %807 : vector<8x256xf32>
    %809 = math.tanh %808 : vector<8x256xf32>
    %810 = arith.truncf %809 : vector<8x256xf32> to vector<8x256xbf16>
    %c176_275 = arith.constant 176 : index
    %c0_276 = arith.constant 0 : index
    %811 = vector.load %arg1[%c176_275, %c0_276] : memref<656x480xbf16, #tpu.memory_space<vmem>>, vector<256x8xbf16>
    %cst_277 = arith.constant dense<0.000000e+00> : vector<8x8xf32>
    %812 = tpu.matmul %810, %811, %cst_277 {dimension_numbers = #tpu.dot_dimension_numbers<[1], [0], [0], [1], [0, 0, 1, 1], [], []>} : vector<8x256xbf16>, vector<256x8xbf16>, vector<8x8xf32> -> vector<8x8xf32>
    %cst_278 = arith.constant dense<0xFF800000> : vector<8xf32>
    %813 = vector.multi_reduction <maximumf>, %812, %cst_278 [1] : vector<8x8xf32> to vector<8xf32>
    %814 = vector.shape_cast %813 : vector<8xf32> to vector<8x1xf32>
    %815 = vector.broadcast %814 : vector<8x1xf32> to vector<8x8xf32>
    %816 = arith.subf %812, %815 : vector<8x8xf32>
    %817 = math.exp %816 : vector<8x8xf32>
    %cst_279 = arith.constant dense<0.000000e+00> : vector<8xf32>
    %818 = vector.multi_reduction <add>, %817, %cst_279 [1] : vector<8x8xf32> to vector<8xf32>
    %819 = vector.shape_cast %818 : vector<8xf32> to vector<8x1xf32>
    %820 = vector.extract_strided_slice %817 {offsets = [0, 0], sizes = [8, 1], strides = [1, 1]} : vector<8x8xf32> to vector<8x1xf32>
    %c0_280 = arith.constant 0 : index
    %c0_281 = arith.constant 0 : index
    %821 = vector.load %arg5[%c0_280, %c0_281] : memref<64x64xf32, #tpu.memory_space<vmem>>, vector<8x64xf32>
    %822 = vector.broadcast %820 : vector<8x1xf32> to vector<8x64xf32>
    %823 = arith.mulf %822, %821 : vector<8x64xf32>
    %824 = vector.extract_strided_slice %817 {offsets = [0, 1], sizes = [8, 1], strides = [1, 1]} : vector<8x8xf32> to vector<8x1xf32>
    %c8_282 = arith.constant 8 : index
    %c0_283 = arith.constant 0 : index
    %825 = vector.load %arg5[%c8_282, %c0_283] : memref<64x64xf32, #tpu.memory_space<vmem>>, vector<8x64xf32>
    %826 = vector.broadcast %824 : vector<8x1xf32> to vector<8x64xf32>
    %827 = arith.mulf %826, %825 : vector<8x64xf32>
    %828 = vector.extract_strided_slice %817 {offsets = [0, 2], sizes = [8, 1], strides = [1, 1]} : vector<8x8xf32> to vector<8x1xf32>
    %c16_284 = arith.constant 16 : index
    %c0_285 = arith.constant 0 : index
    %829 = vector.load %arg5[%c16_284, %c0_285] : memref<64x64xf32, #tpu.memory_space<vmem>>, vector<8x64xf32>
    %830 = vector.broadcast %828 : vector<8x1xf32> to vector<8x64xf32>
    %831 = arith.mulf %830, %829 : vector<8x64xf32>
    %832 = vector.extract_strided_slice %817 {offsets = [0, 3], sizes = [8, 1], strides = [1, 1]} : vector<8x8xf32> to vector<8x1xf32>
    %c24_286 = arith.constant 24 : index
    %c0_287 = arith.constant 0 : index
    %833 = vector.load %arg5[%c24_286, %c0_287] : memref<64x64xf32, #tpu.memory_space<vmem>>, vector<8x64xf32>
    %834 = vector.broadcast %832 : vector<8x1xf32> to vector<8x64xf32>
    %835 = arith.mulf %834, %833 : vector<8x64xf32>
    %836 = vector.extract_strided_slice %817 {offsets = [0, 4], sizes = [8, 1], strides = [1, 1]} : vector<8x8xf32> to vector<8x1xf32>
    %c32_288 = arith.constant 32 : index
    %c0_289 = arith.constant 0 : index
    %837 = vector.load %arg5[%c32_288, %c0_289] : memref<64x64xf32, #tpu.memory_space<vmem>>, vector<8x64xf32>
    %838 = vector.broadcast %836 : vector<8x1xf32> to vector<8x64xf32>
    %839 = arith.mulf %838, %837 : vector<8x64xf32>
    %840 = vector.extract_strided_slice %817 {offsets = [0, 5], sizes = [8, 1], strides = [1, 1]} : vector<8x8xf32> to vector<8x1xf32>
    %c40_290 = arith.constant 40 : index
    %c0_291 = arith.constant 0 : index
    %841 = vector.load %arg5[%c40_290, %c0_291] : memref<64x64xf32, #tpu.memory_space<vmem>>, vector<8x64xf32>
    %842 = vector.broadcast %840 : vector<8x1xf32> to vector<8x64xf32>
    %843 = arith.mulf %842, %841 : vector<8x64xf32>
    %844 = vector.extract_strided_slice %817 {offsets = [0, 6], sizes = [8, 1], strides = [1, 1]} : vector<8x8xf32> to vector<8x1xf32>
    %c48_292 = arith.constant 48 : index
    %c0_293 = arith.constant 0 : index
    %845 = vector.load %arg5[%c48_292, %c0_293] : memref<64x64xf32, #tpu.memory_space<vmem>>, vector<8x64xf32>
    %846 = vector.broadcast %844 : vector<8x1xf32> to vector<8x64xf32>
    %847 = arith.mulf %846, %845 : vector<8x64xf32>
    %848 = vector.extract_strided_slice %817 {offsets = [0, 7], sizes = [8, 1], strides = [1, 1]} : vector<8x8xf32> to vector<8x1xf32>
    %c56_294 = arith.constant 56 : index
    %c0_295 = arith.constant 0 : index
    %849 = vector.load %arg5[%c56_294, %c0_295] : memref<64x64xf32, #tpu.memory_space<vmem>>, vector<8x64xf32>
    %850 = vector.broadcast %848 : vector<8x1xf32> to vector<8x64xf32>
    %851 = arith.mulf %850, %849 : vector<8x64xf32>
    %852 = arith.addf %823, %827 : vector<8x64xf32>
    %853 = arith.addf %831, %835 : vector<8x64xf32>
    %854 = arith.addf %839, %843 : vector<8x64xf32>
    %855 = arith.addf %847, %851 : vector<8x64xf32>
    %856 = arith.addf %852, %853 : vector<8x64xf32>
    %857 = arith.addf %854, %855 : vector<8x64xf32>
    %858 = arith.addf %856, %857 : vector<8x64xf32>
    %859 = vector.broadcast %819 : vector<8x1xf32> to vector<8x64xf32>
    %860 = arith.divf %858, %859 : vector<8x64xf32>
    %861 = arith.truncf %805 : vector<8x128xf32> to vector<8x128xbf16>
    %c432_296 = arith.constant 432 : index
    %c0_297 = arith.constant 0 : index
    %862 = vector.load %arg1[%c432_296, %c0_297] : memref<656x480xbf16, #tpu.memory_space<vmem>>, vector<128x224xbf16>
    %cst_298 = arith.constant dense<0.000000e+00> : vector<8x224xf32>
    %863 = tpu.matmul %861, %862, %cst_298 {dimension_numbers = #tpu.dot_dimension_numbers<[1], [0], [0], [1], [0, 0, 1, 1], [], []>} : vector<8x128xbf16>, vector<128x224xbf16>, vector<8x224xf32> -> vector<8x224xf32>
    %864 = arith.truncf %860 : vector<8x64xf32> to vector<8x64xbf16>
    %c560_299 = arith.constant 560 : index
    %c0_300 = arith.constant 0 : index
    %865 = vector.load %arg1[%c560_299, %c0_300] : memref<656x480xbf16, #tpu.memory_space<vmem>>, vector<64x224xbf16>
    %cst_301 = arith.constant dense<0.000000e+00> : vector<8x224xf32>
    %866 = tpu.matmul %864, %865, %cst_301 {dimension_numbers = #tpu.dot_dimension_numbers<[1], [0], [0], [1], [0, 0, 1, 1], [], []>} : vector<8x64xbf16>, vector<64x224xbf16>, vector<8x224xf32> -> vector<8x224xf32>
    %867 = vector.extract_strided_slice %863 {offsets = [0, 0], sizes = [8, 96], strides = [1, 1]} : vector<8x224xf32> to vector<8x96xf32>
    %868 = vector.extract_strided_slice %866 {offsets = [0, 0], sizes = [8, 96], strides = [1, 1]} : vector<8x224xf32> to vector<8x96xf32>
    %869 = arith.addf %867, %868 : vector<8x96xf32>
    %c4_302 = arith.constant 4 : index
    %c0_303 = arith.constant 0 : index
    %870 = vector.load %arg2[%c4_302, %c0_303] : memref<8x480xf32, #tpu.memory_space<vmem>>, vector<1x96xf32>
    %871 = vector.broadcast %870 : vector<1x96xf32> to vector<8x96xf32>
    %872 = arith.addf %869, %871 : vector<8x96xf32>
    %873 = vector.extract_strided_slice %785 {offsets = [0, 384], sizes = [8, 96], strides = [1, 1]} : vector<8x480xf32> to vector<8x96xf32>
    %874 = vector.extract_strided_slice %872 {offsets = [0, 0], sizes = [8, 32], strides = [1, 1]} : vector<8x96xf32> to vector<8x32xf32>
    %875 = vector.extract_strided_slice %873 {offsets = [0, 0], sizes = [8, 32], strides = [1, 1]} : vector<8x96xf32> to vector<8x32xf32>
    %876 = arith.addf %874, %875 : vector<8x32xf32>
    %877 = arith.negf %876 : vector<8x32xf32>
    %878 = math.exp %877 : vector<8x32xf32>
    %cst_304 = arith.constant 1.000000e+00 : f32
    %879 = vector.broadcast %cst_304 : f32 to vector<8x32xf32>
    %880 = arith.addf %879, %878 : vector<8x32xf32>
    %881 = arith.divf %879, %880 : vector<8x32xf32>
    %882 = vector.extract_strided_slice %872 {offsets = [0, 32], sizes = [8, 32], strides = [1, 1]} : vector<8x96xf32> to vector<8x32xf32>
    %883 = vector.extract_strided_slice %873 {offsets = [0, 32], sizes = [8, 32], strides = [1, 1]} : vector<8x96xf32> to vector<8x32xf32>
    %884 = arith.addf %882, %883 : vector<8x32xf32>
    %885 = arith.negf %884 : vector<8x32xf32>
    %886 = math.exp %885 : vector<8x32xf32>
    %cst_305 = arith.constant 1.000000e+00 : f32
    %887 = vector.broadcast %cst_305 : f32 to vector<8x32xf32>
    %888 = arith.addf %887, %886 : vector<8x32xf32>
    %889 = arith.divf %887, %888 : vector<8x32xf32>
    %890 = vector.extract_strided_slice %872 {offsets = [0, 64], sizes = [8, 32], strides = [1, 1]} : vector<8x96xf32> to vector<8x32xf32>
    %891 = vector.extract_strided_slice %873 {offsets = [0, 64], sizes = [8, 32], strides = [1, 1]} : vector<8x96xf32> to vector<8x32xf32>
    %892 = arith.mulf %881, %891 : vector<8x32xf32>
    %893 = arith.addf %890, %892 : vector<8x32xf32>
    %894 = math.tanh %893 : vector<8x32xf32>
    %cst_306 = arith.constant 1.000000e+00 : f32
    %895 = vector.broadcast %cst_306 : f32 to vector<8x32xf32>
    %896 = arith.subf %895, %889 : vector<8x32xf32>
    %897 = arith.mulf %896, %894 : vector<8x32xf32>
    %898 = arith.mulf %889, %780 : vector<8x32xf32>
    %899 = arith.addf %897, %898 : vector<8x32xf32>
    %900 = arith.truncf %899 : vector<8x32xf32> to vector<8x32xbf16>
    %c624_307 = arith.constant 624 : index
    %c0_308 = arith.constant 0 : index
    %901 = vector.load %arg1[%c624_307, %c0_308] : memref<656x480xbf16, #tpu.memory_space<vmem>>, vector<32x480xbf16>
    %cst_309 = arith.constant dense<0.000000e+00> : vector<8x480xf32>
    %902 = tpu.matmul %900, %901, %cst_309 {dimension_numbers = #tpu.dot_dimension_numbers<[1], [0], [0], [1], [0, 0, 1, 1], [], []>} : vector<8x32xbf16>, vector<32x480xbf16>, vector<8x480xf32> -> vector<8x480xf32>
    %903 = vector.broadcast %324 : vector<1x480xf32> to vector<8x480xf32>
    %904 = arith.addf %902, %903 : vector<8x480xf32>
    %905 = vector.extract_strided_slice %904 {offsets = [0, 0], sizes = [8, 128], strides = [1, 1]} : vector<8x480xf32> to vector<8x128xf32>
    %906 = vector.extract_strided_slice %863 {offsets = [0, 96], sizes = [8, 128], strides = [1, 1]} : vector<8x224xf32> to vector<8x128xf32>
    %907 = arith.addf %905, %906 : vector<8x128xf32>
    %908 = vector.extract_strided_slice %866 {offsets = [0, 96], sizes = [8, 128], strides = [1, 1]} : vector<8x224xf32> to vector<8x128xf32>
    %909 = arith.addf %907, %908 : vector<8x128xf32>
    %c4_310 = arith.constant 4 : index
    %c0_311 = arith.constant 0 : index
    %c0_312 = arith.constant 0 : index
    %910 = vector.load %arg3[%c4_310, %c0_311, %c0_312] : memref<6x8x128xf32, #tpu.memory_space<vmem>>, vector<1x8x128xf32>
    %911 = vector.shape_cast %910 : vector<1x8x128xf32> to vector<8x128xf32>
    %912 = vector.shape_cast %909 : vector<8x128xf32> to vector<1x8x128xf32>
    tpu.vector_store %arg3[%c4_310, %c0_311, %c0_312], %912 {strides = array<i32>} : memref<6x8x128xf32, #tpu.memory_space<vmem>>, vector<1x8x128xf32>,
    %cst_313 = arith.constant dense<0xFF800000> : vector<8xf32>
    %913 = vector.multi_reduction <maximumf>, %909, %cst_313 [1] : vector<8x128xf32> to vector<8xf32>
    %914 = vector.shape_cast %913 : vector<8xf32> to vector<8x1xf32>
    %915 = vector.broadcast %914 : vector<8x1xf32> to vector<8x128xf32>
    %916 = arith.cmpf oeq, %909, %915 : vector<8x128xf32>
    %c128_i32_314 = arith.constant 128 : i32
    %917 = vector.broadcast %c128_i32_314 : i32 to vector<8x128xi32>
    %918 = arith.select %916, %319, %917 : vector<8x128xi1>, vector<8x128xi32>
    %cst_315 = arith.constant dense<2147483647> : vector<8xi32>
    %919 = vector.multi_reduction <minsi>, %918, %cst_315 [1] : vector<8x128xi32> to vector<8xi32>
    %920 = vector.shape_cast %919 : vector<8xi32> to vector<8x1xi32>
    %921 = vector.broadcast %920 : vector<8x1xi32> to vector<8x128xi32>
    %922 = arith.cmpi eq, %319, %921 : vector<8x128xi32>
    %923 = arith.extui %922 : vector<8x128xi1> to vector<8x128xi32>
    %924 = arith.sitofp %923 : vector<8x128xi32> to vector<8x128xf32>
    %c0_316 = arith.constant 0 : index
    %c0_317 = arith.constant 0 : index
    %925 = vector.load %arg6[%c0_316, %c0_317] : memref<8x256xf32, #tpu.memory_space<vmem>>, vector<8x256xf32>
    %926 = vector.extract_strided_slice %904 {offsets = [0, 128], sizes = [8, 256], strides = [1, 1]} : vector<8x480xf32> to vector<8x256xf32>
    %927 = arith.addf %925, %926 : vector<8x256xf32>
    %928 = math.tanh %927 : vector<8x256xf32>
    %929 = arith.truncf %928 : vector<8x256xf32> to vector<8x256xbf16>
    %c176_318 = arith.constant 176 : index
    %c0_319 = arith.constant 0 : index
    %930 = vector.load %arg1[%c176_318, %c0_319] : memref<656x480xbf16, #tpu.memory_space<vmem>>, vector<256x8xbf16>
    %cst_320 = arith.constant dense<0.000000e+00> : vector<8x8xf32>
    %931 = tpu.matmul %929, %930, %cst_320 {dimension_numbers = #tpu.dot_dimension_numbers<[1], [0], [0], [1], [0, 0, 1, 1], [], []>} : vector<8x256xbf16>, vector<256x8xbf16>, vector<8x8xf32> -> vector<8x8xf32>
    %cst_321 = arith.constant dense<0xFF800000> : vector<8xf32>
    %932 = vector.multi_reduction <maximumf>, %931, %cst_321 [1] : vector<8x8xf32> to vector<8xf32>
    %933 = vector.shape_cast %932 : vector<8xf32> to vector<8x1xf32>
    %934 = vector.broadcast %933 : vector<8x1xf32> to vector<8x8xf32>
    %935 = arith.subf %931, %934 : vector<8x8xf32>
    %936 = math.exp %935 : vector<8x8xf32>
    %cst_322 = arith.constant dense<0.000000e+00> : vector<8xf32>
    %937 = vector.multi_reduction <add>, %936, %cst_322 [1] : vector<8x8xf32> to vector<8xf32>
    %938 = vector.shape_cast %937 : vector<8xf32> to vector<8x1xf32>
    %939 = vector.extract_strided_slice %936 {offsets = [0, 0], sizes = [8, 1], strides = [1, 1]} : vector<8x8xf32> to vector<8x1xf32>
    %c0_323 = arith.constant 0 : index
    %c0_324 = arith.constant 0 : index
    %940 = vector.load %arg5[%c0_323, %c0_324] : memref<64x64xf32, #tpu.memory_space<vmem>>, vector<8x64xf32>
    %941 = vector.broadcast %939 : vector<8x1xf32> to vector<8x64xf32>
    %942 = arith.mulf %941, %940 : vector<8x64xf32>
    %943 = vector.extract_strided_slice %936 {offsets = [0, 1], sizes = [8, 1], strides = [1, 1]} : vector<8x8xf32> to vector<8x1xf32>
    %c8_325 = arith.constant 8 : index
    %c0_326 = arith.constant 0 : index
    %944 = vector.load %arg5[%c8_325, %c0_326] : memref<64x64xf32, #tpu.memory_space<vmem>>, vector<8x64xf32>
    %945 = vector.broadcast %943 : vector<8x1xf32> to vector<8x64xf32>
    %946 = arith.mulf %945, %944 : vector<8x64xf32>
    %947 = vector.extract_strided_slice %936 {offsets = [0, 2], sizes = [8, 1], strides = [1, 1]} : vector<8x8xf32> to vector<8x1xf32>
    %c16_327 = arith.constant 16 : index
    %c0_328 = arith.constant 0 : index
    %948 = vector.load %arg5[%c16_327, %c0_328] : memref<64x64xf32, #tpu.memory_space<vmem>>, vector<8x64xf32>
    %949 = vector.broadcast %947 : vector<8x1xf32> to vector<8x64xf32>
    %950 = arith.mulf %949, %948 : vector<8x64xf32>
    %951 = vector.extract_strided_slice %936 {offsets = [0, 3], sizes = [8, 1], strides = [1, 1]} : vector<8x8xf32> to vector<8x1xf32>
    %c24_329 = arith.constant 24 : index
    %c0_330 = arith.constant 0 : index
    %952 = vector.load %arg5[%c24_329, %c0_330] : memref<64x64xf32, #tpu.memory_space<vmem>>, vector<8x64xf32>
    %953 = vector.broadcast %951 : vector<8x1xf32> to vector<8x64xf32>
    %954 = arith.mulf %953, %952 : vector<8x64xf32>
    %955 = vector.extract_strided_slice %936 {offsets = [0, 4], sizes = [8, 1], strides = [1, 1]} : vector<8x8xf32> to vector<8x1xf32>
    %c32_331 = arith.constant 32 : index
    %c0_332 = arith.constant 0 : index
    %956 = vector.load %arg5[%c32_331, %c0_332] : memref<64x64xf32, #tpu.memory_space<vmem>>, vector<8x64xf32>
    %957 = vector.broadcast %955 : vector<8x1xf32> to vector<8x64xf32>
    %958 = arith.mulf %957, %956 : vector<8x64xf32>
    %959 = vector.extract_strided_slice %936 {offsets = [0, 5], sizes = [8, 1], strides = [1, 1]} : vector<8x8xf32> to vector<8x1xf32>
    %c40_333 = arith.constant 40 : index
    %c0_334 = arith.constant 0 : index
    %960 = vector.load %arg5[%c40_333, %c0_334] : memref<64x64xf32, #tpu.memory_space<vmem>>, vector<8x64xf32>
    %961 = vector.broadcast %959 : vector<8x1xf32> to vector<8x64xf32>
    %962 = arith.mulf %961, %960 : vector<8x64xf32>
    %963 = vector.extract_strided_slice %936 {offsets = [0, 6], sizes = [8, 1], strides = [1, 1]} : vector<8x8xf32> to vector<8x1xf32>
    %c48_335 = arith.constant 48 : index
    %c0_336 = arith.constant 0 : index
    %964 = vector.load %arg5[%c48_335, %c0_336] : memref<64x64xf32, #tpu.memory_space<vmem>>, vector<8x64xf32>
    %965 = vector.broadcast %963 : vector<8x1xf32> to vector<8x64xf32>
    %966 = arith.mulf %965, %964 : vector<8x64xf32>
    %967 = vector.extract_strided_slice %936 {offsets = [0, 7], sizes = [8, 1], strides = [1, 1]} : vector<8x8xf32> to vector<8x1xf32>
    %c56_337 = arith.constant 56 : index
    %c0_338 = arith.constant 0 : index
    %968 = vector.load %arg5[%c56_337, %c0_338] : memref<64x64xf32, #tpu.memory_space<vmem>>, vector<8x64xf32>
    %969 = vector.broadcast %967 : vector<8x1xf32> to vector<8x64xf32>
    %970 = arith.mulf %969, %968 : vector<8x64xf32>
    %971 = arith.addf %942, %946 : vector<8x64xf32>
    %972 = arith.addf %950, %954 : vector<8x64xf32>
    %973 = arith.addf %958, %962 : vector<8x64xf32>
    %974 = arith.addf %966, %970 : vector<8x64xf32>
    %975 = arith.addf %971, %972 : vector<8x64xf32>
    %976 = arith.addf %973, %974 : vector<8x64xf32>
    %977 = arith.addf %975, %976 : vector<8x64xf32>
    %978 = vector.broadcast %938 : vector<8x1xf32> to vector<8x64xf32>
    %979 = arith.divf %977, %978 : vector<8x64xf32>
    %980 = arith.truncf %924 : vector<8x128xf32> to vector<8x128xbf16>
    %c432_339 = arith.constant 432 : index
    %c0_340 = arith.constant 0 : index
    %981 = vector.load %arg1[%c432_339, %c0_340] : memref<656x480xbf16, #tpu.memory_space<vmem>>, vector<128x224xbf16>
    %cst_341 = arith.constant dense<0.000000e+00> : vector<8x224xf32>
    %982 = tpu.matmul %980, %981, %cst_341 {dimension_numbers = #tpu.dot_dimension_numbers<[1], [0], [0], [1], [0, 0, 1, 1], [], []>} : vector<8x128xbf16>, vector<128x224xbf16>, vector<8x224xf32> -> vector<8x224xf32>
    %983 = arith.truncf %979 : vector<8x64xf32> to vector<8x64xbf16>
    %c560_342 = arith.constant 560 : index
    %c0_343 = arith.constant 0 : index
    %984 = vector.load %arg1[%c560_342, %c0_343] : memref<656x480xbf16, #tpu.memory_space<vmem>>, vector<64x224xbf16>
    %cst_344 = arith.constant dense<0.000000e+00> : vector<8x224xf32>
    %985 = tpu.matmul %983, %984, %cst_344 {dimension_numbers = #tpu.dot_dimension_numbers<[1], [0], [0], [1], [0, 0, 1, 1], [], []>} : vector<8x64xbf16>, vector<64x224xbf16>, vector<8x224xf32> -> vector<8x224xf32>
    %986 = vector.extract_strided_slice %982 {offsets = [0, 0], sizes = [8, 96], strides = [1, 1]} : vector<8x224xf32> to vector<8x96xf32>
    %987 = vector.extract_strided_slice %985 {offsets = [0, 0], sizes = [8, 96], strides = [1, 1]} : vector<8x224xf32> to vector<8x96xf32>
    %988 = arith.addf %986, %987 : vector<8x96xf32>
    %c4_345 = arith.constant 4 : index
    %c0_346 = arith.constant 0 : index
    %989 = vector.load %arg2[%c4_345, %c0_346] : memref<8x480xf32, #tpu.memory_space<vmem>>, vector<1x96xf32>
    %990 = vector.broadcast %989 : vector<1x96xf32> to vector<8x96xf32>
    %991 = arith.addf %988, %990 : vector<8x96xf32>
    %992 = vector.extract_strided_slice %904 {offsets = [0, 384], sizes = [8, 96], strides = [1, 1]} : vector<8x480xf32> to vector<8x96xf32>
    %993 = vector.extract_strided_slice %991 {offsets = [0, 0], sizes = [8, 32], strides = [1, 1]} : vector<8x96xf32> to vector<8x32xf32>
    %994 = vector.extract_strided_slice %992 {offsets = [0, 0], sizes = [8, 32], strides = [1, 1]} : vector<8x96xf32> to vector<8x32xf32>
    %995 = arith.addf %993, %994 : vector<8x32xf32>
    %996 = arith.negf %995 : vector<8x32xf32>
    %997 = math.exp %996 : vector<8x32xf32>
    %cst_347 = arith.constant 1.000000e+00 : f32
    %998 = vector.broadcast %cst_347 : f32 to vector<8x32xf32>
    %999 = arith.addf %998, %997 : vector<8x32xf32>
    %1000 = arith.divf %998, %999 : vector<8x32xf32>
    %1001 = vector.extract_strided_slice %991 {offsets = [0, 32], sizes = [8, 32], strides = [1, 1]} : vector<8x96xf32> to vector<8x32xf32>
    %1002 = vector.extract_strided_slice %992 {offsets = [0, 32], sizes = [8, 32], strides = [1, 1]} : vector<8x96xf32> to vector<8x32xf32>
    %1003 = arith.addf %1001, %1002 : vector<8x32xf32>
    %1004 = arith.negf %1003 : vector<8x32xf32>
    %1005 = math.exp %1004 : vector<8x32xf32>
    %cst_348 = arith.constant 1.000000e+00 : f32
    %1006 = vector.broadcast %cst_348 : f32 to vector<8x32xf32>
    %1007 = arith.addf %1006, %1005 : vector<8x32xf32>
    %1008 = arith.divf %1006, %1007 : vector<8x32xf32>
    %1009 = vector.extract_strided_slice %991 {offsets = [0, 64], sizes = [8, 32], strides = [1, 1]} : vector<8x96xf32> to vector<8x32xf32>
    %1010 = vector.extract_strided_slice %992 {offsets = [0, 64], sizes = [8, 32], strides = [1, 1]} : vector<8x96xf32> to vector<8x32xf32>
    %1011 = arith.mulf %1000, %1010 : vector<8x32xf32>
    %1012 = arith.addf %1009, %1011 : vector<8x32xf32>
    %1013 = math.tanh %1012 : vector<8x32xf32>
    %cst_349 = arith.constant 1.000000e+00 : f32
    %1014 = vector.broadcast %cst_349 : f32 to vector<8x32xf32>
    %1015 = arith.subf %1014, %1008 : vector<8x32xf32>
    %1016 = arith.mulf %1015, %1013 : vector<8x32xf32>
    %1017 = arith.mulf %1008, %899 : vector<8x32xf32>
    %1018 = arith.addf %1016, %1017 : vector<8x32xf32>
    %1019 = arith.truncf %1018 : vector<8x32xf32> to vector<8x32xbf16>
    %c624_350 = arith.constant 624 : index
    %c0_351 = arith.constant 0 : index
    %1020 = vector.load %arg1[%c624_350, %c0_351] : memref<656x480xbf16, #tpu.memory_space<vmem>>, vector<32x480xbf16>
    %cst_352 = arith.constant dense<0.000000e+00> : vector<8x480xf32>
    %1021 = tpu.matmul %1019, %1020, %cst_352 {dimension_numbers = #tpu.dot_dimension_numbers<[1], [0], [0], [1], [0, 0, 1, 1], [], []>} : vector<8x32xbf16>, vector<32x480xbf16>, vector<8x480xf32> -> vector<8x480xf32>
    %1022 = vector.broadcast %324 : vector<1x480xf32> to vector<8x480xf32>
    %1023 = arith.addf %1021, %1022 : vector<8x480xf32>
    %1024 = vector.extract_strided_slice %1023 {offsets = [0, 0], sizes = [8, 128], strides = [1, 1]} : vector<8x480xf32> to vector<8x128xf32>
    %1025 = vector.extract_strided_slice %982 {offsets = [0, 96], sizes = [8, 128], strides = [1, 1]} : vector<8x224xf32> to vector<8x128xf32>
    %1026 = arith.addf %1024, %1025 : vector<8x128xf32>
    %1027 = vector.extract_strided_slice %985 {offsets = [0, 96], sizes = [8, 128], strides = [1, 1]} : vector<8x224xf32> to vector<8x128xf32>
    %1028 = arith.addf %1026, %1027 : vector<8x128xf32>
    %c5_353 = arith.constant 5 : index
    %c0_354 = arith.constant 0 : index
    %c0_355 = arith.constant 0 : index
    %1029 = vector.load %arg3[%c5_353, %c0_354, %c0_355] : memref<6x8x128xf32, #tpu.memory_space<vmem>>, vector<1x8x128xf32>
    %1030 = vector.shape_cast %1029 : vector<1x8x128xf32> to vector<8x128xf32>
    %1031 = vector.shape_cast %1028 : vector<8x128xf32> to vector<1x8x128xf32>
    tpu.vector_store %arg3[%c5_353, %c0_354, %c0_355], %1031 {strides = array<i32>} : memref<6x8x128xf32, #tpu.memory_space<vmem>>, vector<1x8x128xf32>,
    return
  }
}

</mosaic_0001>

<bundles_post_ra>
// kernel: tpu_custom_call.1
= control target key start
LH: loop header
LB: loop body
LE: loop exit
PB: predicated region body
PF: predicated region fallthrough
CT: control target
= control target key end

     0   :  { %8 = vsyncpa [#allocation6], 0  ;;  %s7463_s0 = inlined_call_operand.vmem [shape: bf16[64,40], index: 0, kind: input, shape index: {}]   ;;  %s7464_s1 = inlined_call_operand.hbm [shape: bf16[656,480], index: 1, kind: input, shape index: {}]   ;;  %s7465_s2 = inlined_call_operand.vmem [shape: f32[8,480], index: 2, kind: input, shape index: {}]   ;;  %s7466_s3 = inlined_call_operand.hbm [shape: f32[6,8,128], index: 3, kind: output, shape index: {}]  }
   0x1   :  { %9 = vsyncpa [#allocation7], 0  ;;  %s6287_s12 = smov [#allocation5]   ;;  %s6239_s16 = scalar_lea.hbm %s7464_s1, 20992 }
   0x2   :  { %s17_s13 = sshll.u32 %s6287_s12, 4  ;;  %p6240_p0 = scmp.ne.s32.totalorder %s7464_s1, %s6239_s16  ;;  %s18_s13 = int_to_ptr.vmem [resolvable:$true] %s17_s13 }
   0x3   :  { %p6243_p1 = scmp.lt.u32.totalorder %s6239_s16, %s7464_s1 }
   0x5   :  { %p6245_p2 = pnand %p6243_p1, %p6240_p0 }
   0x7   :  { %6248 = shalt.err (!%p6245_p2)
}
   0x8   :  { %s6249_s21 = scalar_lea.vmem %s18_s13, 20992  ;;  %p6254_p4 = scmp.lt.s32.totalorder %s18_s13, %s18_s13 }
   0x9   :  { %p6250_p3 = scmp.ne.s32.totalorder %s18_s13, %s6249_s21  ;;  %p6255_p5 = scmp.lt.s32.totalorder %s6249_s21, %s6249_s21 }
   0xb   :  { %p6256_p6 = por %p6255_p5, %p6254_p4 }
   0xd   :  { %p6257_p7 = pnand %p6256_p6, %p6250_p3 }
   0xf   :  { %6260 = shalt.err (!%p6257_p7)
}
  0x10   :  { %s6288_s22 = smov 256   ;;  %s6289_s23 = smov 16  }
  0x11   :  { %23 = dma.hbm_to_vmem [thread:$0]  %s7464_s1, 20992, %s18_s13, [#allocation6], %s6288_s22, %s6288_s22, %s6289_s23  }
  0x12   :  { %6283 = dma.done.wait [#allocation6], 20992  }
  0x13   :  { %6284 = vsyncadd [#allocation6], 4294946304  ;;  %v7483_v0 = vmov 0   ;;  %v5825_v1 = vld [vmem:[#allocation5 + $0x4] ss:$16 sps:$4 sm:$0xff]   ;;  %vm113_vm0 = vcmask 1043456   ;;  %v45_v18 = vlaneseq }
  0x14   :  { %152 = vmatprep.mubr.bf16.mxu0 %v7483_v0  ;;  %308 = vmatprep.mubr.bf16.mxu1 %v7483_v0  ;;  %v5827_v2 = vld [vmem:[#allocation5] ss:$16 sps:$4 sm:$0xff]   ;;  %v6342_v3 = vld [vmem:[#allocation5 + $0x64] ss:$16 sps:$4 sm:$0xff]   ;;  %vm100_vm1 = vcmask 326656   ;;  %vm194_vm2 = vcmask 523264  }
  0x15   :  { %5779 = vset.pattern.permute.xlu0 %v7483_v0  ;;  %120 = vmatprep.subr.bf16.mxu0 %v5825_v1  ;;  %v6344_v4 = vld [vmem:[#allocation5 + $0x60] ss:$16 sps:$4 sm:$0xff]   ;;  %v5831_v5 = vld [vmem:[#allocation5 + $0x24] ss:$16 sps:$4 sm:$0xff]   ;;  %v6392_v19 = vshrl.u32 %v45_v18, 7  ;;  %s6291_s4 = smov 64  }
  0x16   :  { %121 = vmatpush1.bf16.msra.mxu0 %v5827_v2  ;;  %v5833_v6 = vld [vmem:[#allocation5 + $0x20] ss:$16 sps:$4 sm:$0xff]   ;;  %276 = vmatprep.subr.bf16.mxu1 %v6342_v3  ;;  %v6347_v7 = vld [vmem:[#allocation5 + $0x84] ss:$16 sps:$4 sm:$0xff]   ;;  %vm6294_vm3 = vmmov 0   ;;  %vm339_vm4 = vcmask 261120  }
  0x17   :  { %277 = vmatpush1.bf16.msra.mxu1 %v6344_v4  ;;  %122 = vmatprep.subr.bf16.mxu0 %v5831_v5  ;;  %v6350_v8 = vld [vmem:[#allocation5 + $0x80] ss:$16 sps:$4 sm:$0xff]   ;;  %v6353_v12 = vld [vmem:[#allocation5 + $0xa4] ss:$16 sps:$4 sm:$0xff]   ;;  %v6395_v20 = vsub.s32 0, %v6392_v19  ;;  %v6401_v22 = vsub.s32 1, %v6392_v19 }
  0x18   :  { %v42_v9 = vld [vmem:[#allocation5 + $0x40] sm:$0xff]  ;;  %278 = vmatprep.subr.bf16.mxu1 %v6347_v7  ;;  %v5842_v15 = vld [vmem:[%s7463_s0] sm:$0xff]   ;;  %vm341_vm5 = vcmask 523520   ;;  %s6295_s15 = smov 32   ;;  %vm1053_vm6 = vcmask 785920   ;;  %vm1059_vm7 = vcmask 1048320  }
  0x19   :  { %v5219_v10 = vcombine.high %v42_v9, %v42_v9  ;;  %v5218_v11 = vcombine.low %v42_v9, %v42_v9  ;;  %v6355_v14 = vld [vmem:[#allocation5 + $0xa0] ss:$16 sps:$4 sm:$0xff]   ;;  %v6361_v16 = vld [vmem:[#allocation5 + $0xc4] ss:$16 sps:$4 sm:$0xff]   ;;  %vm1412_vm8 = vcmask 64512  }
  0x1a   :  { %123 = vmatpush1.bf16.msra.mxu0 %v5833_v6  ;;  %v6364_v17 = vld [vmem:[#allocation5 + $0xc0] ss:$16 sps:$4 sm:$0xff]  }
  0x1b   :  { %5220 = vmatprep.subr.msk.bf16.mxu0 %vm113_vm0, %v5219_v10  ;;  %v115_v13 = vsel %vm113_vm0, %v5218_v11, 0  ;;  %279 = vmatpush1.bf16.msra.mxu1 %v6350_v8  ;;  %v43_v21 = vld [vmem:[%s7465_s2] ss:$8 sm:$0x3] }
  0x1c   :  { %280 = vmatprep.subr.bf16.mxu1 %v6353_v12  ;;  %v6404_v23 = vrot.slane %v43_v21, %v6395_v20  ;;  %v6407_v24 = vrot.slane %v43_v21, %v6401_v22  ;;  %v5225_v26 = vld [vmem:[%s7465_s2 + $0x1] ss:$8 sm:$0x3] }
  0x1d   :  { %v6416_v33 = vrot.slane %v5225_v26, %v6395_v20  ;;  %v6423_v44 = vrot.slane %v5225_v26, %v6401_v22  ;;  %v5848_v26 = vld [vmem:[%s7463_s0 + $0x18] sm:$0xff]  }
  0x1e   :  { %125 = vmatpush1.bf16.msra.mxu0 %v115_v13 }
  0x1f   :  { %426 = vmatprep.subr.bf16.mxu0 %v6342_v3  ;;  %281 = vmatpush1.bf16.msra.mxu1 %v6355_v14 }
  0x20   :  { %282 = vmatprep.subr.bf16.mxu1 %v6361_v16 }
  0x21   :  { %5221 = vmatmul.mubr.msk.bf16.vlgmr.msra.gmra.mrb[0].mxu0 %vm100_vm1, %v5842_v15  ;;  %v5846_v15 = vld [vmem:[%s7463_s0 + $0x8] sm:$0xff]  }
  0x22   :  { %427 = vmatpush1.bf16.msra.mxu0 %v6344_v4  ;;  %162 = vmatprep.mubr.bf16.mxu0 %v7483_v0 }
  0x23   :  { %428 = vmatprep.subr.bf16.mxu0 %v6347_v7  ;;  %283 = vmatpush1.bf16.msra.mxu1 %v6364_v17 }
  0x24   :  { %352 = vmatprep.subr.bf16.mxu1 %v6342_v3 }
  0x26   :  { %429 = vmatpush1.bf16.msra.mxu0 %v6350_v8  ;;  %309 = vmatmul.mubr.bf16.vlgmr.msra.gmra.mrb[0].mxu1 %v7483_v0 }
  0x27   :  { %430 = vmatprep.subr.bf16.mxu0 %v6353_v12  ;;  %353 = vmatpush1.bf16.msra.mxu1 %v6344_v4 }
  0x28   :  { %384 = vmatprep.mubr.bf16.mxu1 %v7483_v0  ;;  %354 = vmatprep.subr.bf16.mxu1 %v6347_v7 }
  0x29   :  { %5222 = vmatmul.mubr.msk.bf16.gmra.mrb[4].mxu0 %vm100_vm1, %v5846_v15 }
  0x2a   :  { %431 = vmatpush1.bf16.msra.mxu0 %v6355_v14  ;;  %172 = vmatprep.mubr.bf16.mxu0 %v7483_v0 }
  0x2b   :  { %432 = vmatprep.subr.bf16.mxu0 %v6361_v16  ;;  %355 = vmatpush1.bf16.msra.mxu1 %v6350_v8 }
  0x2c   :  { %356 = vmatprep.subr.bf16.mxu1 %v6353_v12 }
  0x2e   :  { %433 = vmatpush1.bf16.msra.mxu0 %v6364_v17 }
  0x2f   :  { %574 = vmatprep.subr.bf16.mxu0 %v6342_v3  ;;  %357 = vmatpush1.bf16.msra.mxu1 %v6355_v14 }
  0x30   :  { %358 = vmatprep.subr.bf16.mxu1 %v6361_v16 }
  0x33   :  { %359 = vmatpush1.bf16.msra.mxu1 %v6364_v17 }
  0x34   :  { %500 = vmatprep.subr.bf16.mxu1 %v6342_v3 }
  0xf4   :  { %v154_v25 = vpop.f32.mrb[0].mxu0 }
  0xf5   :  { %v155_v27 = vadd.f32 %v154_v25, %v6404_v23  ;;  %v156_v28 = vpop.f32.mrb[1].mxu0  ;;  %v5847_v25 = vld [vmem:[%s7463_s0 + $0x10] sm:$0xff]   ;;  %s6292_s0 = smov 96  }
  0xf6   :  { %v157_v29 = vadd.f32 %v156_v28, %v6407_v24  ;;  %v158_v30 = vpop.f32.mrb[2].mxu0  ;;  %5223 = vmatmul.mubr.msk.bf16.gmra.mrb[8].mxu0 %vm100_vm1, %v5847_v25  ;;  %v6514_v25 = vld [vmem:[#allocation5 + $0x60] ss:$16 sps:$4 sm:$0xff]  }
  0xf7   :  { %v159_v31 = vadd.f32 %v158_v30, %v6404_v23  ;;  %v160_v32 = vpop.f32.mrb[3].mxu0  ;;  %182 = vmatprep.mubr.bf16.mxu0 %v7483_v0 }
  0xf8   :  { %195 = vst.msk [vmem:[#allocation2 + $0x8] sm:$0xff] %vm194_vm2, %v157_v29  ;;  %v161_v34 = vadd.f32 %v160_v32, %v6407_v24 }
  0xf9   :  { %v310_v35 = vpop.f32.mrb[0].mxu1 }
  0xfa   :  { %197 = vst.msk [vmem:[#allocation2 + $0x18] sm:$0xff] %vm194_vm2, %v161_v34  ;;  %v311_v36 = vadd.f32 %v310_v35, %v6416_v33  ;;  %v312_v37 = vpop.f32.mrb[1].mxu1 }
  0xfb   :  { %v314_v38 = vpop.f32.mrb[2].mxu1  ;;  %v313_v45 = vadd.f32 %v312_v37, %v6423_v44 }
  0xfc   :  { %v317_v39 = vadd.f32 %v311_v36, %v155_v27  ;;  %v315_v40 = vpop.f32.mrb[3].mxu1  ;;  %v164_v34 = vpop.f32.mrb[4].mxu0 }
  0xfd   :  { %v165_v35 = vadd.f32 %v164_v34, %v6404_v23  ;;  %v166_v36 = vpop.f32.mrb[5].mxu0 }
  0xfe   :  { %v5234_v41 = vmul.f32 -1.442695, %v317_v39  ;;  %5224 = vmatmul.mubr.msk.bf16.gmra.mrb[12].mxu0 %vm100_vm1, %v5848_v26  ;;  %v167_v37 = vadd.f32 %v166_v36, %v6407_v24  ;;  %v168_v38 = vpop.f32.mrb[6].mxu0  ;;  %v6518_v26 = vld [vmem:[#allocation5 + $0x84] ss:$16 sps:$4 sm:$0xff]  }
  0xff   :  { %v221_v48 = vld [vmem:[#allocation2 + $0x8] sm:$0xff]  ;;  %458 = vmatprep.mubr.bf16.mxu0 %v7483_v0  ;;  %v6469_v39 = vadd.f32 %v168_v38, %v6404_v23  ;;  %v170_v40 = vpop.f32.mrb[7].mxu0 }
 0x100   :  { %6099 = vpow2.f32 %v5234_v41  ;;  %199 = vst.msk [vmem:[#allocation2 + $0x28] sm:$0xff] %vm194_vm2, %v167_v37  ;;  %v171_v41 = vadd.f32 %v170_v40, %v6407_v24 }
 0x101   :  { %v344_v11 = vld [vmem:[#allocation2 + $0x18] sm:$0xff] }
 0x102   :  { %201 = vst.msk [vmem:[#allocation2 + $0x38] sm:$0xff] %vm194_vm2, %v171_v41 }
 0x10a   :  { %v6100_v42 = vpop.eup %6099 }
 0x10b   :  { %v321_v43 = vadd.f32 1.0, %v6100_v42 }
 0x10d   :  { %6101 = vrcp.f32 %v321_v43 }
 0x117   :  { %v6102_v46 = vpop.eup %6101 }
 0x118   :  { %v324_v47 = vmul.f32 %v6102_v46, %v313_v45  ;;  %v327_v51 = vsub.f32 1.0, %v6102_v46  ;;  %v333_v53 = vmul.f32 0.0, %v6102_v46 }
 0x11a   :  { %v325_v49 = vadd.f32 %v324_v47, %v221_v48 }
 0x11c   :  { %6103 = vtanh.f32 %v325_v49 }
 0x126   :  { %v6104_v50 = vpop.eup %6103 }
 0x127   :  { %329 = vrot.lane.b32.xlu0 %v6104_v50, %s6291_s4 }
 0x199   :  { %v330_v52 = vpop.permute.xlu0 %329 }
 0x19a   :  { %v332_v54 = vmul.f32 %v330_v52, %v327_v51 }
 0x19c   :  { %v6427_v55 = vadd.f32 %v333_v53, %v332_v54 }
 0x19e   :  { %v345_v56 = vpack.c.bf16 %v6427_v55, %v6427_v55 }
 0x1a0   :  { %347 = vrot.lane.b32.xlu0 %v345_v56, %s6291_s4 }
 0x1c9   :  { %v174_v42 = vpop.f32.mrb[8].mxu0 }
 0x1ca   :  { %v6475_v43 = vadd.f32 %v174_v42, %v6404_v23  ;;  %v176_v45 = vpop.f32.mrb[9].mxu0 }
 0x1cb   :  { %v177_v46 = vadd.f32 %v176_v45, %v6407_v24  ;;  %v178_v47 = vpop.f32.mrb[10].mxu0 }
 0x1cc   :  { %v6479_v48 = vadd.f32 %v178_v47, %v6404_v23  ;;  %v180_v49 = vpop.f32.mrb[11].mxu0 }
 0x1cd   :  { %203 = vst.msk [vmem:[#allocation2 + $0x48] sm:$0xff] %vm194_vm2, %v177_v46  ;;  %v181_v50 = vadd.f32 %v180_v49, %v6407_v24 }
 0x1cf   :  { %205 = vst.msk [vmem:[#allocation2 + $0x58] sm:$0xff] %vm194_vm2, %v181_v50 }
 0x1d1   :  { %v184_v51 = vpop.f32.mrb[12].mxu0 }
 0x1d2   :  { %v6485_v52 = vadd.f32 %v184_v51, %v6404_v23  ;;  %v186_v53 = vpop.f32.mrb[13].mxu0 }
 0x1d3   :  { %v187_v54 = vadd.f32 %v186_v53, %v6407_v24  ;;  %v188_v56 = vpop.f32.mrb[14].mxu0 }
 0x1d5   :  { %207 = vst.msk [vmem:[#allocation2 + $0x68] sm:$0xff] %vm194_vm2, %v187_v54 }
 0x212   :  { %v348_v57 = vpop.permute.xlu0 %347 }
 0x213   :  { %5235 = vmatmul.mubr.msk.bf16.vlgmr.msra.gmra.mrb[4].mxu1 %vm194_vm2, %v348_v57  ;;  %v6489_v57 = vadd.f32 %v188_v56, %v6404_v23 }
 0x214   :  { %501 = vmatpush1.bf16.msra.mxu1 %v6344_v4  ;;  %532 = vmatprep.mubr.bf16.mxu1 %v7483_v0 }
 0x215   :  { %502 = vmatprep.subr.bf16.mxu1 %v6347_v7 }
 0x218   :  { %503 = vmatpush1.bf16.msra.mxu1 %v6350_v8 }
 0x219   :  { %504 = vmatprep.subr.bf16.mxu1 %v6353_v12 }
 0x21c   :  { %505 = vmatpush1.bf16.msra.mxu1 %v6355_v14 }
 0x21d   :  { %506 = vmatprep.subr.bf16.mxu1 %v6361_v16 }
 0x220   :  { %507 = vmatpush1.bf16.msra.mxu1 %v6364_v17 }
 0x221   :  { %648 = vmatprep.subr.bf16.mxu1 %v6342_v3 }
 0x2e6   :  { %v386_v58 = vpop.f32.mrb[4].mxu1 }
 0x2e7   :  { %v387_v59 = vadd.f32 %v386_v58, %v6416_v33  ;;  %v388_v60 = vpop.f32.mrb[5].mxu1  ;;  %v190_v58 = vpop.f32.mrb[15].mxu0 }
 0x2e8   :  { %v390_v61 = vpop.f32.mrb[6].mxu1  ;;  %v389_v6 = vadd.f32 %v388_v60, %v6423_v44 }
 0x2e9   :  { %v393_v62 = vadd.f32 %v387_v59, %v159_v31  ;;  %v391_v63 = vpop.f32.mrb[7].mxu1  ;;  %v191_v59 = vadd.f32 %v190_v58, %v6407_v24 }
 0x2eb   :  { %v5236_v1 = vmul.f32 -1.442695, %v393_v62  ;;  %209 = vst.msk [vmem:[#allocation2 + $0x78] sm:$0xff] %vm194_vm2, %v191_v59 }
 0x2ed   :  { %6105 = vpow2.f32 %v5236_v1 }
 0x2f7   :  { %v6106_v2 = vpop.eup %6105 }
 0x2f8   :  { %v397_v5 = vadd.f32 1.0, %v6106_v2  ;;  %v418_v2 = vld [vmem:[#allocation2 + $0x28] sm:$0xff] }
 0x2fa   :  { %6107 = vrcp.f32 %v397_v5 }
 0x304   :  { %v6108_v9 = vpop.eup %6107 }
 0x305   :  { %v400_v10 = vmul.f32 %v6108_v9, %v389_v6  ;;  %v403_v27 = vsub.f32 1.0, %v6108_v9  ;;  %v409_v29 = vmul.f32 %v6108_v9, %v6427_v55 }
 0x307   :  { %v401_v13 = vadd.f32 %v400_v10, %v344_v11 }
 0x309   :  { %6109 = vtanh.f32 %v401_v13 }
 0x313   :  { %v6110_v21 = vpop.eup %6109 }
 0x314   :  { %405 = vrot.lane.b32.xlu1 %v6110_v21, %s6291_s4 }
 0x386   :  { %v406_v28 = vpop.permute.xlu1 %405 }
 0x387   :  { %v408_v30 = vmul.f32 %v406_v28, %v403_v27  ;;  %v6521_v27 = vld [vmem:[#allocation5 + $0x80] ss:$16 sps:$4 sm:$0xff]   ;;  %v6524_v28 = vld [vmem:[#allocation5 + $0xa4] ss:$16 sps:$4 sm:$0xff]  }
 0x389   :  { %v6461_v31 = vadd.f32 %v409_v29, %v408_v30  ;;  %v6527_v29 = vld [vmem:[#allocation5 + $0xa0] ss:$16 sps:$4 sm:$0xff]   ;;  %v6530_v30 = vld [vmem:[#allocation5 + $0xc4] ss:$16 sps:$4 sm:$0xff]  }
 0x38b   :  { %v419_v32 = vpack.c.bf16 %v6461_v31, %v6461_v31 }
 0x38d   :  { %421 = vrot.lane.b32.xlu1 %v419_v32, %s6291_s4  ;;  %v6237_v32 = vld [vmem:[#allocation5 + $0x64] ss:$16 sps:$4 sm:$0xff]  }
 0x3ff   :  { %v422_v60 = vpop.permute.xlu1 %421 }
 0x400   :  { %5237 = vmatmul.mubr.msk.bf16.vlgmr.msra.gmra.mrb[16].mxu0 %vm194_vm2, %v422_v60 }
 0x401   :  { %575 = vmatpush1.bf16.msra.mxu0 %v6344_v4  ;;  %606 = vmatprep.mubr.bf16.mxu0 %v7483_v0 }
 0x402   :  { %576 = vmatprep.subr.bf16.mxu0 %v6347_v7 }
 0x405   :  { %577 = vmatpush1.bf16.msra.mxu0 %v6350_v8 }
 0x406   :  { %578 = vmatprep.subr.bf16.mxu0 %v6353_v12 }
 0x409   :  { %579 = vmatpush1.bf16.msra.mxu0 %v6355_v14 }
 0x40a   :  { %580 = vmatprep.subr.bf16.mxu0 %v6361_v16 }
 0x40d   :  { %581 = vmatpush1.bf16.msra.mxu0 %v6364_v17 }
 0x40e   :  { %722 = vmatprep.subr.bf16.mxu0 %v6342_v3 }
 0x4d3   :  { %v460_v23 = vpop.f32.mrb[16].mxu0 }
 0x4d4   :  { %v461_v24 = vadd.f32 %v460_v23, %v6416_v33  ;;  %v462_v4 = vpop.f32.mrb[17].mxu0  ;;  %v6238_v23 = vld [vmem:[#allocation5 + $0xc0] ss:$16 sps:$4 sm:$0xff]  }
 0x4d5   :  { %v464_v61 = vpop.f32.mrb[18].mxu0  ;;  %v463_v12 = vadd.f32 %v462_v4, %v6423_v44 }
 0x4d6   :  { %v467_v62 = vadd.f32 %v461_v24, %v165_v35  ;;  %v465_v63 = vpop.f32.mrb[19].mxu0 }
 0x4d8   :  { %v5238_v7 = vmul.f32 -1.442695, %v467_v62 }
 0x4da   :  { %6111 = vpow2.f32 %v5238_v7 }
 0x4e4   :  { %v6112_v8 = vpop.eup %6111 }
 0x4e5   :  { %v471_v1 = vadd.f32 1.0, %v6112_v8 }
 0x4e7   :  { %6113 = vrcp.f32 %v471_v1 }
 0x4f1   :  { %v6114_v14 = vpop.eup %6113 }
 0x4f2   :  { %v474_v16 = vmul.f32 %v6114_v14, %v463_v12  ;;  %v477_v6 = vsub.f32 1.0, %v6114_v14  ;;  %v483_v10 = vmul.f32 %v6114_v14, %v6461_v31 }
 0x4f4   :  { %v475_v5 = vadd.f32 %v474_v16, %v418_v2 }
 0x4f6   :  { %6115 = vtanh.f32 %v475_v5  ;;  %v566_v5 = vld [vmem:[#allocation2 + $0x48] sm:$0xff] }
 0x500   :  { %v6116_v3 = vpop.eup %6115 }
 0x501   :  { %479 = vrot.lane.b32.xlu0 %v6116_v3, %s6291_s4 }
 0x573   :  { %v480_v9 = vpop.permute.xlu0 %479 }
 0x574   :  { %v482_v11 = vmul.f32 %v480_v9, %v477_v6 }
 0x576   :  { %v6508_v13 = vadd.f32 %v483_v10, %v482_v11 }
 0x578   :  { %v493_v15 = vpack.c.bf16 %v6508_v13, %v6508_v13 }
 0x57a   :  { %495 = vrot.lane.b32.xlu1 %v493_v15, %s6291_s4 }
 0x5ec   :  { %v496_v21 = vpop.permute.xlu1 %495 }
 0x5ed   :  { %5239 = vmatmul.mubr.msk.bf16.vlgmr.msra.gmra.mrb[8].mxu1 %vm194_vm2, %v496_v21 }
 0x5ee   :  { %649 = vmatpush1.bf16.msra.mxu1 %v6514_v25  ;;  %680 = vmatprep.mubr.bf16.mxu1 %v7483_v0 }
 0x5ef   :  { %650 = vmatprep.subr.bf16.mxu1 %v6518_v26 }
 0x5f2   :  { %651 = vmatpush1.bf16.msra.mxu1 %v6521_v27 }
 0x5f3   :  { %652 = vmatprep.subr.bf16.mxu1 %v6524_v28 }
 0x5f6   :  { %653 = vmatpush1.bf16.msra.mxu1 %v6527_v29 }
 0x5f7   :  { %654 = vmatprep.subr.bf16.mxu1 %v6530_v30 }
 0x5fa   :  { %655 = vmatpush1.bf16.msra.mxu1 %v6364_v17  ;;  %v492_v17 = vld [vmem:[#allocation2 + $0x38] sm:$0xff] }
 0x5fb   :  { %796 = vmatprep.subr.bf16.mxu1 %v6237_v32 }
 0x6c0   :  { %v534_v34 = vpop.f32.mrb[8].mxu1 }
 0x6c1   :  { %v535_v35 = vadd.f32 %v534_v34, %v6416_v33  ;;  %v536_v36 = vpop.f32.mrb[9].mxu1 }
 0x6c2   :  { %v538_v37 = vpop.f32.mrb[10].mxu1  ;;  %v537_v46 = vadd.f32 %v536_v36, %v6423_v44 }
 0x6c3   :  { %v541_v38 = vadd.f32 %v535_v35, %v6469_v39  ;;  %v539_v40 = vpop.f32.mrb[11].mxu1 }
 0x6c5   :  { %v5240_v41 = vmul.f32 -1.442695, %v541_v38 }
 0x6c7   :  { %6117 = vpow2.f32 %v5240_v41 }
 0x6d1   :  { %v6118_v42 = vpop.eup %6117 }
 0x6d2   :  { %v545_v45 = vadd.f32 1.0, %v6118_v42  ;;  %v640_v42 = vld [vmem:[#allocation2 + $0x58] sm:$0xff] }
 0x6d4   :  { %6119 = vrcp.f32 %v545_v45 }
 0x6de   :  { %v6120_v47 = vpop.eup %6119 }
 0x6df   :  { %v548_v49 = vmul.f32 %v6120_v47, %v537_v46  ;;  %v551_v53 = vsub.f32 1.0, %v6120_v47  ;;  %v557_v39 = vmul.f32 %v6120_v47, %v6508_v13 }
 0x6e1   :  { %v549_v50 = vadd.f32 %v548_v49, %v492_v17 }
 0x6e3   :  { %6121 = vtanh.f32 %v549_v50 }
 0x6ed   :  { %v6122_v51 = vpop.eup %6121 }
 0x6ee   :  { %553 = vrot.lane.b32.xlu0 %v6122_v51, %s6291_s4 }
 0x760   :  { %v554_v54 = vpop.permute.xlu0 %553 }
 0x761   :  { %v556_v56 = vmul.f32 %v554_v54, %v551_v53 }
 0x763   :  { %v6539_v58 = vadd.f32 %v557_v39, %v556_v56 }
 0x765   :  { %v567_v59 = vpack.c.bf16 %v6539_v58, %v6539_v58 }
 0x767   :  { %569 = vrot.lane.b32.xlu1 %v567_v59, %s6291_s4 }
 0x7d9   :  { %v570_v60 = vpop.permute.xlu1 %569 }
 0x7da   :  { %5241 = vmatmul.mubr.msk.bf16.vlgmr.msra.gmra.mrb[20].mxu0 %vm194_vm2, %v570_v60 }
 0x7db   :  { %723 = vmatpush1.bf16.msra.mxu0 %v6514_v25  ;;  %754 = vmatprep.mubr.bf16.mxu0 %v7483_v0 }
 0x7dc   :  { %724 = vmatprep.subr.bf16.mxu0 %v6518_v26 }
 0x7df   :  { %725 = vmatpush1.bf16.msra.mxu0 %v6521_v27 }
 0x7e0   :  { %726 = vmatprep.subr.bf16.mxu0 %v6524_v28 }
 0x7e3   :  { %727 = vmatpush1.bf16.msra.mxu0 %v6527_v29 }
 0x7e4   :  { %728 = vmatprep.subr.bf16.mxu0 %v6530_v30 }
 0x7e7   :  { %729 = vmatpush1.bf16.msra.mxu0 %v6238_v23 }
 0x8ad   :  { %v608_v24 = vpop.f32.mrb[20].mxu0 }
 0x8ae   :  { %v609_v4 = vadd.f32 %v608_v24, %v6416_v33  ;;  %v610_v61 = vpop.f32.mrb[21].mxu0 }
 0x8af   :  { %v612_v62 = vpop.f32.mrb[22].mxu0  ;;  %v611_v14 = vadd.f32 %v610_v61, %v6423_v44 }
 0x8b0   :  { %v615_v63 = vadd.f32 %v609_v4, %v6475_v43  ;;  %v613_v7 = vpop.f32.mrb[23].mxu0 }
 0x8b1   :  { %v714_v7 = vld [vmem:[#allocation2 + $0x68] sm:$0xff] }
 0x8b2   :  { %v5242_v8 = vmul.f32 -1.442695, %v615_v63 }
 0x8b4   :  { %6123 = vpow2.f32 %v5242_v8 }
 0x8be   :  { %v6124_v1 = vpop.eup %6123 }
 0x8bf   :  { %v619_v12 = vadd.f32 1.0, %v6124_v1 }
 0x8c1   :  { %6125 = vrcp.f32 %v619_v12 }
 0x8cb   :  { %v6126_v16 = vpop.eup %6125 }
 0x8cc   :  { %v622_v2 = vmul.f32 %v6126_v16, %v611_v14  ;;  %v625_v9 = vsub.f32 1.0, %v6126_v16  ;;  %v631_v43 = vmul.f32 %v6126_v16, %v6539_v58 }
 0x8ce   :  { %v623_v3 = vadd.f32 %v622_v2, %v566_v5 }
 0x8d0   :  { %6127 = vtanh.f32 %v623_v3 }
 0x8da   :  { %v6128_v6 = vpop.eup %6127 }
 0x8db   :  { %627 = vrot.lane.b32.xlu0 %v6128_v6, %s6291_s4 }
 0x94d   :  { %v628_v10 = vpop.permute.xlu0 %627 }
 0x94e   :  { %v630_v11 = vmul.f32 %v628_v10, %v625_v9 }
 0x950   :  { %v6557_v15 = vadd.f32 %v631_v43, %v630_v11 }
 0x952   :  { %v641_v21 = vpack.c.bf16 %v6557_v15, %v6557_v15 }
 0x954   :  { %643 = vrot.lane.b32.xlu1 %v641_v21, %s6291_s4 }
 0x9c6   :  { %v644_v32 = vpop.permute.xlu1 %643 }
 0x9c7   :  { %5243 = vmatmul.mubr.msk.bf16.vlgmr.msra.gmra.mrb[12].mxu1 %vm194_vm2, %v644_v32 }
 0x9c8   :  { %797 = vmatpush1.bf16.msra.mxu1 %v6514_v25  ;;  %828 = vmatprep.mubr.bf16.mxu1 %v7483_v0 }
 0x9c9   :  { %798 = vmatprep.subr.bf16.mxu1 %v6518_v26 }
 0x9cc   :  { %799 = vmatpush1.bf16.msra.mxu1 %v6521_v27 }
 0x9cd   :  { %800 = vmatprep.subr.bf16.mxu1 %v6524_v28 }
 0x9d0   :  { %801 = vmatpush1.bf16.msra.mxu1 %v6527_v29 }
 0x9d1   :  { %802 = vmatprep.subr.bf16.mxu1 %v6530_v30 }
 0x9d4   :  { %803 = vmatpush1.bf16.msra.mxu1 %v6238_v23 }
 0xa9a   :  { %v682_v34 = vpop.f32.mrb[12].mxu1 }
 0xa9b   :  { %v683_v35 = vadd.f32 %v682_v34, %v6416_v33  ;;  %v684_v36 = vpop.f32.mrb[13].mxu1 }
 0xa9c   :  { %v686_v37 = vpop.f32.mrb[14].mxu1  ;;  %v685_v27 = vadd.f32 %v684_v36, %v6423_v44 }
 0xa9d   :  { %v689_v25 = vadd.f32 %v683_v35, %v6479_v48  ;;  %v687_v38 = vpop.f32.mrb[15].mxu1 }
 0xa9e   :  { %v788_v38 = vld [vmem:[#allocation2 + $0x78] sm:$0xff] }
 0xa9f   :  { %v5244_v40 = vmul.f32 -1.442695, %v689_v25 }
 0xaa1   :  { %6129 = vpow2.f32 %v5244_v40 }
 0xaab   :  { %v6130_v26 = vpop.eup %6129 }
 0xaac   :  { %v693_v41 = vadd.f32 1.0, %v6130_v26 }
 0xaae   :  { %6131 = vrcp.f32 %v693_v41  ;;  %v5850_v41 = vld [vmem:[#allocation5 + $0x100] ss:$16 sps:$4 sm:$0xff]  }
 0xab8   :  { %v6132_v28 = vpop.eup %6131 }
 0xab9   :  { %v696_v29 = vmul.f32 %v6132_v28, %v685_v27  ;;  %v699_v46 = vsub.f32 1.0, %v6132_v28  ;;  %v705_v48 = vmul.f32 %v6132_v28, %v6557_v15 }
 0xabb   :  { %v697_v30 = vadd.f32 %v696_v29, %v640_v42 }
 0xabd   :  { %6133 = vtanh.f32 %v697_v30 }
 0xac7   :  { %v6134_v45 = vpop.eup %6133 }
 0xac8   :  { %701 = vrot.lane.b32.xlu0 %v6134_v45, %s6291_s4 }
 0xb3a   :  { %v702_v47 = vpop.permute.xlu0 %701 }
 0xb3b   :  { %v704_v49 = vmul.f32 %v702_v47, %v699_v46 }
 0xb3d   :  { %v6575_v17 = vadd.f32 %v705_v48, %v704_v49  ;;  %v6620_v48 = vld [vmem:[#allocation5 + $0x4e0] ss:$16 sps:$4 sm:$0xff]  }
 0xb3f   :  { %v715_v50 = vpack.c.bf16 %v6575_v17, %v6575_v17 }
 0xb41   :  { %717 = vrot.lane.b32.xlu1 %v715_v50, %s6291_s4 }
 0xbb3   :  { %v718_v51 = vpop.permute.xlu1 %717 }
 0xbb4   :  { %5245 = vmatmul.mubr.msk.bf16.vlgmr.msra.gmra.mrb[24].mxu0 %vm194_vm2, %v718_v51 }
 0xc87   :  { %v756_v53 = vpop.f32.mrb[24].mxu0 }
 0xc88   :  { %v757_v54 = vadd.f32 %v756_v53, %v6416_v33  ;;  %v758_v39 = vpop.f32.mrb[25].mxu0 }
 0xc89   :  { %v760_v56 = vpop.f32.mrb[26].mxu0  ;;  %v759_v61 = vadd.f32 %v758_v39, %v6423_v44 }
 0xc8a   :  { %v763_v59 = vadd.f32 %v757_v54, %v6485_v52  ;;  %v761_v60 = vpop.f32.mrb[27].mxu0 }
 0xc8c   :  { %v5246_v23 = vmul.f32 -1.442695, %v763_v59 }
 0xc8e   :  { %6135 = vpow2.f32 %v5246_v23 }
 0xc98   :  { %v6136_v24 = vpop.eup %6135 }
 0xc99   :  { %v767_v4 = vadd.f32 1.0, %v6136_v24 }
 0xc9b   :  { %6137 = vrcp.f32 %v767_v4 }
 0xca5   :  { %v6138_v62 = vpop.eup %6137 }
 0xca6   :  { %v770_v63 = vmul.f32 %v6138_v62, %v759_v61  ;;  %v773_v12 = vsub.f32 1.0, %v6138_v62  ;;  %v779_v52 = vmul.f32 %v6138_v62, %v6575_v17 }
 0xca8   :  { %v771_v8 = vadd.f32 %v770_v63, %v714_v7 }
 0xcaa   :  { %6139 = vtanh.f32 %v771_v8 }
 0xcb4   :  { %v6140_v1 = vpop.eup %6139 }
 0xcb5   :  { %775 = vrot.lane.b32.xlu0 %v6140_v1, %s6291_s4 }
 0xd27   :  { %v776_v14 = vpop.permute.xlu0 %775 }
 0xd28   :  { %v778_v16 = vmul.f32 %v776_v14, %v773_v12  ;;  %v6663_v14 = vld [vmem:[#allocation5 + $0x504] ss:$16 sps:$4 sm:$0xff]  }
 0xd2a   :  { %v780_v2 = vadd.f32 %v779_v52, %v778_v16  ;;  %v6665_v52 = vld [vmem:[#allocation5 + $0x500] ss:$16 sps:$4 sm:$0xff]   ;;  %v6669_v16 = vld [vmem:[#allocation5 + $0x4ec] ss:$16 sps:$4 sm:$0xff]  }
 0xd2c   :  { %v789_v5 = vpack.c.bf16 %v780_v2, %v780_v2 }
 0xd2e   :  { %791 = vrot.lane.b32.xlu1 %v789_v5, %s6291_s4 }
 0xda0   :  { %v792_v3 = vpop.permute.xlu1 %791 }
 0xda1   :  { %5247 = vmatmul.mubr.msk.bf16.vlgmr.msra.gmra.mrb[16].mxu1 %vm194_vm2, %v792_v3 }
 0xe74   :  { %v830_v6 = vpop.f32.mrb[16].mxu1 }
 0xe75   :  { %v831_v9 = vadd.f32 %v830_v6, %v6416_v33  ;;  %v832_v10 = vpop.f32.mrb[17].mxu1  ;;  %v5849_v33 = vld [vmem:[#allocation5 + $0xe0] ss:$16 sps:$4 sm:$0xff]  }
 0xe76   :  { %v834_v43 = vpop.f32.mrb[18].mxu1  ;;  %v833_v36 = vadd.f32 %v832_v10, %v6423_v44  ;;  %v6293_v44 = vmov 0.0   ;;  %v6677_v10 = vld [vmem:[#allocation5 + $0x4e8] ss:$16 sps:$4 sm:$0xff]  }
 0xe77   :  { %v837_v11 = vadd.f32 %v831_v9, %v6489_v57  ;;  %v835_v21 = vpop.f32.mrb[19].mxu1  ;;  %5731 = vmatprep.subr.bf16.mxu0 %v6293_v44  ;;  %5739 = vmatprep.mubr.msk.bf16.mxu0 %vm6294_vm3, %v6293_v44  ;;  %v5851_v57 = vld [vmem:[#allocation5 + $0x120] ss:$16 sps:$4 sm:$0xff]  }
 0xe78   :  { %5732 = vmatpush3.bf16.msra.mxu0 %v5849_v33  ;;  %v6681_v21 = vld [vmem:[#allocation5 + $0x50c] ss:$16 sps:$4 sm:$0xff]  }
 0xe79   :  { %v5248_v32 = vmul.f32 -1.442695, %v837_v11  ;;  %5733 = vmatprep.subr.bf16.mxu0 %v6293_v44 }
 0xe7b   :  { %6141 = vpow2.f32 %v5248_v32  ;;  %v6685_v32 = vld [vmem:[#allocation5 + $0x508] ss:$16 sps:$4 sm:$0xff]  }
 0xe7c   :  { %5734 = vmatpush3.bf16.msra.mxu0 %v5850_v41 }
 0xe7d   :  { %5735 = vmatprep.subr.bf16.mxu0 %v6293_v44 }
 0xe80   :  { %5736 = vmatpush3.bf16.msra.mxu0 %v5851_v57 }
 0xe81   :  { %5737 = vmatprep.subr.bf16.mxu0 %v6293_v44  ;;  %v5866_v44 = vld [vmem:[#allocation5 + $0x160] ss:$16 sps:$4 sm:$0xff]  }
 0xe85   :  { %v6142_v34 = vpop.eup %6141 }
 0xe86   :  { %v841_v35 = vadd.f32 1.0, %v6142_v34  ;;  %v953_v34 = vld [vmem:[%s7465_s2 + $0x3] ss:$0 sm:$0xff] }
 0xe88   :  { %6143 = vrcp.f32 %v841_v35 }
 0xe92   :  { %v6144_v37 = vpop.eup %6143 }
 0xe93   :  { %v844_v25 = vmul.f32 %v6144_v37, %v833_v36  ;;  %v853_v28 = vmul.f32 %v6144_v37, %v780_v2 }
 0xe95   :  { %v845_v40 = vadd.f32 %v844_v25, %v788_v38 }
 0xe97   :  { %6145 = vtanh.f32 %v845_v40 }
 0xea1   :  { %v6146_v26 = vpop.eup %6145 }
 0xea2   :  { %849 = vrot.lane.b32.xlu0 %v6146_v26, %s6291_s4 }
 0xea6   :  { %954 = vrot.lane.b32.xlu0 %v5849_v33, %s6292_s0  ;;  %v5865_v33 = vld [vmem:[#allocation5 + $0x260] ss:$16 sps:$4 sm:$0xff]  }
 0xeaa   :  { %412 = vrot.lane.b32.xlu0 %v6461_v31, %s6291_s4  ;;  %v5852_v31 = vld [vmem:[#allocation5 + $0x140] ss:$16 sps:$4 sm:$0xff]  }
 0xeab   :  { %5738 = vmatpush3.bf16.msra.mxu0 %v5852_v31 }
 0xeae   :  { %486 = vrot.lane.b32.xlu0 %v6508_v13, %s6291_s4  ;;  %v847_v13 = vsub.f32 1.0, %v6144_v37 }
 0xeb2   :  { %782 = vrot.lane.b32.xlu0 %v780_v2, %s6291_s4  ;;  %v870_v2 = vld [vmem:[%s7465_s2 + $0x2] ss:$0 sm:$0xff] }
 0xeb6   :  { %634 = vrot.lane.b32.xlu0 %v6557_v15, %s6291_s4 }
 0xeba   :  { %958 = vrot.lane.b32.xlu0 %v5851_v57, %s6292_s0  ;;  %v5867_v57 = vld [vmem:[#allocation5 + $0x280] ss:$16 sps:$4 sm:$0xff]  }
 0xf14   :  { %v850_v27 = vpop.permute.xlu0 %849 }
 0xf15   :  { %v852_v29 = vmul.f32 %v850_v27, %v847_v13 }
 0xf17   :  { %v854_v42 = vadd.f32 %v853_v28, %v852_v29 }
 0xf18   :  { %v955_v30 = vpop.permute.xlu0 %954 }
 0xf19   :  { %v861_v45 = vpack.c.bf16 %v854_v42, %v854_v42  ;;  %5743 = vmatprep.subr.bf16.mxu1 %v955_v30 }
 0xf1a   :  { %5744 = vmatpush3.bf16.msra.mxu1 %v955_v30 }
 0xf1b   :  { %872 = vrot.lane.b32.xlu1 %v861_v45, %s6291_s4 }
 0xf1c   :  { %v413_v15 = vpop.permute.xlu0 %412 }
 0xf1d   :  { %415 = vst.msk [vmem:[#allocation3 + $0x8] sm:$0xff] %vm339_vm4, %v413_v15 }
 0xf1e   :  { %416 = vst.msk [vmem:[#allocation3 + $0x30] sm:$0xff] %vm341_vm5, %v413_v15  ;;  %v5868_v15 = vld [vmem:[#allocation5 + $0x180] ss:$16 sps:$4 sm:$0xff]  }
 0xf1f   :  { %336 = vrot.lane.b32.xlu1 %v6427_v55, %s6291_s4  ;;  %v6617_v55 = vld [vmem:[#allocation5 + $0x4e4] ss:$16 sps:$4 sm:$0xff]  }
 0xf20   :  { %v487_v46 = vpop.permute.xlu0 %486  ;;  %1155 = vmatprep.subr.bf16.mxu0 %v6617_v55 }
 0xf21   :  { %489 = vst.msk [vmem:[#allocation3 + $0x10] sm:$0xff] %vm339_vm4, %v487_v46 }
 0xf22   :  { %490 = vst.msk [vmem:[#allocation3 + $0x28] sm:$0xff] %vm341_vm5, %v487_v46  ;;  %v5869_v46 = vld [vmem:[#allocation5 + $0x2a0] ss:$16 sps:$4 sm:$0xff]  }
 0xf23   :  { %956 = vrot.lane.b32.xlu1 %v5850_v41, %s6292_s0 }
 0xf24   :  { %v783_v47 = vpop.permute.xlu0 %782 }
 0xf25   :  { %785 = vst.msk [vmem:[#allocation3 + $0x30] sm:$0xff] %vm339_vm4, %v783_v47 }
 0xf26   :  { %786 = vst.msk [vmem:[#allocation3 + $0x8] sm:$0xff] %vm341_vm5, %v783_v47  ;;  %v5870_v47 = vld [vmem:[#allocation5 + $0x1a0] ss:$16 sps:$4 sm:$0xff]  }
 0xf27   :  { %560 = vrot.lane.b32.xlu1 %v6539_v58, %s6291_s4 }
 0xf28   :  { %v635_v58 = vpop.permute.xlu0 %634 }
 0xf2b   :  { %856 = vrot.lane.b32.xlu1 %v854_v42, %s6291_s4 }
 0xf2c   :  { %v959_v51 = vpop.permute.xlu0 %958  ;;  %v6658_v1 = vld [vmem:[#allocation3 + $0x30] sm:$0xff] }
 0xf2d   :  { %v6637_v60 = vld [vmem:[#allocation3 + $0x8] sm:$0xff] }
 0xf2f   :  { %708 = vrot.lane.b32.xlu1 %v6575_v17, %s6291_s4 }
 0xf33   :  { %960 = vrot.lane.b32.xlu1 %v5852_v31, %s6292_s0 }
 0xf8d   :  { %v873_v49 = vpop.permute.xlu1 %872 }
 0xf8e   :  { %5740 = vmatmul.mubr.msk.bf16.vlgmr.msra.gmra.mrb[28].mxu0 %vm194_vm2, %v873_v49  ;;  %v5871_v49 = vld [vmem:[#allocation5 + $0x2c0] ss:$16 sps:$4 sm:$0xff]  }
 0xf8f   :  { %1156 = vmatpush1.bf16.msra.mxu0 %v6620_v48  ;;  %1187 = vmatprep.mubr.bf16.mxu0 %v7483_v0 }
 0xf90   :  { %1157 = vmatprep.subr.bf16.mxu0 %v6663_v14 }
 0xf91   :  { %v337_v50 = vpop.permute.xlu1 %336 }
 0xf92   :  { %340 = vst.msk [vmem:[#allocation3] sm:$0xff] %vm339_vm4, %v337_v50 }
 0xf93   :  { %342 = vst.msk [vmem:[#allocation3 + $0x38] sm:$0xff] %vm341_vm5, %v337_v50  ;;  %1158 = vmatpush1.bf16.msra.mxu0 %v6665_v52  ;;  %v5873_v50 = vld [vmem:[#allocation5 + $0x2e0] ss:$16 sps:$4 sm:$0xff]  }
 0xf94   :  { %1195 = vmatprep.subr.bf16.mxu0 %v6669_v16 }
 0xf95   :  { %v957_v17 = vpop.permute.xlu1 %956 }
 0xf96   :  { %5745 = vmatprep.subr.bf16.mxu1 %v957_v17 }
 0xf97   :  { %5746 = vmatpush3.bf16.msra.mxu1 %v957_v17  ;;  %v5874_v17 = vld [vmem:[#allocation5 + $0x1e0] ss:$16 sps:$4 sm:$0xff]  }
 0xf98   :  { %5747 = vmatprep.subr.bf16.mxu1 %v959_v51 }
 0xf99   :  { %v561_v53 = vpop.permute.xlu1 %560 }
 0xf9a   :  { %563 = vst.msk [vmem:[#allocation3 + $0x18] sm:$0xff] %vm339_vm4, %v561_v53 }
 0xf9b   :  { %564 = vst.msk [vmem:[#allocation3 + $0x20] sm:$0xff] %vm341_vm5, %v561_v53  ;;  %638 = vst.msk [vmem:[#allocation3 + $0x18] sm:$0xff] %vm341_vm5, %v635_v58  ;;  %5748 = vmatpush3.bf16.msra.mxu1 %v959_v51  ;;  %v5875_v51 = vld [vmem:[#allocation5 + $0x300] ss:$16 sps:$4 sm:$0xff]  }
 0xf9c   :  { %637 = vst.msk [vmem:[#allocation3 + $0x20] sm:$0xff] %vm339_vm4, %v635_v58  ;;  %v5872_v58 = vld [vmem:[#allocation5 + $0x1c0] ss:$16 sps:$4 sm:$0xff]  }
 0xf9d   :  { %v857_v54 = vpop.permute.xlu1 %856  ;;  %v5876_v53 = vld [vmem:[#allocation5 + $0x200] ss:$16 sps:$4 sm:$0xff]  }
 0xf9e   :  { %859 = vst.msk [vmem:[#allocation3 + $0x38] sm:$0xff] %vm339_vm4, %v857_v54 }
 0xf9f   :  { %860 = vst.msk [vmem:[#allocation3] sm:$0xff] %vm341_vm5, %v857_v54  ;;  %v5877_v54 = vld [vmem:[#allocation5 + $0x320] ss:$16 sps:$4 sm:$0xff]  }
 0xfa1   :  { %v709_v39 = vpop.permute.xlu1 %708 }
 0xfa2   :  { %711 = vst.msk [vmem:[#allocation3 + $0x28] sm:$0xff] %vm339_vm4, %v709_v39  ;;  %v6642_v24 = vld [vmem:[#allocation3 + $0x18] sm:$0xff] }
 0xfa3   :  { %712 = vst.msk [vmem:[#allocation3 + $0x10] sm:$0xff] %vm341_vm5, %v709_v39  ;;  %v6646_v61 = vld [vmem:[#allocation3 + $0x20] sm:$0xff] }
 0xfa4   :  { %v5878_v39 = vld [vmem:[#allocation5 + $0x220] ss:$16 sps:$4 sm:$0xff]  }
 0xfa5   :  { %v961_v56 = vpop.permute.xlu1 %960  ;;  %v6656_v8 = vld [vmem:[#allocation3 + $0x38] sm:$0xff] }
 0xfa6   :  { %v6635_v59 = vld [vmem:[#allocation3] sm:$0xff]  ;;  %5749 = vmatprep.subr.bf16.mxu1 %v961_v56  ;;  %v952_v12 = vpack.c.bf16 %v6656_v8, %v6658_v1 }
 0xfa7   :  { %v949_v23 = vpack.c.bf16 %v6637_v60, %v6635_v59  ;;  %5750 = vmatpush3.bf16.msra.mxu1 %v961_v56  ;;  %v5879_v56 = vld [vmem:[#allocation5 + $0x340] ss:$16 sps:$4 sm:$0xff]  }
 0xfa8   :  { %5599 = vmatprep.subr.bf16.mxu1 %v5865_v33 }
 0xfa9   :  { %5751 = vmatprep.mubr.msk.bf16.mxu1 %vm194_vm2, %v949_v23  ;;  %v6648_v62 = vld [vmem:[#allocation3 + $0x28] sm:$0xff]  ;;  %v5880_v23 = vld [vmem:[#allocation5 + $0x240] ss:$16 sps:$4 sm:$0xff]  }
 0xfaa   :  { %v6644_v4 = vld [vmem:[#allocation3 + $0x10] sm:$0xff]  ;;  %v951_v7 = vpack.c.bf16 %v6648_v62, %v6646_v61 }
 0xfab   :  { %v950_v63 = vpack.c.bf16 %v6642_v24, %v6644_v4 }
 0xfad   :  { %5752 = vmatmul.mubr.msk.bf16.vlgmr.msra.gmra.mrb[20].mxu1 %vm194_vm2, %v950_v63 }
 0xfae   :  { %5755 = vmatprep.mubr.msk.bf16.mxu1 %vm194_vm2, %v951_v7  ;;  %5600 = vmatpush3.bf16.msra.mxu1 %v5866_v44 }
 0xfaf   :  { %5601 = vmatprep.subr.bf16.mxu1 %v5867_v57 }
 0xfb2   :  { %5602 = vmatpush3.bf16.msra.mxu1 %v5868_v15 }
 0xfb3   :  { %5603 = vmatprep.subr.bf16.mxu1 %v5869_v46 }
 0xfb5   :  { %5756 = vmatmul.mubr.msk.bf16.gmra.mrb[24].mxu1 %vm194_vm2, %v952_v12 }
 0xfb6   :  { %5604 = vmatpush3.bf16.msra.mxu1 %v5870_v47 }
 0xfb7   :  { %5605 = vmatprep.subr.bf16.mxu1 %v5871_v49 }
 0xfba   :  { %5606 = vmatpush3.bf16.msra.mxu1 %v5872_v58  ;;  %v7467_v58 = vmov 1  }
 0xfbb   :  { %5607 = vmatprep.subr.bf16.mxu1 %v5873_v50  ;;  %5780 = vset.pattern.permute.xlu1 %v7467_v58 }
 0xfbe   :  { %5608 = vmatpush3.bf16.msra.mxu1 %v5874_v17 }
 0xfbf   :  { %5609 = vmatprep.subr.bf16.mxu1 %v5875_v51 }
 0xfc2   :  { %5610 = vmatpush3.bf16.msra.mxu1 %v5876_v53  ;;  %v1106_v53 = vsub.s32 3, %v6392_v19 }
 0xfc3   :  { %5611 = vmatprep.subr.bf16.mxu1 %v5877_v54 }
 0xfc6   :  { %5612 = vmatpush3.bf16.msra.mxu1 %v5878_v39 }
 0xfc7   :  { %5613 = vmatprep.subr.bf16.mxu1 %v5879_v56 }
 0xfca   :  { %5614 = vmatpush3.bf16.msra.mxu1 %v5880_v23  ;;  %v7481_v23 = vmov 2  }
0x1061   :  { %v935_v5 = vpop.f32.mrb[28].mxu0 }
0x1062   :  { %v6675_v3 = vadd.f32 %v935_v5, %v870_v2  ;;  %v5741_v6 = vpop.f32.mrb[29].mxu0 }
0x1063   :  { %v938_v9 = vpop.f32.mrb[30].mxu0 }
0x1064   :  { %v1082_v43 = vpack.c.bf16 %v6675_v3, %v6675_v3  ;;  %v5742_v11 = vpop.f32.mrb[31].mxu0  ;;  %v6708_v9 = vld [vmem:[%s7465_s2 + $0x5] ss:$8 sm:$0xf] }
0x1065   :  { %v6712_v11 = vrot.slane %v6708_v9, %v6401_v22  ;;  %v6731_v54 = vrot.slane %v6708_v9, %v1106_v53 }
0x1066   :  { %5267 = vmatmul.mubr.msk.bf16.vlgmr.msra.gmra.mrb[32].mxu0 %vm339_vm4, %v1082_v43 }
0x1067   :  { %1196 = vmatpush1.bf16.msra.mxu0 %v6677_v10  ;;  %1227 = vmatprep.mubr.bf16.mxu0 %v7483_v0  ;;  %7503 = vst [vmem:[#allocation11_spill] sm:$0xff] %v6731_v54 }
0x1068   :  { %1197 = vmatprep.subr.bf16.mxu0 %v6681_v21 }
0x106b   :  { %1198 = vmatpush1.bf16.msra.mxu0 %v6685_v32 }
0x106e   :  { %5268 = vmatmul.mubr.msk.bf16.vlgmr.msra.gmra.mrb[36].mxu0 %vm339_vm4, %v1082_v43 }
0x106f   :  { %1611 = vmatprep.mubr.bf16.mxu0 %v7483_v0 }
0x1080   :  { %v5753_v35 = vpop.f32.mrb[20].mxu1 }
0x1081   :  { %v1021_v36 = vadd.f32 %v5753_v35, %v953_v34  ;;  %v1012_v37 = vpop.f32.mrb[21].mxu1  ;;  %v1102_v35 = vsub.s32 2, %v6392_v19  ;;  %v7477_v19 = vmov 4  }
0x1082   :  { %v1013_v25 = vadd.f32 %v1012_v37, %v953_v34  ;;  %v5754_v38 = vpop.f32.mrb[22].mxu1 }
0x1083   :  { %1050 = vrot.lane.b32.xlu1 %v1021_v36, %s6291_s4  ;;  %v1015_v40 = vpop.f32.mrb[23].mxu1  ;;  %v1024_v31 = vadd.f32 %v5754_v38, %v953_v34  ;;  %v6717_v38 = vrot.slane %v6708_v9, %v1102_v35  ;;  %v6756_v35 = vld [vmem:[#allocation5 + $0x3a4] ss:$16 sps:$4 sm:$0xff]  }
0x1084   :  { %1043 = vst.msk [vmem:[#allocation4] sm:$0xff] %vm339_vm4, %v1013_v25  ;;  %v1016_v26 = vadd.f32 %v1015_v40, %v953_v34 }
0x1087   :  { %1045 = vrot.lane.b32.xlu1 %v1016_v26, %s6295_s15 }
0x1088   :  { %v5757_v41 = vpop.f32.mrb[24].mxu1 }
0x1089   :  { %v1037_v13 = vadd.f32 %v5757_v41, %v953_v34  ;;  %v1028_v27 = vpop.f32.mrb[25].mxu1 }
0x108a   :  { %v1029_v28 = vadd.f32 %v1028_v27, %v953_v34  ;;  %v5758_v29 = vpop.f32.mrb[26].mxu1 }
0x108b   :  { %1068 = vrot.lane.b32.xlu0 %v1037_v13, %s6291_s4  ;;  %v1031_v42 = vpop.f32.mrb[27].mxu1  ;;  %1056 = vrot.lane.b32.xlu1 %v1024_v31, %s6292_s0  ;;  %v1040_v45 = vadd.f32 %v5758_v29, %v953_v34 }
0x108c   :  { %1061 = vst.msk [vmem:[#allocation4 + $0x8] sm:$0xff] %vm339_vm4, %v1029_v28  ;;  %v1032_v30 = vadd.f32 %v1031_v42, %v953_v34 }
0x108f   :  { %1063 = vrot.lane.b32.xlu0 %v1032_v30, %s6295_s15 }
0x1093   :  { %1073 = vrot.lane.b32.xlu0 %v1040_v45, %s6292_s0 }
0x10f5   :  { %v1051_v63 = vpop.permute.xlu1 %1050 }
0x10f9   :  { %v1046_v7 = vpop.permute.xlu1 %1045 }
0x10fa   :  { %1048 = vst.msk [vmem:[#allocation4] sm:$0xff] %vm341_vm5, %v1046_v7  ;;  %v7475_v7 = vmov 5  }
0x10fb   :  { %1054 = vst.msk [vmem:[#allocation4] sm:$0xff] %vm1053_vm6, %v1051_v63  ;;  %v7479_v63 = vmov 3  }
0x10fd   :  { %v1069_v12 = vpop.permute.xlu0 %1068  ;;  %v1057_v2 = vpop.permute.xlu1 %1056 }
0x10fe   :  { %1060 = vst.msk [vmem:[#allocation4] sm:$0xff] %vm1059_vm7, %v1057_v2  ;;  %v6744_v2 = vld [vmem:[#allocation5 + $0x360] ss:$16 sps:$4 sm:$0xff]  }
0x1101   :  { %v1064_v5 = vpop.permute.xlu0 %1063 }
0x1102   :  { %1066 = vst.msk [vmem:[#allocation4 + $0x8] sm:$0xff] %vm341_vm5, %v1064_v5  ;;  %v6746_v5 = vld [vmem:[#allocation5 + $0x364] ss:$16 sps:$4 sm:$0xff]  }
0x1103   :  { %1071 = vst.msk [vmem:[#allocation4 + $0x8] sm:$0xff] %vm1053_vm6, %v1069_v12  ;;  %v7473_v12 = vmov 6   ;;  %1579 = vmatprep.subr.bf16.mxu0 %v6746_v5 }
0x1104   :  { %1580 = vmatpush1.bf16.msra.mxu0 %v6744_v2 }
0x1105   :  { %v1074_v6 = vpop.permute.xlu0 %1073  ;;  %v6719_v40 = vld [vmem:[#allocation4] sm:$0xff] }
0x1106   :  { %1076 = vst.msk [vmem:[#allocation4 + $0x8] sm:$0xff] %vm1059_vm7, %v1074_v6  ;;  %v6748_v6 = vld [vmem:[#allocation5 + $0x384] ss:$16 sps:$4 sm:$0xff]  }
0x1107   :  { %1581 = vmatprep.subr.bf16.mxu0 %v6748_v6 }
0x110d   :  { %v6723_v22 = vld [vmem:[#allocation4 + $0x8] sm:$0xff] }
0x1139   :  { %v1189_v43 = vpop.f32.mrb[32].mxu0 }
0x113a   :  { %v1190_v34 = vpop.f32.mrb[33].mxu0  ;;  %v6752_v43 = vld [vmem:[#allocation5 + $0x380] ss:$16 sps:$4 sm:$0xff]  }
0x113b   :  { %v1192_v36 = vpop.f32.mrb[34].mxu0  ;;  %v1191_v25 = vadd.f32 %v1190_v34, %v6712_v11  ;;  %v7471_v34 = vmov 7   ;;  %1582 = vmatpush1.bf16.msra.mxu0 %v6752_v43 }
0x113c   :  { %v1193_v37 = vpop.f32.mrb[35].mxu0  ;;  %v6759_v36 = vld [vmem:[#allocation5 + $0x3a0] ss:$16 sps:$4 sm:$0xff]   ;;  %1583 = vmatprep.subr.bf16.mxu0 %v6756_v35 }
0x113d   :  { %v1238_v26 = vadd.f32 %v6719_v40, %v1191_v25  ;;  %v6762_v37 = vld [vmem:[#allocation5 + $0x3c4] ss:$16 sps:$4 sm:$0xff]   ;;  %v6765_v25 = vld [vmem:[#allocation5 + $0x3c0] ss:$16 sps:$4 sm:$0xff]  }
0x113f   :  { %6147 = vtanh.f32 %v1238_v26  ;;  %1584 = vmatpush1.bf16.msra.mxu0 %v6759_v36  ;;  %v6768_v26 = vld [vmem:[#allocation5 + $0x3e4] ss:$16 sps:$4 sm:$0xff]  }
0x1140   :  { %1585 = vmatprep.subr.bf16.mxu0 %v6762_v37 }
0x1141   :  { %v1229_v33 = vpop.f32.mrb[36].mxu0 }
0x1142   :  { %v1230_v44 = vadd.f32 %v1229_v33, %v6717_v38  ;;  %v1231_v57 = vpop.f32.mrb[37].mxu0  ;;  %v6771_v33 = vld [vmem:[#allocation5 + $0x3e0] ss:$16 sps:$4 sm:$0xff]  }
0x1143   :  { %v1233_v41 = vpop.f32.mrb[38].mxu0  ;;  %v6734_v56 = vadd.f32 %v1231_v57, %v6731_v54  ;;  %1586 = vmatpush1.bf16.msra.mxu0 %v6765_v25  ;;  %v6776_v57 = vld [vmem:[#allocation5 + $0x464] ss:$16 sps:$4 sm:$0xff]  }
0x1144   :  { %v1239_v31 = vadd.f32 %v6723_v22, %v1230_v44  ;;  %v1234_v13 = vpop.f32.mrb[39].mxu0  ;;  %1587 = vmatprep.subr.bf16.mxu0 %v6768_v26  ;;  %v6778_v41 = vld [vmem:[#allocation5 + $0x460] ss:$16 sps:$4 sm:$0xff]   ;;  %1672 = vmatprep.subr.bf16.mxu1 %v6776_v57 }
0x1145   :  { %v6783_v13 = vld [vmem:[#allocation5 + $0x400] ss:$16 sps:$4 sm:$0xff]  }
0x1146   :  { %6149 = vtanh.f32 %v1239_v31  ;;  %v6780_v31 = vld [vmem:[#allocation5 + $0x404] ss:$16 sps:$4 sm:$0xff]  }
0x1147   :  { %1588 = vmatpush1.bf16.msra.mxu0 %v6771_v33 }
0x1148   :  { %1589 = vmatprep.subr.bf16.mxu0 %v6780_v31 }
0x1149   :  { %v6148_v27 = vpop.eup %6147 }
0x114a   :  { %v1242_v42 = vpack.c.bf16 %v6148_v27, %v6148_v27  ;;  %v6788_v27 = vld [vmem:[#allocation5 + $0x484] ss:$16 sps:$4 sm:$0xff]  }
0x114b   :  { %1590 = vmatpush1.bf16.msra.mxu0 %v6783_v13 }
0x1150   :  { %v6150_v28 = vpop.eup %6149 }
0x1151   :  { %v1243_v29 = vpack.c.bf16 %v6150_v28, %v6150_v28  ;;  %v6790_v28 = vld [vmem:[#allocation5 + $0x480] ss:$16 sps:$4 sm:$0xff]  }
0x1153   :  { %1404 = vmatprep.mubr.bf16.mxu1 %v1243_v29  ;;  %v6792_v29 = vld [vmem:[#allocation5 + $0x424] ss:$16 sps:$4 sm:$0xff]  }
0x1154   :  { %1405 = vmatmul.mubr.bf16.vlgmr.msra.gmra.mrb[28].mxu1 %v1242_v42  ;;  %v6795_v42 = vld [vmem:[#allocation5 + $0x420] ss:$16 sps:$4 sm:$0xff]   ;;  %1591 = vmatprep.subr.bf16.mxu0 %v6792_v29 }
0x1155   :  { %1704 = vmatprep.mubr.bf16.mxu1 %v7483_v0  ;;  %1673 = vmatpush1.bf16.msra.mxu1 %v6778_v41 }
0x1156   :  { %1674 = vmatprep.subr.bf16.mxu1 %v6788_v27  ;;  %1592 = vmatpush1.bf16.msra.mxu0 %v6795_v42 }
0x1159   :  { %1675 = vmatpush1.bf16.msra.mxu1 %v6790_v28 }
0x1227   :  { %v5615_v30 = vpop.f32.mrb[28].mxu1 }
0x1228   :  { %v5616_v45 = vpop.f32.mrb[29].mxu1 }
0x1229   :  { %v5617_v15 = vadd.f32 %v5616_v45, %v5615_v30  ;;  %v5618_v46 = vpop.f32.mrb[30].mxu1  ;;  %v6800_v30 = vld [vmem:[#allocation5 + $0x4a4] ss:$16 sps:$4 sm:$0xff]   ;;  %v6803_v45 = vand.u32 127, %v45_v18  ;;  %v6818_v18 = vld [vmem:[#allocation5 + $0x4c0] ss:$16 sps:$4 sm:$0xff]  }
0x122a   :  { %v5619_v47 = vpop.f32.mrb[31].mxu1  ;;  %v6807_v46 = vld [vmem:[#allocation5 + $0x444] ss:$16 sps:$4 sm:$0xff]   ;;  %1676 = vmatprep.subr.bf16.mxu1 %v6800_v30 }
0x122b   :  { %v1413_v49 = vsel %vm1412_vm8, %v5617_v15, -inf  ;;  %v6811_v47 = vld [vmem:[#allocation5 + $0x440] ss:$16 sps:$4 sm:$0xff]   ;;  %1593 = vmatprep.subr.bf16.mxu0 %v6807_v46  ;;  %vm1079_vm9 = vcmp.eq.s32.totalorder %v6803_v45, 1 }
0x122c   :  { %1414 = vmax.xlane.f32.xlu0 %v1413_v49  ;;  %1594 = vmatpush1.bf16.msra.mxu0 %v6811_v47  ;;  %v6816_v49 = vld [vmem:[#allocation5 + $0x4c4] ss:$16 sps:$4 sm:$0xff]   ;;  %vm5302_vm10 = vmpackc.low %vm1079_vm9, %vm1079_vm9 }
0x122d   :  { %1753 = vmatprep.subr.bf16.mxu0 %v6617_v55 }
0x12b9   :  { %v1415_v50 = vpop.xlane.xlu0 %1414 }
0x12ba   :  { %v1416_v17 = vsub.f32 %v5617_v15, %v1415_v50  ;;  %v6805_v15 = vld [vmem:[#allocation5 + $0x4a0] ss:$16 sps:$4 sm:$0xff]   ;;  %v7469_v50 = vmov 1.0|1.0  }
0x12bb   :  { %1677 = vmatpush1.bf16.msra.mxu1 %v6805_v15  ;;  %5303 = vmatmul.mubr.msk.bf16.vlgmr.msra.gmra.mrb[40].mxu0 %vm5302_vm10, %v7469_v50 }
0x12bc   :  { %v1417_v51 = vmul.f32 1.442695, %v1416_v17  ;;  %1678 = vmatprep.subr.bf16.mxu1 %v6816_v49  ;;  %1754 = vmatpush1.bf16.msra.mxu0 %v6620_v48 }
0x12bd   :  { %1755 = vmatprep.subr.bf16.mxu0 %v6663_v14  ;;  %1785 = vmatprep.mubr.bf16.mxu0 %v7483_v0 }
0x12be   :  { %6151 = vpow2.f32 %v1417_v51 }
0x12bf   :  { %1679 = vmatpush1.bf16.msra.mxu1 %v6818_v18 }
0x12c0   :  { %1794 = vmatprep.subr.bf16.mxu1 %v6669_v16  ;;  %1756 = vmatpush1.bf16.msra.mxu0 %v6665_v52 }
0x12c8   :  { %v6152_v39 = vpop.eup %6151 }
0x12c9   :  { %1431 = vperm.xlu1 %5780, %v6152_v39   ;;  %1425 = vperm.xlu0 %5779, %v6152_v39   ;;  %v1419_v44 = vsel %vm1412_vm8, %v6152_v39, 0.0 }
0x12cd   :  { %5781 = vset.pattern.permute.xlu1 %v7481_v23  ;;  %1724 = vrot.lane.b32.xlu0 %v6734_v56, %s6291_s4 }
0x12ce   :  { %1437 = vperm.xlu1 %5781, %v6152_v39   ;;  %5788 = vset.pattern.permute.xlu0 %v7467_v58 }
0x12d2   :  { %5782 = vset.pattern.permute.xlu1 %v7479_v63 }
0x12d3   :  { %1443 = vperm.xlu1 %5782, %v6152_v39  }
0x12d7   :  { %5783 = vset.pattern.permute.xlu1 %v7477_v19 }
0x12d8   :  { %1449 = vperm.xlu1 %5783, %v6152_v39  }
0x12dc   :  { %5784 = vset.pattern.permute.xlu1 %v7475_v7 }
0x12dd   :  { %1455 = vperm.xlu1 %5784, %v6152_v39  }
0x12e1   :  { %5785 = vset.pattern.permute.xlu1 %v7473_v12 }
0x12e2   :  { %1461 = vperm.xlu1 %5785, %v6152_v39  }
0x12e6   :  { %5786 = vset.pattern.permute.xlu1 %v7471_v34 }
0x1306   :  { %1420 = vadd.xlane.f32.xlu1 %v1419_v44 }
0x1317   :  { %1467 = vperm.xlu1 %5786, %v6152_v39  }
0x131b   :  { %5787 = vset.pattern.permute.xlu1 %v7483_v0 }
0x1348   :  { %v1432_v17 = vpop.permute.xlu1 %1431  ;;  %v1426_v58 = vpop.permute.xlu0 %1425 }
0x1349   :  { %v1434_v16 = vmul.f32 %v1432_v17, %v6637_v60  ;;  %v1428_v48 = vmul.f32 %v1426_v58, %v6635_v59 }
0x134b   :  { %v1471_v0 = vadd.f32 %v1434_v16, %v1428_v48 }
0x134d   :  { %v1438_v55 = vpop.permute.xlu1 %1437 }
0x134e   :  { %v1440_v14 = vmul.f32 %v1438_v55, %v6644_v4  ;;  %v7504_v4 = vmov 0   ;;  %v1725_v55 = vpop.permute.xlu0 %1724 }
0x1352   :  { %v1444_v51 = vpop.permute.xlu1 %1443 }
0x1353   :  { %v1446_v34 = vmul.f32 %v1444_v51, %v6642_v24 }
0x1355   :  { %v1472_v7 = vadd.f32 %v1446_v34, %v1440_v14 }
0x1357   :  { %v1450_v53 = vpop.permute.xlu1 %1449 }
0x1358   :  { %v1452_v19 = vmul.f32 %v1450_v53, %v6646_v61 }
0x135c   :  { %v1456_v39 = vpop.permute.xlu1 %1455 }
0x135d   :  { %v1458_v12 = vmul.f32 %v1456_v39, %v6648_v62 }
0x135f   :  { %v1473_v54 = vadd.f32 %v1458_v12, %v1452_v19 }
0x1361   :  { %v1462_v44 = vpop.permute.xlu1 %1461 }
0x1362   :  { %v1464_v63 = vmul.f32 %v1462_v44, %v6658_v1 }
0x138e   :  { %v1613_v61 = vpop.f32.mrb[40].mxu0 }
0x138f   :  { %v1615_v62 = vpop.f32.mrb[41].mxu0 }
0x1393   :  { %v1421_v50 = vpop.xlane.xlu1 %1420 }
0x1394   :  { %6153 = vrcp.f32 %v1421_v50  ;;  %v1475_v50 = vadd.f32 %v1472_v7, %v1471_v0  ;;  %v1617_v0 = vpop.f32.mrb[42].mxu0 }
0x1395   :  { %v5923_v0 = vld [vmem:[#allocation5 + $0x2c0] ss:$16 sps:$4 sm:$0xff]  }
0x1397   :  { %v1468_v52 = vpop.permute.xlu1 %1467 }
0x1398   :  { %v1470_v23 = vmul.f32 %v1468_v52, %v6656_v8  ;;  %v1618_v8 = vpop.f32.mrb[43].mxu0 }
0x139a   :  { %v1474_v24 = vadd.f32 %v1470_v23, %v1464_v63 }
0x139c   :  { %v1476_v51 = vadd.f32 %v1474_v24, %v1473_v54  ;;  %v6847_v54 = vld [vmem:[%s7465_s2 + $0x4] ss:$0 sm:$0xff] }
0x139e   :  { %v6154_v60 = vpop.eup %6153  ;;  %v1477_v17 = vadd.f32 %v1476_v51, %v1475_v50  ;;  %v5917_v50 = vld [vmem:[#allocation5 + $0x260] ss:$16 sps:$4 sm:$0xff]  }
0x139f   :  { %5621 = vmatprep.subr.bf16.mxu0 %v5917_v50 }
0x13a0   :  { %v1479_v59 = vmul.f32 %v6154_v60, %v1477_v17  ;;  %v5918_v60 = vld [vmem:[#allocation5 + $0x160] ss:$16 sps:$4 sm:$0xff]  }
0x13a1   :  { %v5919_v17 = vld [vmem:[#allocation5 + $0x280] ss:$16 sps:$4 sm:$0xff]  }
0x13a2   :  { %v1620_v58 = vpack.c.bf16 %v1479_v59, %v1479_v59 }
0x13a4   :  { %5312 = vmatmul.mubr.msk.bf16.vlgmr.msra.gmra.mrb[32].mxu1 %vm194_vm2, %v1620_v58  ;;  %v5920_v58 = vld [vmem:[#allocation5 + $0x180] ss:$16 sps:$4 sm:$0xff]  }
0x13a5   :  { %1795 = vmatpush1.bf16.msra.mxu1 %v6677_v10  ;;  %1826 = vmatprep.mubr.bf16.mxu1 %v7504_v4 }
0x13a6   :  { %1796 = vmatprep.subr.bf16.mxu1 %v6681_v21 }
0x13a9   :  { %1797 = vmatpush1.bf16.msra.mxu1 %v6685_v32 }
0x13aa   :  { %2215 = vmatprep.subr.bf16.mxu1 %v6746_v5 }
0x1477   :  { %v1706_v1 = vpop.f32.mrb[32].mxu1 }
0x1478   :  { %v1713_v23 = vadd.f32 %v1706_v1, %v1613_v61  ;;  %v1708_v10 = vpop.f32.mrb[33].mxu1 }
0x1479   :  { %v1710_v63 = vpop.f32.mrb[34].mxu1 }
0x147a   :  { %v1715_v19 = vadd.f32 %v6847_v54, %v1713_v23  ;;  %v1711_v21 = vpop.f32.mrb[35].mxu1 }
0x147c   :  { %v1716_v32 = vadd.f32 %v1715_v19, %v6734_v56 }
0x147e   :  { %v5313_v7 = vmul.f32 -1.442695, %v1716_v32 }
0x1480   :  { %6155 = vpow2.f32 %v5313_v7 }
0x148a   :  { %v6156_v12 = vpop.eup %6155 }
0x148b   :  { %v1720_v5 = vadd.f32 1.0, %v6156_v12 }
0x148d   :  { %6157 = vrcp.f32 %v1720_v5 }
0x1497   :  { %v6158_v34 = vpop.eup %6157 }
0x1498   :  { %v1727_v53 = vmul.f32 %v6158_v34, %v1725_v55  ;;  %v1734_v48 = vsub.f32 1.0, %v6158_v34 }
0x149a   :  { %1729 = vrot.lane.b32.xlu1 %v1727_v53, %s6291_s4 }
0x149e   :  { %1741 = vrot.lane.b32.xlu1 %v6675_v3, %s6295_s15 }
0x14a2   :  { %1837 = vrot.lane.b32.xlu1 %v1613_v61, %s6295_s15  ;;  %v5921_v61 = vld [vmem:[#allocation5 + $0x2a0] ss:$16 sps:$4 sm:$0xff]  }
0x14a6   :  { %1846 = vrot.lane.b32.xlu1 %v1706_v1, %s6295_s15 }
0x150c   :  { %v1730_v39 = vpop.permute.xlu1 %1729 }
0x150d   :  { %v1732_v44 = vadd.f32 %v1730_v39, %v1715_v19 }
0x150f   :  { %6159 = vtanh.f32 %v1732_v44 }
0x1510   :  { %v1742_v16 = vpop.permute.xlu1 %1741 }
0x1511   :  { %v1744_v52 = vmul.f32 %v6158_v34, %v1742_v16 }
0x1519   :  { %v6160_v56 = vpop.eup %6159 }
0x151a   :  { %1736 = vrot.lane.b32.xlu0 %v6160_v56, %s6292_s0 }
0x158c   :  { %v1737_v14 = vpop.permute.xlu0 %1736 }
0x158d   :  { %v1739_v24 = vmul.f32 %v1737_v14, %v1734_v48 }
0x158f   :  { %v6857_v51 = vadd.f32 %v1744_v52, %v1739_v24 }
0x1591   :  { %v1746_v3 = vpack.c.bf16 %v6857_v51, %v6857_v51 }
0x1593   :  { %1748 = vrot.lane.b32.xlu0 %v1746_v3, %s6292_s0 }
0x1597   :  { %1839 = vrot.lane.b32.xlu0 %v1615_v62, %s6295_s15  ;;  %v5922_v62 = vld [vmem:[#allocation5 + $0x1a0] ss:$16 sps:$4 sm:$0xff]  }
0x159b   :  { %1848 = vrot.lane.b32.xlu0 %v1708_v10, %s6295_s15 }
0x1605   :  { %v1749_v59 = vpop.permute.xlu0 %1748 }
0x1606   :  { %5314 = vmatmul.mubr.msk.bf16.vlgmr.msra.gmra.mrb[44].mxu0 %vm339_vm4, %v1749_v59  ;;  %5315 = vmatmul.mubr.msk.bf16.vlgmr.msra.gmra.mrb[36].mxu1 %vm339_vm4, %v1749_v59  ;;  %v7505_v59 = vmov 2  }
0x1607   :  { %5622 = vmatpush3.bf16.msra.mxu0 %v5918_v60  ;;  %2216 = vmatpush1.bf16.msra.mxu1 %v6744_v2  ;;  %v5924_v2 = vld [vmem:[#allocation5 + $0x1c0] ss:$16 sps:$4 sm:$0xff]  }
0x1608   :  { %5623 = vmatprep.subr.bf16.mxu0 %v5919_v17  ;;  %2217 = vmatprep.subr.bf16.mxu1 %v6748_v6  ;;  %v5925_v6 = vld [vmem:[#allocation5 + $0x2e0] ss:$16 sps:$4 sm:$0xff]  }
0x1609   :  { %2247 = vmatprep.mubr.bf16.mxu1 %v7504_v4 }
0x160b   :  { %5624 = vmatpush3.bf16.msra.mxu0 %v5920_v58  ;;  %2218 = vmatpush1.bf16.msra.mxu1 %v6752_v43  ;;  %v5926_v43 = vld [vmem:[#allocation5 + $0x1e0] ss:$16 sps:$4 sm:$0xff]   ;;  %v7506_v58 = vmov 3  }
0x160c   :  { %5625 = vmatprep.subr.bf16.mxu0 %v5921_v61  ;;  %2219 = vmatprep.subr.bf16.mxu1 %v6756_v35  ;;  %v5927_v35 = vld [vmem:[#allocation5 + $0x300] ss:$16 sps:$4 sm:$0xff]   ;;  %v7507_v61 = vmov 4  }
0x160f   :  { %5626 = vmatpush3.bf16.msra.mxu0 %v5922_v62  ;;  %2220 = vmatpush1.bf16.msra.mxu1 %v6759_v36  ;;  %v5928_v36 = vld [vmem:[#allocation5 + $0x200] ss:$16 sps:$4 sm:$0xff]   ;;  %v7508_v62 = vmov 5  }
0x1610   :  { %5627 = vmatprep.subr.bf16.mxu0 %v5923_v0  ;;  %2221 = vmatprep.subr.bf16.mxu1 %v6762_v37  ;;  %v5929_v37 = vld [vmem:[#allocation5 + $0x320] ss:$16 sps:$4 sm:$0xff]   ;;  %v7509_v0 = vmov 6  }
0x1613   :  { %2222 = vmatpush1.bf16.msra.mxu1 %v6765_v25  ;;  %5628 = vmatpush3.bf16.msra.mxu0 %v5924_v2  ;;  %v5930_v25 = vld [vmem:[#allocation5 + $0x220] ss:$16 sps:$4 sm:$0xff]   ;;  %v7510_v2 = vmov 7  }
0x1614   :  { %2223 = vmatprep.subr.bf16.mxu1 %v6768_v26  ;;  %5629 = vmatprep.subr.bf16.mxu0 %v5925_v6  ;;  %v5931_v26 = vld [vmem:[#allocation5 + $0x340] ss:$16 sps:$4 sm:$0xff]  }
0x1617   :  { %2224 = vmatpush1.bf16.msra.mxu1 %v6771_v33  ;;  %5630 = vmatpush3.bf16.msra.mxu0 %v5926_v43  ;;  %v5932_v33 = vld [vmem:[#allocation5 + $0x240] ss:$16 sps:$4 sm:$0xff]  }
0x1618   :  { %2225 = vmatprep.subr.bf16.mxu1 %v6780_v31  ;;  %5631 = vmatprep.subr.bf16.mxu0 %v5927_v35  ;;  %v1838_v31 = vpop.permute.xlu1 %1837  ;;  %v7511_v43 = vld [vmem:[#allocation11_spill] sm:$0xff] }
0x161b   :  { %2226 = vmatpush1.bf16.msra.mxu1 %v6783_v13  ;;  %5632 = vmatpush3.bf16.msra.mxu0 %v5928_v36  ;;  %v1840_v13 = vpop.permute.xlu0 %1839 }
0x161c   :  { %2227 = vmatprep.subr.bf16.mxu1 %v6792_v29  ;;  %5633 = vmatprep.subr.bf16.mxu0 %v5929_v37  ;;  %v6885_v29 = vrot.slane %v6708_v9, %v6395_v20  ;;  %v1841_v19 = vsel %vm339_vm4, %v1838_v31, %v1840_v13  ;;  %v7512_v31 = vmov 1.0|1.0  }
0x161f   :  { %2228 = vmatpush1.bf16.msra.mxu1 %v6795_v42  ;;  %5634 = vmatpush3.bf16.msra.mxu0 %v5930_v25  ;;  %v1847_v42 = vpop.permute.xlu1 %1846 }
0x1620   :  { %2229 = vmatprep.subr.bf16.mxu1 %v6807_v46  ;;  %5635 = vmatprep.subr.bf16.mxu0 %v5931_v26  ;;  %v1849_v46 = vpop.permute.xlu0 %1848 }
0x1621   :  { %v1850_v5 = vsel %vm339_vm4, %v1847_v42, %v1849_v46 }
0x1623   :  { %2230 = vmatpush1.bf16.msra.mxu1 %v6811_v47  ;;  %5636 = vmatpush3.bf16.msra.mxu0 %v5932_v33 }
0x1624   :  { %2308 = vmatprep.subr.bf16.mxu0 %v6776_v57 }
0x16d9   :  { %v1787_v47 = vpop.f32.mrb[44].mxu0  ;;  %v1828_v8 = vpop.f32.mrb[36].mxu1 }
0x16da   :  { %v1788_v1 = vadd.f32 %v1787_v47, %v6885_v29  ;;  %v1829_v23 = vadd.f32 %v1828_v8, %v6717_v38  ;;  %v1789_v10 = vpop.f32.mrb[45].mxu0  ;;  %v6889_v63 = vpop.f32.mrb[37].mxu1 }
0x16db   :  { %v1790_v57 = vadd.f32 %v1789_v10, %v6712_v11  ;;  %v1791_v21 = vpop.f32.mrb[46].mxu0  ;;  %v1832_v32 = vpop.f32.mrb[38].mxu1  ;;  %v1831_v35 = vadd.f32 %v6889_v63, %v7511_v43  ;;  %v6920_v10 = vld [vmem:[#allocation3 + $0x8] sm:$0xff] }
0x16dc   :  { %v1843_v7 = vadd.f32 %v1841_v19, %v1788_v1  ;;  %v1876_v20 = vadd.f32 %v1829_v23, %v6723_v22  ;;  %v1792_v9 = vpop.f32.mrb[47].mxu0  ;;  %v1833_v12 = vpop.f32.mrb[39].mxu1  ;;  %v6925_v21 = vld [vmem:[#allocation3 + $0x18] sm:$0xff]  ;;  %v6927_v32 = vld [vmem:[#allocation3 + $0x28] sm:$0xff] }
0x16dd   :  { %v1875_v34 = vadd.f32 %v1790_v57, %v6719_v40  ;;  %v6923_v57 = vld [vmem:[#allocation3] sm:$0xff] }
0x16de   :  { %6161 = vtanh.f32 %v1876_v20  ;;  %v1852_v55 = vadd.f32 %v1850_v5, %v1843_v7  ;;  %v6930_v20 = vld [vmem:[#allocation3 + $0x10] sm:$0xff] }
0x16df   :  { %6163 = vtanh.f32 %v1875_v34  ;;  %v6935_v34 = vld [vmem:[#allocation3 + $0x20] sm:$0xff] }
0x16e0   :  { %1854 = vmax.xlane.f32.xlu1 %v1852_v55  ;;  %1853 = vst [vmem:[#allocation8] sm:$0xff] %v1852_v55 }
0x16e8   :  { %v6162_v53 = vpop.eup %6161 }
0x16e9   :  { %v6164_v39 = vpop.eup %6163  ;;  %v1880_v44 = vpack.c.bf16 %v6162_v53, %v6162_v53  ;;  %v6939_v53 = vld [vmem:[#allocation3 + $0x38] sm:$0xff] }
0x16ea   :  { %v1879_v56 = vpack.c.bf16 %v6164_v39, %v6164_v39 }
0x16eb   :  { %2041 = vmatprep.mubr.bf16.mxu0 %v1880_v44 }
0x16ec   :  { %2042 = vmatmul.mubr.bf16.vlgmr.msra.gmra.mrb[48].mxu0 %v1879_v56 }
0x16ed   :  { %2309 = vmatpush1.bf16.msra.mxu0 %v6778_v41  ;;  %2340 = vmatprep.mubr.bf16.mxu0 %v7504_v4 }
0x16ee   :  { %2310 = vmatprep.subr.bf16.mxu0 %v6788_v27 }
0x16f1   :  { %2311 = vmatpush1.bf16.msra.mxu0 %v6790_v28 }
0x16f2   :  { %2312 = vmatprep.subr.bf16.mxu0 %v6800_v30 }
0x16f5   :  { %2313 = vmatpush1.bf16.msra.mxu0 %v6805_v15 }
0x16f6   :  { %2314 = vmatprep.subr.bf16.mxu0 %v6816_v49 }
0x16f9   :  { %2315 = vmatpush1.bf16.msra.mxu0 %v6818_v18 }
0x176d   :  { %v1855_v40 = vpop.xlane.xlu1 %1854 }
0x176e   :  { %vm1856_vm11 = vcmp.eq.f32.partialorder %v1852_v55, %v1855_v40  ;;  %v6937_v55 = vld [vmem:[#allocation3 + $0x30] sm:$0xff] }
0x176f   :  { %v1857_v22 = vsel %vm1856_vm11, %v6803_v45, 128 }
0x1770   :  { %v1859_v27 = vshra.s32 %v1857_v22, 16  ;;  %v1858_v24 = vand.u32 65535, %v1857_v22 }
0x1772   :  { %v1861_v30 = vcvt.s32.f32 %v1859_v27  ;;  %v1860_v3 = vcvt.s32.f32 %v1858_v24 }
0x17bf   :  { %v5637_v16 = vpop.f32.mrb[48].mxu0 }
0x17c0   :  { %v5638_v41 = vpop.f32.mrb[49].mxu0 }
0x17c1   :  { %v5639_v48 = vadd.f32 %v5638_v41, %v5637_v16  ;;  %v5640_v14 = vpop.f32.mrb[50].mxu0 }
0x17c2   :  { %v5641_v52 = vpop.f32.mrb[51].mxu0 }
0x17c3   :  { %v2049_v28 = vsel %vm1412_vm8, %v5639_v48, -inf }
0x17c4   :  { %2050 = vmax.xlane.f32.xlu0 %v2049_v28 }
0x17c8   :  { %1862 = vmin.xlane.f32.xlu0 %v1861_v30 }
0x1851   :  { %v2051_v15 = vpop.xlane.xlu0 %2050 }
0x1852   :  { %v2052_v49 = vsub.f32 %v5639_v48, %v2051_v15 }
0x1854   :  { %v2053_v50 = vmul.f32 1.442695, %v2052_v49 }
0x1855   :  { %v1863_v18 = vpop.xlane.xlu0 %1862 }
0x1856   :  { %6165 = vpow2.f32 %v2053_v50  ;;  %vm1864_vm12 = vcmp.eq.f32.partialorder %v1861_v30, %v1863_v18  ;;  %v1869_v36 = vcvt.f32.s32 %v1863_v18 }
0x1857   :  { %v1865_v60 = vsel %vm1864_vm12, %v1860_v3, inf }
0x1858   :  { %1866 = vmin.xlane.f32.xlu0 %v1865_v60  ;;  %v1870_v25 = vshll.u32 %v1869_v36, 16 }
0x1860   :  { %v6166_v17 = vpop.eup %6165 }
0x1861   :  { %2061 = vperm.xlu1 %5787, %v6166_v17   ;;  %v2055_v6 = vsel %vm1412_vm8, %v6166_v17, 0.0 }
0x1865   :  { %5789 = vset.pattern.permute.xlu1 %v7505_v59 }
0x1866   :  { %2073 = vperm.xlu1 %5789, %v6166_v17  }
0x186a   :  { %5790 = vset.pattern.permute.xlu1 %v7506_v58 }
0x186b   :  { %2079 = vperm.xlu1 %5790, %v6166_v17  }
0x186e   :  { %2067 = vperm.xlu0 %5788, %v6166_v17  }
0x186f   :  { %5791 = vset.pattern.permute.xlu1 %v7507_v61 }
0x1870   :  { %2085 = vperm.xlu1 %5791, %v6166_v17  }
0x1874   :  { %5792 = vset.pattern.permute.xlu1 %v7508_v62 }
0x1875   :  { %2091 = vperm.xlu1 %5792, %v6166_v17  }
0x1879   :  { %5793 = vset.pattern.permute.xlu1 %v7509_v0 }
0x187a   :  { %2097 = vperm.xlu1 %5793, %v6166_v17  }
0x187e   :  { %5794 = vset.pattern.permute.xlu1 %v7510_v2 }
0x189e   :  { %2056 = vadd.xlane.f32.xlu1 %v2055_v6 }
0x18af   :  { %2103 = vperm.xlu1 %5794, %v6166_v17  }
0x18b3   :  { %2360 = vrot.lane.b32.xlu1 %v1831_v35, %s6291_s4 }
0x18b4   :  { %5795 = vset.pattern.permute.xlu1 %v7504_v4 }
0x18e0   :  { %v2062_v13 = vpop.permute.xlu1 %2061 }
0x18e1   :  { %v2064_v7 = vmul.f32 %v2062_v13, %v6923_v57 }
0x18e5   :  { %v1867_v37 = vpop.xlane.xlu0 %1866  ;;  %v2074_v42 = vpop.permute.xlu1 %2073 }
0x18e6   :  { %v1868_v26 = vcvt.f32.s32 %v1867_v37  ;;  %v2076_v5 = vmul.f32 %v2074_v42, %v6930_v20 }
0x18e8   :  { %v1871_v33 = vadd.s32 %v1870_v25, %v1868_v26 }
0x18ea   :  { %vm1872_vm13 = vcmp.eq.s32.totalorder %v6803_v45, %v1871_v33  ;;  %v2080_v46 = vpop.permute.xlu1 %2079 }
0x18eb   :  { %vm5349_vm14 = vmpackc.low %vm1872_vm13, %vm1872_vm13  ;;  %v2082_v9 = vmul.f32 %v2080_v46, %v6925_v21 }
0x18ec   :  { %5350 = vmatmul.mubr.msk.bf16.vlgmr.msra.gmra.mrb[40].mxu1 %vm5349_vm14, %v7512_v31 }
0x18ed   :  { %2465 = vmatprep.mubr.bf16.mxu1 %v7504_v4  ;;  %v2068_v23 = vpop.permute.xlu0 %2067  ;;  %v2108_v16 = vadd.f32 %v2082_v9, %v2076_v5 }
0x18ee   :  { %v2070_v19 = vmul.f32 %v2068_v23, %v6920_v10 }
0x18ef   :  { %v2086_v47 = vpop.permute.xlu1 %2085 }
0x18f0   :  { %v2107_v44 = vadd.f32 %v2070_v19, %v2064_v7  ;;  %v2088_v56 = vmul.f32 %v2086_v47, %v6935_v34  ;;  %v6957_v19 = vld [vmem:[#allocation5 + $0x500] ss:$16 sps:$4 sm:$0xff]   ;;  %v6960_v7 = vld [vmem:[#allocation5 + $0x4ec] ss:$16 sps:$4 sm:$0xff]  }
0x18f2   :  { %v2111_v14 = vadd.f32 %v2108_v16, %v2107_v44  ;;  %v5945_v44 = vld [vmem:[#allocation5 + $0x260] ss:$16 sps:$4 sm:$0xff]  }
0x18f3   :  { %5643 = vmatprep.subr.bf16.mxu0 %v5945_v44 }
0x18f4   :  { %v2092_v8 = vpop.permute.xlu1 %2091 }
0x18f5   :  { %v2094_v12 = vmul.f32 %v2092_v8, %v6927_v32 }
0x18f7   :  { %v2109_v41 = vadd.f32 %v2094_v12, %v2088_v56  ;;  %v5946_v56 = vld [vmem:[#allocation5 + $0x160] ss:$16 sps:$4 sm:$0xff]  }
0x18f9   :  { %v2098_v1 = vpop.permute.xlu1 %2097 }
0x18fa   :  { %v2100_v40 = vmul.f32 %v2098_v1, %v6937_v55 }
0x192b   :  { %v2057_v63 = vpop.xlane.xlu1 %2056 }
0x192c   :  { %6167 = vrcp.f32 %v2057_v63  ;;  %v6948_v63 = vld [vmem:[#allocation5 + $0x4e0] ss:$16 sps:$4 sm:$0xff]  }
0x192f   :  { %v2104_v39 = vpop.permute.xlu1 %2103 }
0x1930   :  { %v2106_v22 = vmul.f32 %v2104_v39, %v6939_v53 }
0x1932   :  { %v2110_v48 = vadd.f32 %v2106_v22, %v2100_v40  ;;  %v5947_v40 = vld [vmem:[#allocation5 + $0x280] ss:$16 sps:$4 sm:$0xff]  }
0x1933   :  { %v2361_v46 = vpop.permute.xlu1 %2360 }
0x1934   :  { %v2112_v52 = vadd.f32 %v2110_v48, %v2109_v41  ;;  %v6973_v41 = vld [vmem:[#allocation5 + $0x4e8] ss:$16 sps:$4 sm:$0xff]  }
0x1936   :  { %v6168_v27 = vpop.eup %6167  ;;  %v2113_v28 = vadd.f32 %v2112_v52, %v2111_v14  ;;  %v6979_v14 = vld [vmem:[#allocation5 + $0x508] ss:$16 sps:$4 sm:$0xff]   ;;  %v5948_v52 = vld [vmem:[#allocation5 + $0x180] ss:$16 sps:$4 sm:$0xff]  }
0x1938   :  { %v2115_v30 = vmul.f32 %v6168_v27, %v2113_v28  ;;  %v5949_v27 = vld [vmem:[#allocation5 + $0x2a0] ss:$16 sps:$4 sm:$0xff]  }
0x1939   :  { %v5950_v28 = vld [vmem:[#allocation5 + $0x1a0] ss:$16 sps:$4 sm:$0xff]  }
0x193a   :  { %v2256_v15 = vpack.c.bf16 %v2115_v30, %v2115_v30  ;;  %v5951_v30 = vld [vmem:[#allocation5 + $0x2c0] ss:$16 sps:$4 sm:$0xff]  }
0x193c   :  { %5359 = vmatmul.mubr.msk.bf16.vlgmr.msra.gmra.mrb[52].mxu0 %vm194_vm2, %v2256_v15  ;;  %v5952_v15 = vld [vmem:[#allocation5 + $0x1c0] ss:$16 sps:$4 sm:$0xff]  }
0x193d   :  { %5644 = vmatpush3.bf16.msra.mxu0 %v5946_v56 }
0x193e   :  { %5645 = vmatprep.subr.bf16.mxu0 %v5947_v40 }
0x1941   :  { %5646 = vmatpush3.bf16.msra.mxu0 %v5948_v52 }
0x1942   :  { %5647 = vmatprep.subr.bf16.mxu0 %v5949_v27 }
0x1945   :  { %5648 = vmatpush3.bf16.msra.mxu0 %v5950_v28 }
0x1946   :  { %5649 = vmatprep.subr.bf16.mxu0 %v5951_v30 }
0x1949   :  { %5650 = vmatpush3.bf16.msra.mxu0 %v5952_v15 }
0x19bf   :  { %v2249_v24 = vpop.f32.mrb[40].mxu1 }
0x19c0   :  { %v2251_v49 = vpop.f32.mrb[41].mxu1 }
0x19c1   :  { %v2253_v50 = vpop.f32.mrb[42].mxu1 }
0x19c2   :  { %v2254_v18 = vpop.f32.mrb[43].mxu1  ;;  %v5955_v50 = vld [vmem:[#allocation5 + $0x300] ss:$16 sps:$4 sm:$0xff]  }
0x19c3   :  { %v5956_v18 = vld [vmem:[#allocation5 + $0x200] ss:$16 sps:$4 sm:$0xff]  }
0x1a0f   :  { %v2342_v3 = vpop.f32.mrb[52].mxu0 }
0x1a10   :  { %v2349_v60 = vadd.f32 %v2342_v3, %v2249_v24  ;;  %v2344_v17 = vpop.f32.mrb[53].mxu0 }
0x1a11   :  { %v2346_v6 = vpop.f32.mrb[54].mxu0 }
0x1a12   :  { %v2351_v36 = vadd.f32 %v2349_v60, %v6847_v54  ;;  %v2347_v37 = vpop.f32.mrb[55].mxu0  ;;  %v6950_v54 = vld [vmem:[#allocation5 + $0x4e4] ss:$16 sps:$4 sm:$0xff]   ;;  %v5958_v60 = vld [vmem:[#allocation5 + $0x220] ss:$16 sps:$4 sm:$0xff]  }
0x1a13   :  { %2433 = vmatprep.subr.bf16.mxu1 %v6950_v54  ;;  %v5960_v6 = vld [vmem:[#allocation5 + $0x240] ss:$16 sps:$4 sm:$0xff]  }
0x1a14   :  { %v2352_v25 = vadd.f32 %v2351_v36, %v1831_v35  ;;  %v6952_v35 = vld [vmem:[#allocation5 + $0x504] ss:$16 sps:$4 sm:$0xff]   ;;  %2434 = vmatpush1.bf16.msra.mxu1 %v6948_v63 }
0x1a15   :  { %2435 = vmatprep.subr.bf16.mxu1 %v6952_v35 }
0x1a16   :  { %v5360_v26 = vmul.f32 -1.442695, %v2352_v25 }
0x1a18   :  { %6169 = vpow2.f32 %v5360_v26  ;;  %2436 = vmatpush1.bf16.msra.mxu1 %v6957_v19 }
0x1a19   :  { %2474 = vmatprep.subr.bf16.mxu1 %v6960_v7 }
0x1a22   :  { %v6170_v33 = vpop.eup %6169 }
0x1a23   :  { %v2356_v13 = vadd.f32 1.0, %v6170_v33 }
0x1a25   :  { %6171 = vrcp.f32 %v2356_v13 }
0x1a2f   :  { %v6172_v42 = vpop.eup %6171 }
0x1a30   :  { %v2363_v47 = vmul.f32 %v6172_v42, %v2361_v46  ;;  %v2370_v9 = vsub.f32 1.0, %v6172_v42  ;;  %v2376_v5 = vmul.f32 %v6172_v42, %v6857_v51  ;;  %v6975_v51 = vld [vmem:[#allocation5 + $0x50c] ss:$16 sps:$4 sm:$0xff]  }
0x1a32   :  { %2365 = vrot.lane.b32.xlu0 %v2363_v47, %s6291_s4 }
0x1aa4   :  { %v2366_v8 = vpop.permute.xlu0 %2365 }
0x1aa5   :  { %v2368_v1 = vadd.f32 %v2366_v8, %v2351_v36 }
0x1aa7   :  { %6173 = vtanh.f32 %v2368_v1 }
0x1ab1   :  { %v6174_v23 = vpop.eup %6173 }
0x1ab2   :  { %2372 = vrot.lane.b32.xlu1 %v6174_v23, %s6292_s0 }
0x1ab6   :  { %2517 = vrot.lane.b32.xlu1 %v2249_v24, %s6295_s15  ;;  %v5953_v24 = vld [vmem:[#allocation5 + $0x2e0] ss:$16 sps:$4 sm:$0xff]  }
0x1ab7   :  { %5651 = vmatprep.subr.bf16.mxu0 %v5953_v24 }
0x1aba   :  { %2526 = vrot.lane.b32.xlu1 %v2342_v3, %s6295_s15  ;;  %v5957_v3 = vld [vmem:[#allocation5 + $0x320] ss:$16 sps:$4 sm:$0xff]  }
0x1b24   :  { %v2373_v12 = vpop.permute.xlu1 %2372 }
0x1b25   :  { %v2375_v39 = vmul.f32 %v2373_v12, %v2370_v9 }
0x1b27   :  { %v6966_v22 = vadd.f32 %v2376_v5, %v2375_v39  ;;  %v6990_v5 = vld [vmem:[#allocation4] sm:$0xff] }
0x1b28   :  { %v2518_v37 = vpop.permute.xlu1 %2517 }
0x1b29   :  { %v2378_v16 = vpack.c.bf16 %v6966_v22, %v6966_v22 }
0x1b2b   :  { %2388 = vrot.lane.b32.xlu0 %v2378_v16, %s6292_s0  ;;  %v6996_v16 = vld [vmem:[#allocation4 + $0x8] sm:$0xff] }
0x1b2c   :  { %v2527_v47 = vpop.permute.xlu1 %2526 }
0x1b2f   :  { %2519 = vrot.lane.b32.xlu0 %v2251_v49, %s6295_s15  ;;  %v5954_v49 = vld [vmem:[#allocation5 + $0x1e0] ss:$16 sps:$4 sm:$0xff]  }
0x1b30   :  { %5652 = vmatpush3.bf16.msra.mxu0 %v5954_v49 }
0x1b31   :  { %5653 = vmatprep.subr.bf16.mxu0 %v5955_v50 }
0x1b33   :  { %2528 = vrot.lane.b32.xlu0 %v2344_v17, %s6295_s15  ;;  %v5959_v17 = vld [vmem:[#allocation5 + $0x340] ss:$16 sps:$4 sm:$0xff]  }
0x1b34   :  { %5654 = vmatpush3.bf16.msra.mxu0 %v5956_v18 }
0x1b35   :  { %5655 = vmatprep.subr.bf16.mxu0 %v5957_v3 }
0x1b38   :  { %5656 = vmatpush3.bf16.msra.mxu0 %v5958_v60 }
0x1b39   :  { %5657 = vmatprep.subr.bf16.mxu0 %v5959_v17 }
0x1b3c   :  { %5658 = vmatpush3.bf16.msra.mxu0 %v5960_v6 }
0x1b9d   :  { %v2389_v48 = vpop.permute.xlu0 %2388 }
0x1b9e   :  { %5369 = vmatmul.mubr.msk.bf16.vlgmr.msra.gmra.mrb[44].mxu1 %vm339_vm4, %v2389_v48 }
0x1b9f   :  { %2475 = vmatpush1.bf16.msra.mxu1 %v6973_v41  ;;  %2506 = vmatprep.mubr.bf16.mxu1 %v7504_v4 }
0x1ba0   :  { %2476 = vmatprep.subr.bf16.mxu1 %v6975_v51 }
0x1ba1   :  { %v2520_v36 = vpop.permute.xlu0 %2519 }
0x1ba2   :  { %v2521_v42 = vsel %vm339_vm4, %v2518_v37, %v2520_v36 }
0x1ba3   :  { %2477 = vmatpush1.bf16.msra.mxu1 %v6979_v14 }
0x1ba5   :  { %v2529_v26 = vpop.permute.xlu0 %2528 }
0x1ba6   :  { %5370 = vmatmul.mubr.msk.bf16.vlgmr.msra.gmra.mrb[48].mxu1 %vm339_vm4, %v2389_v48  ;;  %v2530_v23 = vsel %vm339_vm4, %v2527_v47, %v2529_v26  ;;  %v7002_v26 = vld [vmem:[#allocation5 + $0x360] ss:$16 sps:$4 sm:$0xff]  }
0x1ba7   :  { %2928 = vmatprep.mubr.bf16.mxu1 %v7504_v4  ;;  %v7016_v47 = vld [vmem:[#allocation5 + $0x3a0] ss:$16 sps:$4 sm:$0xff]  }
0x1c71   :  { %v2467_v25 = vpop.f32.mrb[44].mxu1 }
0x1c72   :  { %v2468_v33 = vadd.f32 %v2467_v25, %v6885_v29  ;;  %v2469_v13 = vpop.f32.mrb[45].mxu1 }
0x1c73   :  { %v2471_v46 = vpop.f32.mrb[46].mxu1  ;;  %v2470_v9 = vadd.f32 %v2469_v13, %v6712_v11  ;;  %v7006_v13 = vld [vmem:[#allocation5 + $0x384] ss:$16 sps:$4 sm:$0xff]  }
0x1c74   :  { %v2523_v8 = vadd.f32 %v2521_v42, %v2468_v33  ;;  %v2472_v1 = vpop.f32.mrb[47].mxu1  ;;  %v7004_v33 = vld [vmem:[#allocation5 + $0x364] ss:$16 sps:$4 sm:$0xff]   ;;  %v7010_v42 = vld [vmem:[#allocation5 + $0x380] ss:$16 sps:$4 sm:$0xff]  }
0x1c75   :  { %v2556_v39 = vadd.f32 %v6990_v5, %v2470_v9  ;;  %2896 = vmatprep.subr.bf16.mxu1 %v7004_v33  ;;  %v7013_v46 = vld [vmem:[#allocation5 + $0x3a4] ss:$16 sps:$4 sm:$0xff]   ;;  %v7022_v1 = vld [vmem:[#allocation5 + $0x3c0] ss:$16 sps:$4 sm:$0xff]  }
0x1c76   :  { %v2532_v12 = vadd.f32 %v2530_v23, %v2523_v8  ;;  %2897 = vmatpush1.bf16.msra.mxu1 %v7002_v26  ;;  %v7019_v8 = vld [vmem:[#allocation5 + $0x3c4] ss:$16 sps:$4 sm:$0xff]   ;;  %v7028_v9 = vld [vmem:[#allocation5 + $0x3e0] ss:$16 sps:$4 sm:$0xff]  }
0x1c77   :  { %6175 = vtanh.f32 %v2556_v39  ;;  %2898 = vmatprep.subr.bf16.mxu1 %v7006_v13  ;;  %v7025_v23 = vld [vmem:[#allocation5 + $0x3e4] ss:$16 sps:$4 sm:$0xff]   ;;  %v7034_v39 = vld [vmem:[#allocation5 + $0x400] ss:$16 sps:$4 sm:$0xff]  }
0x1c78   :  { %2535 = vmax.xlane.f32.xlu1 %v2532_v12  ;;  %2534 = vst [vmem:[#allocation8 + $0x8] sm:$0xff] %v2532_v12 }
0x1c79   :  { %v2508_v44 = vpop.f32.mrb[48].mxu1 }
0x1c7a   :  { %v2509_v56 = vadd.f32 %v2508_v44, %v6717_v38  ;;  %v6994_v40 = vpop.f32.mrb[49].mxu1  ;;  %2899 = vmatpush1.bf16.msra.mxu1 %v7010_v42 }
0x1c7b   :  { %v2512_v48 = vpop.f32.mrb[50].mxu1  ;;  %2900 = vmatprep.subr.bf16.mxu1 %v7013_v46 }
0x1c7c   :  { %v2557_v52 = vadd.f32 %v6996_v16, %v2509_v56  ;;  %v2513_v27 = vpop.f32.mrb[51].mxu1 }
0x1c7e   :  { %6177 = vtanh.f32 %v2557_v52  ;;  %2901 = vmatpush1.bf16.msra.mxu1 %v7016_v47 }
0x1c7f   :  { %2902 = vmatprep.subr.bf16.mxu1 %v7019_v8 }
0x1c81   :  { %v6176_v28 = vpop.eup %6175 }
0x1c82   :  { %v2560_v24 = vpack.c.bf16 %v6176_v28, %v6176_v28  ;;  %2903 = vmatpush1.bf16.msra.mxu1 %v7022_v1 }
0x1c83   :  { %2904 = vmatprep.subr.bf16.mxu1 %v7025_v23 }
0x1c86   :  { %2905 = vmatpush1.bf16.msra.mxu1 %v7028_v9 }
0x1c88   :  { %v6178_v30 = vpop.eup %6177 }
0x1c89   :  { %v2561_v15 = vpack.c.bf16 %v6178_v30, %v6178_v30 }
0x1c8b   :  { %2722 = vmatprep.mubr.bf16.mxu0 %v2561_v15 }
0x1c8c   :  { %2723 = vmatmul.mubr.bf16.vlgmr.msra.gmra.mrb[56].mxu0 %v2560_v24  ;;  %v7038_v24 = vld [vmem:[#allocation5 + $0x420] ss:$16 sps:$4 sm:$0xff]  }
0x1c8d   :  { %3021 = vmatprep.mubr.bf16.mxu0 %v7504_v4 }
0x1d05   :  { %v2536_v49 = vpop.xlane.xlu1 %2535 }
0x1d06   :  { %vm2537_vm15 = vcmp.eq.f32.partialorder %v2532_v12, %v2536_v49  ;;  %v7031_v12 = vld [vmem:[#allocation5 + $0x404] ss:$16 sps:$4 sm:$0xff]  }
0x1d07   :  { %v2538_v50 = vsel %vm2537_vm15, %v6803_v45, 128  ;;  %2906 = vmatprep.subr.bf16.mxu1 %v7031_v12  ;;  %v7040_v49 = vld [vmem:[#allocation5 + $0x424] ss:$16 sps:$4 sm:$0xff]  }
0x1d08   :  { %v2540_v36 = vshra.s32 %v2538_v50, 16  ;;  %2907 = vmatpush1.bf16.msra.mxu1 %v7034_v39  ;;  %v2539_v56 = vand.u32 65535, %v2538_v50  ;;  %v7045_v50 = vld [vmem:[#allocation5 + $0x444] ss:$16 sps:$4 sm:$0xff]  }
0x1d09   :  { %2908 = vmatprep.subr.bf16.mxu1 %v7040_v49 }
0x1d0a   :  { %v2542_v25 = vcvt.s32.f32 %v2540_v36  ;;  %v2541_v28 = vcvt.s32.f32 %v2539_v56  ;;  %v7071_v36 = vadd.f32 %v6994_v40, %v7511_v43  ;;  %v7084_v56 = vld [vmem:[#allocation5 + $0x4c4] ss:$16 sps:$4 sm:$0xff]   ;;  %v7086_v40 = vld [vmem:[#allocation5 + $0x4c0] ss:$16 sps:$4 sm:$0xff]  }
0x1d0c   :  { %2909 = vmatpush1.bf16.msra.mxu1 %v7038_v24 }
0x1d0d   :  { %2910 = vmatprep.subr.bf16.mxu1 %v7045_v50 }
0x1d5f   :  { %v5659_v18 = vpop.f32.mrb[56].mxu0 }
0x1d60   :  { %v5660_v3 = vpop.f32.mrb[57].mxu0 }
0x1d61   :  { %v5661_v60 = vadd.f32 %v5660_v3, %v5659_v18  ;;  %v5662_v17 = vpop.f32.mrb[58].mxu0  ;;  %v7047_v18 = vld [vmem:[#allocation5 + $0x440] ss:$16 sps:$4 sm:$0xff]  }
0x1d62   :  { %v5663_v6 = vpop.f32.mrb[59].mxu0  ;;  %2911 = vmatpush1.bf16.msra.mxu1 %v7047_v18  ;;  %v7065_v17 = vld [vmem:[#allocation5 + $0x484] ss:$16 sps:$4 sm:$0xff]  }
0x1d63   :  { %v2730_v37 = vsel %vm1412_vm8, %v5661_v60, -inf  ;;  %3114 = vmatprep.subr.bf16.mxu1 %v6950_v54  ;;  %v7061_v54 = vld [vmem:[#allocation5 + $0x460] ss:$16 sps:$4 sm:$0xff]  }
0x1d64   :  { %2731 = vmax.xlane.f32.xlu0 %v2730_v37  ;;  %v7067_v6 = vld [vmem:[#allocation5 + $0x480] ss:$16 sps:$4 sm:$0xff]   ;;  %v7077_v37 = vld [vmem:[#allocation5 + $0x4a4] ss:$16 sps:$4 sm:$0xff]  }
0x1d68   :  { %2543 = vmin.xlane.f32.xlu0 %v2542_v25 }
0x1df1   :  { %v2732_v44 = vpop.xlane.xlu0 %2731 }
0x1df2   :  { %v2733_v48 = vsub.f32 %v5661_v60, %v2732_v44  ;;  %v7059_v60 = vld [vmem:[#allocation5 + $0x464] ss:$16 sps:$4 sm:$0xff]   ;;  %v7513_v44 = vmov 1  }
0x1df3   :  { %2989 = vmatprep.subr.bf16.mxu0 %v7059_v60 }
0x1df4   :  { %v2734_v52 = vmul.f32 1.442695, %v2733_v48  ;;  %2990 = vmatpush1.bf16.msra.mxu0 %v7061_v54 }
0x1df5   :  { %v2544_v27 = vpop.xlane.xlu0 %2543  ;;  %2991 = vmatprep.subr.bf16.mxu0 %v7065_v17 }
0x1df6   :  { %6179 = vpow2.f32 %v2734_v52  ;;  %vm2545_vm0 = vcmp.eq.f32.partialorder %v2542_v25, %v2544_v27  ;;  %v7079_v25 = vld [vmem:[#allocation5 + $0x4a0] ss:$16 sps:$4 sm:$0xff]   ;;  %v2550_v48 = vcvt.f32.s32 %v2544_v27 }
0x1df7   :  { %v2546_v30 = vsel %vm2545_vm0, %v2541_v28, inf }
0x1df8   :  { %2547 = vmin.xlane.f32.xlu0 %v2546_v30  ;;  %2992 = vmatpush1.bf16.msra.mxu0 %v7067_v6  ;;  %v2551_v28 = vshll.u32 %v2550_v48, 16 }
0x1df9   :  { %2993 = vmatprep.subr.bf16.mxu0 %v7077_v37 }
0x1dfc   :  { %2994 = vmatpush1.bf16.msra.mxu0 %v7079_v25 }
0x1dfd   :  { %2995 = vmatprep.subr.bf16.mxu0 %v7084_v56 }
0x1e00   :  { %v6180_v15 = vpop.eup %6179  ;;  %2996 = vmatpush1.bf16.msra.mxu0 %v7086_v40 }
0x1e01   :  { %2742 = vperm.xlu1 %5795, %v6180_v15   ;;  %v2736_v3 = vsel %vm1412_vm8, %v6180_v15, 0.0 }
0x1e05   :  { %5796 = vset.pattern.permute.xlu1 %v7505_v59 }
0x1e06   :  { %2754 = vperm.xlu1 %5796, %v6180_v15  }
0x1e0a   :  { %5797 = vset.pattern.permute.xlu1 %v7506_v58 }
0x1e0b   :  { %2760 = vperm.xlu1 %5797, %v6180_v15  }
0x1e0e   :  { %2748 = vperm.xlu0 %5788, %v6180_v15  }
0x1e0f   :  { %5799 = vset.pattern.permute.xlu1 %v7508_v62 }
0x1e10   :  { %2772 = vperm.xlu1 %5799, %v6180_v15  }
0x1e12   :  { %5798 = vset.pattern.permute.xlu0 %v7507_v61 }
0x1e13   :  { %2766 = vperm.xlu0 %5798, %v6180_v15  }
0x1e14   :  { %5800 = vset.pattern.permute.xlu1 %v7509_v0 }
0x1e17   :  { %5801 = vset.pattern.permute.xlu0 %v7510_v2 }
0x1e18   :  { %2784 = vperm.xlu0 %5801, %v6180_v15  }
0x1e1c   :  { %5802 = vset.pattern.permute.xlu0 %v7504_v4 }
0x1e34   :  { %2737 = vadd.xlane.f32.xlu1 %v2736_v3 }
0x1e45   :  { %2778 = vperm.xlu1 %5800, %v6180_v15  }
0x1e49   :  { %3041 = vrot.lane.b32.xlu1 %v7071_v36, %s6291_s4 }
0x1e4a   :  { %5803 = vset.pattern.permute.xlu1 %v7513_v44 }
0x1e80   :  { %v2743_v27 = vpop.permute.xlu1 %2742 }
0x1e85   :  { %v2548_v52 = vpop.xlane.xlu0 %2547  ;;  %v2755_v3 = vpop.permute.xlu1 %2754 }
0x1e86   :  { %v2549_v30 = vcvt.f32.s32 %v2548_v52 }
0x1e88   :  { %v2552_v15 = vadd.s32 %v2551_v28, %v2549_v30 }
0x1e8a   :  { %vm2553_vm1 = vcmp.eq.s32.totalorder %v6803_v45, %v2552_v15  ;;  %v2761_v48 = vpop.permute.xlu1 %2760 }
0x1e8b   :  { %vm5404_vm3 = vmpackc.low %vm2553_vm1, %vm2553_vm1  ;;  %v2763_v2 = vmul.f32 %v2761_v48, %v6925_v21 }
0x1e8c   :  { %5405 = vmatmul.mubr.msk.bf16.vlgmr.msra.gmra.mrb[52].mxu1 %vm5404_vm3, %v7512_v31 }
0x1e8d   :  { %3115 = vmatpush1.bf16.msra.mxu1 %v6948_v63  ;;  %3146 = vmatprep.mubr.bf16.mxu1 %v7504_v4  ;;  %v2749_v52 = vpop.permute.xlu0 %2748  ;;  %v2745_v63 = vmul.f32 %v2743_v27, %v6923_v57 }
0x1e8e   :  { %3116 = vmatprep.subr.bf16.mxu1 %v6952_v35  ;;  %v2751_v43 = vmul.f32 %v2749_v52, %v6920_v10 }
0x1e8f   :  { %v2773_v28 = vpop.permute.xlu1 %2772 }
0x1e90   :  { %v2788_v44 = vadd.f32 %v2751_v43, %v2745_v63  ;;  %v2775_v0 = vmul.f32 %v2773_v28, %v6927_v32 }
0x1e91   :  { %3117 = vmatpush1.bf16.msra.mxu1 %v6957_v19  ;;  %v2757_v19 = vmul.f32 %v2755_v3, %v6930_v20 }
0x1e92   :  { %3155 = vmatprep.subr.bf16.mxu1 %v6960_v7  ;;  %v2767_v30 = vpop.permute.xlu0 %2766 }
0x1e93   :  { %v2769_v35 = vmul.f32 %v2767_v30, %v6935_v34  ;;  %v2789_v58 = vadd.f32 %v2763_v2, %v2757_v19 }
0x1e95   :  { %v2790_v10 = vadd.f32 %v2775_v0, %v2769_v35 }
0x1e97   :  { %v2785_v31 = vpop.permute.xlu0 %2784 }
0x1e98   :  { %v2787_v62 = vmul.f32 %v2785_v31, %v6939_v53  ;;  %v7109_v31 = vld [vmem:[%s7465_s2 + $0x4] ss:$0 sm:$0xff] }
0x1ec1   :  { %v2738_v15 = vpop.xlane.xlu1 %2737 }
0x1ec2   :  { %6181 = vrcp.f32 %v2738_v15  ;;  %v2792_v15 = vadd.f32 %v2789_v58, %v2788_v44 }
0x1ec5   :  { %v2779_v7 = vpop.permute.xlu1 %2778 }
0x1ec6   :  { %v2781_v61 = vmul.f32 %v2779_v7, %v6937_v55 }
0x1ec8   :  { %v2791_v52 = vadd.f32 %v2787_v62, %v2781_v61 }
0x1ec9   :  { %v3042_v30 = vpop.permute.xlu1 %3041 }
0x1eca   :  { %v2793_v59 = vadd.f32 %v2791_v52, %v2790_v10 }
0x1ecc   :  { %v6182_v57 = vpop.eup %6181  ;;  %v2794_v27 = vadd.f32 %v2793_v59, %v2792_v15 }
0x1ece   :  { %v2796_v21 = vmul.f32 %v6182_v57, %v2794_v27  ;;  %v5997_v57 = vld [vmem:[#allocation5 + $0x260] ss:$16 sps:$4 sm:$0xff]  }
0x1ecf   :  { %v5998_v27 = vld [vmem:[#allocation5 + $0x160] ss:$16 sps:$4 sm:$0xff]   ;;  %5665 = vmatprep.subr.bf16.mxu0 %v5997_v57 }
0x1ed0   :  { %v2937_v48 = vpack.c.bf16 %v2796_v21, %v2796_v21  ;;  %v5999_v21 = vld [vmem:[#allocation5 + $0x280] ss:$16 sps:$4 sm:$0xff]  }
0x1ed2   :  { %5414 = vmatmul.mubr.msk.bf16.vlgmr.msra.gmra.mrb[60].mxu0 %vm194_vm2, %v2937_v48 }
0x1ed3   :  { %5666 = vmatpush3.bf16.msra.mxu0 %v5998_v27 }
0x1ed4   :  { %5667 = vmatprep.subr.bf16.mxu0 %v5999_v21 }
0x1f5f   :  { %v2930_v20 = vpop.f32.mrb[52].mxu1 }
0x1f60   :  { %v2932_v34 = vpop.f32.mrb[53].mxu1 }
0x1f61   :  { %v2934_v43 = vpop.f32.mrb[54].mxu1 }
0x1f62   :  { %v2935_v3 = vpop.f32.mrb[55].mxu1 }
0x1fa5   :  { %v3023_v32 = vpop.f32.mrb[60].mxu0 }
0x1fa6   :  { %v3030_v0 = vadd.f32 %v3023_v32, %v2930_v20  ;;  %v3025_v61 = vpop.f32.mrb[61].mxu0 }
0x1fa7   :  { %v3027_v58 = vpop.f32.mrb[62].mxu0 }
0x1fa8   :  { %v3032_v62 = vadd.f32 %v7109_v31, %v3030_v0  ;;  %v3028_v59 = vpop.f32.mrb[63].mxu0 }
0x1faa   :  { %v3033_v2 = vadd.f32 %v3032_v62, %v7071_v36 }
0x1fac   :  { %v5415_v55 = vmul.f32 -1.442695, %v3033_v2 }
0x1fae   :  { %6183 = vpow2.f32 %v5415_v55 }
0x1fb8   :  { %v6184_v53 = vpop.eup %6183 }
0x1fb9   :  { %v3037_v44 = vadd.f32 1.0, %v6184_v53 }
0x1fbb   :  { %6185 = vrcp.f32 %v3037_v44 }
0x1fc5   :  { %v6186_v28 = vpop.eup %6185 }
0x1fc6   :  { %v3044_v63 = vmul.f32 %v6186_v28, %v3042_v30  ;;  %v3051_v36 = vsub.f32 1.0, %v6186_v28  ;;  %v3057_v52 = vmul.f32 %v6186_v28, %v6966_v22  ;;  %v6000_v22 = vld [vmem:[#allocation5 + $0x180] ss:$16 sps:$4 sm:$0xff]  }
0x1fc7   :  { %5668 = vmatpush3.bf16.msra.mxu0 %v6000_v22  ;;  %v7514_v22 = vmov 2  }
0x1fc8   :  { %3046 = vrot.lane.b32.xlu1 %v3044_v63, %s6291_s4 }
0x203a   :  { %v3047_v35 = vpop.permute.xlu1 %3046 }
0x203b   :  { %v3049_v19 = vadd.f32 %v3047_v35, %v3032_v62 }
0x203d   :  { %6187 = vtanh.f32 %v3049_v19 }
0x2047   :  { %v6188_v7 = vpop.eup %6187 }
0x2048   :  { %3053 = vrot.lane.b32.xlu0 %v6188_v7, %s6292_s0 }
0x204c   :  { %3198 = vrot.lane.b32.xlu0 %v2930_v20, %s6295_s15 }
0x2050   :  { %3207 = vrot.lane.b32.xlu0 %v3023_v32, %s6295_s15 }
0x20ba   :  { %v3054_v10 = vpop.permute.xlu0 %3053 }
0x20bb   :  { %v3056_v15 = vmul.f32 %v3054_v10, %v3051_v36 }
0x20bd   :  { %v7118_v48 = vadd.f32 %v3057_v52, %v3056_v15 }
0x20bf   :  { %v3059_v43 = vpack.c.bf16 %v7118_v48, %v7118_v48 }
0x20c1   :  { %3069 = vrot.lane.b32.xlu1 %v3059_v43, %s6292_s0 }
0x20c5   :  { %3200 = vrot.lane.b32.xlu1 %v2932_v34, %s6295_s15 }
0x20c9   :  { %3209 = vrot.lane.b32.xlu1 %v3025_v61, %s6295_s15 }
0x2133   :  { %v3070_v20 = vpop.permute.xlu1 %3069 }
0x2134   :  { %5424 = vmatmul.mubr.msk.bf16.vlgmr.msra.gmra.mrb[56].mxu1 %vm339_vm4, %v3070_v20 }
0x2135   :  { %3156 = vmatpush1.bf16.msra.mxu1 %v6973_v41  ;;  %3187 = vmatprep.mubr.bf16.mxu1 %v7504_v4  ;;  %v6001_v41 = vld [vmem:[#allocation5 + $0x2a0] ss:$16 sps:$4 sm:$0xff]  }
0x2136   :  { %3157 = vmatprep.subr.bf16.mxu1 %v6975_v51  ;;  %v6002_v51 = vld [vmem:[#allocation5 + $0x1a0] ss:$16 sps:$4 sm:$0xff]   ;;  %5669 = vmatprep.subr.bf16.mxu0 %v6001_v41  ;;  %v7515_v41 = vmov 3  }
0x2137   :  { %5670 = vmatpush3.bf16.msra.mxu0 %v6002_v51  ;;  %v7516_v51 = vmov 4  }
0x2139   :  { %3158 = vmatpush1.bf16.msra.mxu1 %v6979_v14  ;;  %v6003_v14 = vld [vmem:[#allocation5 + $0x2c0] ss:$16 sps:$4 sm:$0xff]  }
0x213a   :  { %3577 = vmatprep.subr.bf16.mxu1 %v7004_v33  ;;  %5671 = vmatprep.subr.bf16.mxu0 %v6003_v14  ;;  %v6005_v33 = vld [vmem:[#allocation5 + $0x2e0] ss:$16 sps:$4 sm:$0xff]   ;;  %v7517_v14 = vmov 5  }
0x213c   :  { %5425 = vmatmul.mubr.msk.bf16.vlgmr.msra.gmra.mrb[60].mxu1 %vm339_vm4, %v3070_v20 }
0x213d   :  { %3578 = vmatpush1.bf16.msra.mxu1 %v7002_v26  ;;  %3609 = vmatprep.mubr.bf16.mxu1 %v7504_v4  ;;  %v6004_v26 = vld [vmem:[#allocation5 + $0x1c0] ss:$16 sps:$4 sm:$0xff]  }
0x213e   :  { %3579 = vmatprep.subr.bf16.mxu1 %v7006_v13  ;;  %5672 = vmatpush3.bf16.msra.mxu0 %v6004_v26  ;;  %v6006_v13 = vld [vmem:[#allocation5 + $0x1e0] ss:$16 sps:$4 sm:$0xff]   ;;  %v7518_v26 = vmov 6  }
0x213f   :  { %5673 = vmatprep.subr.bf16.mxu0 %v6005_v33  ;;  %v7519_v33 = vmov 1  }
0x2141   :  { %3580 = vmatpush1.bf16.msra.mxu1 %v7010_v42  ;;  %v6007_v42 = vld [vmem:[#allocation5 + $0x300] ss:$16 sps:$4 sm:$0xff]  }
0x2142   :  { %3581 = vmatprep.subr.bf16.mxu1 %v7013_v46  ;;  %5674 = vmatpush3.bf16.msra.mxu0 %v6006_v13  ;;  %v6008_v46 = vld [vmem:[#allocation5 + $0x200] ss:$16 sps:$4 sm:$0xff]   ;;  %v7520_v13 = vmov 7  }
0x2143   :  { %5675 = vmatprep.subr.bf16.mxu0 %v6007_v42  ;;  %v7521_v42 = vld [vmem:[#allocation11_spill] sm:$0xff] }
0x2145   :  { %3582 = vmatpush1.bf16.msra.mxu1 %v7016_v47  ;;  %v6009_v47 = vld [vmem:[#allocation5 + $0x320] ss:$16 sps:$4 sm:$0xff]  }
0x2146   :  { %3583 = vmatprep.subr.bf16.mxu1 %v7019_v8  ;;  %5676 = vmatpush3.bf16.msra.mxu0 %v6008_v46  ;;  %v6010_v8 = vld [vmem:[#allocation5 + $0x220] ss:$16 sps:$4 sm:$0xff]  }
0x2147   :  { %5677 = vmatprep.subr.bf16.mxu0 %v6009_v47 }
0x2149   :  { %3584 = vmatpush1.bf16.msra.mxu1 %v7022_v1  ;;  %v6011_v1 = vld [vmem:[#allocation5 + $0x340] ss:$16 sps:$4 sm:$0xff]  }
0x214a   :  { %3585 = vmatprep.subr.bf16.mxu1 %v7025_v23  ;;  %5678 = vmatpush3.bf16.msra.mxu0 %v6010_v8  ;;  %v6012_v23 = vld [vmem:[#allocation5 + $0x240] ss:$16 sps:$4 sm:$0xff]  }
0x214b   :  { %5679 = vmatprep.subr.bf16.mxu0 %v6011_v1 }
0x214d   :  { %3586 = vmatpush1.bf16.msra.mxu1 %v7028_v9  ;;  %v3201_v9 = vpop.permute.xlu1 %3200 }
0x214e   :  { %3587 = vmatprep.subr.bf16.mxu1 %v7031_v12  ;;  %5680 = vmatpush3.bf16.msra.mxu0 %v6012_v23  ;;  %v3199_v12 = vpop.permute.xlu0 %3198 }
0x214f   :  { %3670 = vmatprep.subr.bf16.mxu0 %v7059_v60 }
0x2151   :  { %3588 = vmatpush1.bf16.msra.mxu1 %v7034_v39 }
0x2152   :  { %3589 = vmatprep.subr.bf16.mxu1 %v7040_v49  ;;  %v3208_v3 = vpop.permute.xlu0 %3207 }
0x2155   :  { %3590 = vmatpush1.bf16.msra.mxu1 %v7038_v24  ;;  %v3210_v24 = vpop.permute.xlu1 %3209 }
0x2156   :  { %3591 = vmatprep.subr.bf16.mxu1 %v7045_v50  ;;  %v3211_v61 = vsel %vm339_vm4, %v3208_v3, %v3210_v24 }
0x2159   :  { %3592 = vmatpush1.bf16.msra.mxu1 %v7047_v18  ;;  %v3202_v18 = vsel %vm339_vm4, %v3199_v12, %v3201_v9  ;;  %v7522_v12 = vmov 1.0|1.0  }
0x2207   :  { %v3148_v39 = vpop.f32.mrb[56].mxu1 }
0x2208   :  { %v3149_v49 = vadd.f32 %v3148_v39, %v6885_v29  ;;  %v3150_v50 = vpop.f32.mrb[57].mxu1 }
0x2209   :  { %v3152_v34 = vpop.f32.mrb[58].mxu1  ;;  %v3151_v58 = vadd.f32 %v3150_v50, %v6712_v11 }
0x220a   :  { %v3204_v32 = vadd.f32 %v3202_v18, %v3149_v49  ;;  %v3153_v0 = vpop.f32.mrb[59].mxu1 }
0x220b   :  { %v3237_v60 = vadd.f32 %v3151_v58, %v6990_v5  ;;  %v7180_v0 = vld [vmem:[#allocation3] sm:$0xff]  ;;  %v7183_v58 = vld [vmem:[#allocation3 + $0x8] sm:$0xff] }
0x220c   :  { %v3213_v62 = vadd.f32 %v3211_v61, %v3204_v32 }
0x220d   :  { %6189 = vtanh.f32 %v3237_v60  ;;  %v7187_v60 = vld [vmem:[#allocation3 + $0x28] sm:$0xff] }
0x220e   :  { %3216 = vmax.xlane.f32.xlu0 %v3213_v62  ;;  %3215 = vst [vmem:[#allocation8 + $0x10] sm:$0xff] %v3213_v62 }
0x220f   :  { %v3189_v59 = vpop.f32.mrb[60].mxu1 }
0x2210   :  { %v3190_v2 = vadd.f32 %v3189_v59, %v6717_v38  ;;  %v3191_v55 = vpop.f32.mrb[61].mxu1 }
0x2211   :  { %v3193_v53 = vpop.f32.mrb[62].mxu1  ;;  %v3192_v46 = vadd.f32 %v3191_v55, %v7521_v42 }
0x2212   :  { %v3238_v44 = vadd.f32 %v3190_v2, %v6996_v16  ;;  %v3194_v28 = vpop.f32.mrb[63].mxu1  ;;  %v7190_v2 = vld [vmem:[#allocation3 + $0x10] sm:$0xff] }
0x2213   :  { %v7195_v28 = vld [vmem:[#allocation3 + $0x20] sm:$0xff] }
0x2214   :  { %6191 = vtanh.f32 %v3238_v44 }
0x2217   :  { %v6190_v30 = vpop.eup %6189 }
0x2218   :  { %v3241_v19 = vpack.c.bf16 %v6190_v30, %v6190_v30  ;;  %v7197_v30 = vld [vmem:[#allocation3 + $0x30] sm:$0xff] }
0x221e   :  { %v6192_v63 = vpop.eup %6191 }
0x221f   :  { %v3242_v35 = vpack.c.bf16 %v6192_v63, %v6192_v63  ;;  %v7199_v63 = vld [vmem:[#allocation3 + $0x38] sm:$0xff] }
0x2221   :  { %3403 = vmatprep.mubr.bf16.mxu0 %v3242_v35 }
0x2222   :  { %3404 = vmatmul.mubr.bf16.vlgmr.msra.gmra.mrb[64].mxu0 %v3241_v19 }
0x2223   :  { %3671 = vmatpush1.bf16.msra.mxu0 %v7061_v54  ;;  %3702 = vmatprep.mubr.bf16.mxu0 %v7504_v4 }
0x2224   :  { %3672 = vmatprep.subr.bf16.mxu0 %v7065_v17 }
0x2227   :  { %3673 = vmatpush1.bf16.msra.mxu0 %v7067_v6 }
0x2228   :  { %3674 = vmatprep.subr.bf16.mxu0 %v7077_v37 }
0x222b   :  { %3675 = vmatpush1.bf16.msra.mxu0 %v7079_v25 }
0x222c   :  { %3676 = vmatprep.subr.bf16.mxu0 %v7084_v56 }
0x222f   :  { %3677 = vmatpush1.bf16.msra.mxu0 %v7086_v40 }
0x229b   :  { %v3217_v5 = vpop.xlane.xlu0 %3216 }
0x229c   :  { %vm3218_vm5 = vcmp.eq.f32.partialorder %v3213_v62, %v3217_v5  ;;  %v7185_v62 = vld [vmem:[#allocation3 + $0x18] sm:$0xff] }
0x229d   :  { %v3219_v16 = vsel %vm3218_vm5, %v6803_v45, 128 }
0x229e   :  { %v3221_v7 = vshra.s32 %v3219_v16, 16  ;;  %v3220_v25 = vand.u32 65535, %v3219_v16 }
0x22a0   :  { %v3223_v54 = vcvt.s32.f32 %v3221_v7  ;;  %v3222_v15 = vcvt.s32.f32 %v3220_v25 }
0x22a2   :  { %3224 = vmin.xlane.f32.xlu0 %v3223_v54 }
0x22f5   :  { %v5681_v36 = vpop.f32.mrb[64].mxu0 }
0x22f6   :  { %v5682_v10 = vpop.f32.mrb[65].mxu0 }
0x22f7   :  { %v5683_v17 = vadd.f32 %v5682_v10, %v5681_v36  ;;  %v5684_v52 = vpop.f32.mrb[66].mxu0 }
0x22f8   :  { %v5685_v6 = vpop.f32.mrb[67].mxu0 }
0x22f9   :  { %v3411_v37 = vsel %vm1412_vm8, %v5683_v17, -inf }
0x22fa   :  { %3412 = vmax.xlane.f32.xlu1 %v3411_v37 }
0x232f   :  { %v3225_v56 = vpop.xlane.xlu0 %3224 }
0x2330   :  { %vm3226_vm6 = vcmp.eq.f32.partialorder %v3223_v54, %v3225_v56  ;;  %v3231_v47 = vcvt.f32.s32 %v3225_v56 }
0x2331   :  { %v3227_v40 = vsel %vm3226_vm6, %v3222_v15, inf }
0x2332   :  { %3228 = vmin.xlane.f32.xlu1 %v3227_v40  ;;  %v3232_v1 = vshll.u32 %v3231_v47, 16 }
0x2387   :  { %v3413_v57 = vpop.xlane.xlu1 %3412 }
0x2388   :  { %v3414_v27 = vsub.f32 %v5683_v17, %v3413_v57 }
0x238a   :  { %v3415_v21 = vmul.f32 1.442695, %v3414_v27 }
0x238c   :  { %6193 = vpow2.f32 %v3415_v21 }
0x2396   :  { %v6194_v43 = vpop.eup %6193 }
0x2397   :  { %3429 = vperm.xlu1 %5803, %v6194_v43   ;;  %v3417_v20 = vsel %vm1412_vm8, %v6194_v43, 0.0 }
0x2398   :  { %3418 = vadd.xlane.f32.xlu0 %v3417_v20 }
0x239b   :  { %5804 = vset.pattern.permute.xlu1 %v7514_v22 }
0x239c   :  { %3435 = vperm.xlu1 %5804, %v6194_v43  }
0x23a0   :  { %5805 = vset.pattern.permute.xlu1 %v7515_v41 }
0x23a1   :  { %3441 = vperm.xlu1 %5805, %v6194_v43  }
0x23a5   :  { %5806 = vset.pattern.permute.xlu1 %v7516_v51 }
0x23a6   :  { %3447 = vperm.xlu1 %5806, %v6194_v43  }
0x23aa   :  { %5807 = vset.pattern.permute.xlu1 %v7517_v14 }
0x23ab   :  { %3453 = vperm.xlu1 %5807, %v6194_v43  }
0x23ae   :  { %3423 = vperm.xlu0 %5802, %v6194_v43  }
0x23af   :  { %5808 = vset.pattern.permute.xlu1 %v7518_v26 }
0x23b0   :  { %3459 = vperm.xlu1 %5808, %v6194_v43  }
0x23b2   :  { %5811 = vset.pattern.permute.xlu0 %v7519_v33 }
0x23b4   :  { %5809 = vset.pattern.permute.xlu1 %v7520_v13 }
0x23b5   :  { %3465 = vperm.xlu1 %5809, %v6194_v43  }
0x23b9   :  { %3722 = vrot.lane.b32.xlu1 %v3192_v46, %s6291_s4 }
0x23ba   :  { %5810 = vset.pattern.permute.xlu1 %v7504_v4 }
0x23bf   :  { %v3229_v8 = vpop.xlane.xlu1 %3228 }
0x23c0   :  { %v3230_v23 = vcvt.f32.s32 %v3229_v8 }
0x23c2   :  { %v3233_v9 = vadd.s32 %v3232_v1, %v3230_v23 }
0x23c4   :  { %vm3234_vm7 = vcmp.eq.s32.totalorder %v6803_v45, %v3233_v9 }
0x23c5   :  { %vm5459_vm9 = vmpackc.low %vm3234_vm7, %vm3234_vm7 }
0x23c6   :  { %5460 = vmatmul.mubr.msk.bf16.vlgmr.msra.gmra.mrb[64].mxu1 %vm5459_vm9, %v7522_v12 }
0x23c7   :  { %3827 = vmatprep.mubr.bf16.mxu1 %v7504_v4 }
0x2416   :  { %v3430_v39 = vpop.permute.xlu1 %3429 }
0x2417   :  { %v3432_v59 = vmul.f32 %v3430_v39, %v7183_v58 }
0x241b   :  { %v3436_v24 = vpop.permute.xlu1 %3435 }
0x241c   :  { %v3438_v44 = vmul.f32 %v3436_v24, %v7190_v2 }
0x2420   :  { %v3442_v49 = vpop.permute.xlu1 %3441 }
0x2421   :  { %v3444_v55 = vmul.f32 %v3442_v49, %v7185_v62 }
0x2423   :  { %v3470_v54 = vadd.f32 %v3444_v55, %v3438_v44 }
0x2425   :  { %v3448_v50 = vpop.permute.xlu1 %3447  ;;  %v3419_v18 = vpop.xlane.xlu0 %3418 }
0x2426   :  { %6195 = vrcp.f32 %v3419_v18  ;;  %v3450_v19 = vmul.f32 %v3448_v50, %v7195_v28 }
0x242a   :  { %v3454_v34 = vpop.permute.xlu1 %3453 }
0x242b   :  { %v3456_v53 = vmul.f32 %v3454_v34, %v7187_v60 }
0x242d   :  { %v3424_v3 = vpop.permute.xlu0 %3423  ;;  %v3471_v36 = vadd.f32 %v3456_v53, %v3450_v19  ;;  %v6025_v19 = vld [vmem:[#allocation5 + $0x260] ss:$16 sps:$4 sm:$0xff]  }
0x242e   :  { %v3426_v61 = vmul.f32 %v3424_v3, %v7180_v0  ;;  %5687 = vmatprep.subr.bf16.mxu0 %v6025_v19 }
0x242f   :  { %v3460_v32 = vpop.permute.xlu1 %3459 }
0x2430   :  { %v3469_v5 = vadd.f32 %v3432_v59, %v3426_v61  ;;  %v3462_v16 = vmul.f32 %v3460_v32, %v7197_v30  ;;  %v6196_v37 = vpop.eup %6195  ;;  %v7208_v32 = vld [vmem:[#allocation5 + $0x4e0] ss:$16 sps:$4 sm:$0xff]   ;;  %v7220_v59 = vld [vmem:[#allocation5 + $0x4ec] ss:$16 sps:$4 sm:$0xff]  }
0x2431   :  { %v7217_v61 = vld [vmem:[#allocation5 + $0x500] ss:$16 sps:$4 sm:$0xff]  }
0x2432   :  { %v3473_v17 = vadd.f32 %v3470_v54, %v3469_v5  ;;  %v6026_v5 = vld [vmem:[#allocation5 + $0x160] ss:$16 sps:$4 sm:$0xff]  }
0x2434   :  { %v3466_v35 = vpop.permute.xlu1 %3465 }
0x2435   :  { %v3468_v7 = vmul.f32 %v3466_v35, %v7199_v63 }
0x2437   :  { %v3472_v10 = vadd.f32 %v3468_v7, %v3462_v16  ;;  %v6027_v16 = vld [vmem:[#allocation5 + $0x280] ss:$16 sps:$4 sm:$0xff]  }
0x2438   :  { %v3723_v49 = vpop.permute.xlu1 %3722 }
0x2439   :  { %v3474_v52 = vadd.f32 %v3472_v10, %v3471_v36  ;;  %v7233_v36 = vld [vmem:[#allocation5 + $0x4e8] ss:$16 sps:$4 sm:$0xff]  }
0x243b   :  { %v3475_v6 = vadd.f32 %v3474_v52, %v3473_v17  ;;  %v7239_v17 = vld [vmem:[#allocation5 + $0x508] ss:$16 sps:$4 sm:$0xff]   ;;  %v6028_v52 = vld [vmem:[#allocation5 + $0x180] ss:$16 sps:$4 sm:$0xff]  }
0x243d   :  { %v3477_v25 = vmul.f32 %v6196_v37, %v3475_v6  ;;  %v6029_v6 = vld [vmem:[#allocation5 + $0x2a0] ss:$16 sps:$4 sm:$0xff]  }
0x243e   :  { %v6030_v37 = vld [vmem:[#allocation5 + $0x1a0] ss:$16 sps:$4 sm:$0xff]  }
0x243f   :  { %v3618_v15 = vpack.c.bf16 %v3477_v25, %v3477_v25  ;;  %v6031_v25 = vld [vmem:[#allocation5 + $0x2c0] ss:$16 sps:$4 sm:$0xff]  }
0x2441   :  { %5469 = vmatmul.mubr.msk.bf16.vlgmr.msra.gmra.mrb[68].mxu0 %vm194_vm2, %v3618_v15  ;;  %v6032_v15 = vld [vmem:[#allocation5 + $0x1c0] ss:$16 sps:$4 sm:$0xff]  }
0x2442   :  { %5688 = vmatpush3.bf16.msra.mxu0 %v6026_v5 }
0x2443   :  { %5689 = vmatprep.subr.bf16.mxu0 %v6027_v16 }
0x2446   :  { %5690 = vmatpush3.bf16.msra.mxu0 %v6028_v52 }
0x2447   :  { %5691 = vmatprep.subr.bf16.mxu0 %v6029_v6 }
0x244a   :  { %5692 = vmatpush3.bf16.msra.mxu0 %v6030_v37 }
0x244b   :  { %5693 = vmatprep.subr.bf16.mxu0 %v6031_v25 }
0x244e   :  { %5694 = vmatpush3.bf16.msra.mxu0 %v6032_v15 }
0x2499   :  { %v3611_v56 = vpop.f32.mrb[64].mxu1 }
0x249a   :  { %v3613_v40 = vpop.f32.mrb[65].mxu1 }
0x249b   :  { %v3615_v57 = vpop.f32.mrb[66].mxu1 }
0x249c   :  { %v3616_v27 = vpop.f32.mrb[67].mxu1  ;;  %v6035_v57 = vld [vmem:[#allocation5 + $0x300] ss:$16 sps:$4 sm:$0xff]  }
0x249d   :  { %v6036_v27 = vld [vmem:[#allocation5 + $0x200] ss:$16 sps:$4 sm:$0xff]  }
0x2514   :  { %v3704_v21 = vpop.f32.mrb[68].mxu0 }
0x2515   :  { %v3711_v43 = vadd.f32 %v3704_v21, %v3611_v56  ;;  %v3706_v20 = vpop.f32.mrb[69].mxu0 }
0x2516   :  { %v3708_v33 = vpop.f32.mrb[70].mxu0 }
0x2517   :  { %v3713_v47 = vadd.f32 %v3711_v43, %v7109_v31  ;;  %v3709_v8 = vpop.f32.mrb[71].mxu0  ;;  %v7210_v31 = vld [vmem:[#allocation5 + $0x4e4] ss:$16 sps:$4 sm:$0xff]   ;;  %v6038_v43 = vld [vmem:[#allocation5 + $0x220] ss:$16 sps:$4 sm:$0xff]  }
0x2518   :  { %3795 = vmatprep.subr.bf16.mxu1 %v7210_v31  ;;  %v6040_v33 = vld [vmem:[#allocation5 + $0x240] ss:$16 sps:$4 sm:$0xff]  }
0x2519   :  { %v3714_v1 = vadd.f32 %v3713_v47, %v3192_v46  ;;  %v7212_v46 = vld [vmem:[#allocation5 + $0x504] ss:$16 sps:$4 sm:$0xff]   ;;  %3796 = vmatpush1.bf16.msra.mxu1 %v7208_v32 }
0x251a   :  { %3797 = vmatprep.subr.bf16.mxu1 %v7212_v46 }
0x251b   :  { %v5470_v23 = vmul.f32 -1.442695, %v3714_v1 }
0x251d   :  { %6197 = vpow2.f32 %v5470_v23  ;;  %3798 = vmatpush1.bf16.msra.mxu1 %v7217_v61 }
0x251e   :  { %3836 = vmatprep.subr.bf16.mxu1 %v7220_v59 }
0x2527   :  { %v6198_v9 = vpop.eup %6197 }
0x2528   :  { %v3718_v39 = vadd.f32 1.0, %v6198_v9 }
0x252a   :  { %6199 = vrcp.f32 %v3718_v39 }
0x2534   :  { %v6200_v24 = vpop.eup %6199 }
0x2535   :  { %v3725_v50 = vmul.f32 %v6200_v24, %v3723_v49  ;;  %v3732_v55 = vsub.f32 1.0, %v6200_v24  ;;  %v3738_v44 = vmul.f32 %v6200_v24, %v7118_v48  ;;  %v7235_v48 = vld [vmem:[#allocation5 + $0x50c] ss:$16 sps:$4 sm:$0xff]  }
0x2537   :  { %3727 = vrot.lane.b32.xlu0 %v3725_v50, %s6291_s4 }
0x25a9   :  { %v3728_v18 = vpop.permute.xlu0 %3727 }
0x25aa   :  { %v3730_v34 = vadd.f32 %v3728_v18, %v3713_v47 }
0x25ac   :  { %6201 = vtanh.f32 %v3730_v34 }
0x25b6   :  { %v6202_v3 = vpop.eup %6201 }
0x25b7   :  { %3734 = vrot.lane.b32.xlu1 %v6202_v3, %s6292_s0 }
0x25bb   :  { %3879 = vrot.lane.b32.xlu1 %v3611_v56, %s6295_s15  ;;  %v6033_v56 = vld [vmem:[#allocation5 + $0x2e0] ss:$16 sps:$4 sm:$0xff]  }
0x25bc   :  { %5695 = vmatprep.subr.bf16.mxu0 %v6033_v56 }
0x25bf   :  { %3888 = vrot.lane.b32.xlu1 %v3704_v21, %s6295_s15  ;;  %v6037_v21 = vld [vmem:[#allocation5 + $0x320] ss:$16 sps:$4 sm:$0xff]  }
0x2629   :  { %v3735_v53 = vpop.permute.xlu1 %3734 }
0x262a   :  { %v3737_v35 = vmul.f32 %v3735_v53, %v3732_v55 }
0x262c   :  { %v7226_v7 = vadd.f32 %v3738_v44, %v3737_v35  ;;  %v7250_v44 = vld [vmem:[#allocation4] sm:$0xff] }
0x262d   :  { %v3880_v8 = vpop.permute.xlu1 %3879 }
0x262e   :  { %v3740_v54 = vpack.c.bf16 %v7226_v7, %v7226_v7 }
0x2630   :  { %3750 = vrot.lane.b32.xlu0 %v3740_v54, %s6292_s0  ;;  %v7256_v54 = vld [vmem:[#allocation4 + $0x8] sm:$0xff] }
0x2631   :  { %v3889_v50 = vpop.permute.xlu1 %3888 }
0x2634   :  { %3881 = vrot.lane.b32.xlu0 %v3613_v40, %s6295_s15  ;;  %v6034_v40 = vld [vmem:[#allocation5 + $0x1e0] ss:$16 sps:$4 sm:$0xff]  }
0x2635   :  { %5696 = vmatpush3.bf16.msra.mxu0 %v6034_v40 }
0x2636   :  { %5697 = vmatprep.subr.bf16.mxu0 %v6035_v57 }
0x2638   :  { %3890 = vrot.lane.b32.xlu0 %v3706_v20, %s6295_s15  ;;  %v6039_v20 = vld [vmem:[#allocation5 + $0x340] ss:$16 sps:$4 sm:$0xff]  }
0x2639   :  { %5698 = vmatpush3.bf16.msra.mxu0 %v6036_v27 }
0x263a   :  { %5699 = vmatprep.subr.bf16.mxu0 %v6037_v21 }
0x263d   :  { %5700 = vmatpush3.bf16.msra.mxu0 %v6038_v43 }
0x263e   :  { %5701 = vmatprep.subr.bf16.mxu0 %v6039_v20 }
0x2641   :  { %5702 = vmatpush3.bf16.msra.mxu0 %v6040_v33 }
0x26a2   :  { %v3751_v10 = vpop.permute.xlu0 %3750 }
0x26a3   :  { %5479 = vmatmul.mubr.msk.bf16.vlgmr.msra.gmra.mrb[68].mxu1 %vm339_vm4, %v3751_v10 }
0x26a4   :  { %3837 = vmatpush1.bf16.msra.mxu1 %v7233_v36  ;;  %3868 = vmatprep.mubr.bf16.mxu1 %v7504_v4 }
0x26a5   :  { %3838 = vmatprep.subr.bf16.mxu1 %v7235_v48 }
0x26a6   :  { %v3882_v47 = vpop.permute.xlu0 %3881 }
0x26a7   :  { %v3883_v24 = vsel %vm339_vm4, %v3880_v8, %v3882_v47 }
0x26a8   :  { %3839 = vmatpush1.bf16.msra.mxu1 %v7239_v17 }
0x26aa   :  { %v3891_v23 = vpop.permute.xlu0 %3890 }
0x26ab   :  { %5480 = vmatmul.mubr.msk.bf16.vlgmr.msra.gmra.mrb[72].mxu1 %vm339_vm4, %v3751_v10  ;;  %v3892_v3 = vsel %vm339_vm4, %v3889_v50, %v3891_v23  ;;  %v7262_v23 = vld [vmem:[#allocation5 + $0x360] ss:$16 sps:$4 sm:$0xff]  }
0x26ac   :  { %4290 = vmatprep.mubr.bf16.mxu1 %v7504_v4  ;;  %v7276_v50 = vld [vmem:[#allocation5 + $0x3a0] ss:$16 sps:$4 sm:$0xff]  }
0x2776   :  { %v3829_v1 = vpop.f32.mrb[68].mxu1 }
0x2777   :  { %v3830_v9 = vadd.f32 %v3829_v1, %v6885_v29  ;;  %v3831_v39 = vpop.f32.mrb[69].mxu1 }
0x2778   :  { %v3833_v49 = vpop.f32.mrb[70].mxu1  ;;  %v3832_v55 = vadd.f32 %v3831_v39, %v6712_v11  ;;  %v7266_v39 = vld [vmem:[#allocation5 + $0x384] ss:$16 sps:$4 sm:$0xff]  }
0x2779   :  { %v3885_v18 = vadd.f32 %v3883_v24, %v3830_v9  ;;  %v3834_v34 = vpop.f32.mrb[71].mxu1  ;;  %v7264_v9 = vld [vmem:[#allocation5 + $0x364] ss:$16 sps:$4 sm:$0xff]   ;;  %v7270_v24 = vld [vmem:[#allocation5 + $0x380] ss:$16 sps:$4 sm:$0xff]  }
0x277a   :  { %v3918_v35 = vadd.f32 %v7250_v44, %v3832_v55  ;;  %4258 = vmatprep.subr.bf16.mxu1 %v7264_v9  ;;  %v7273_v49 = vld [vmem:[#allocation5 + $0x3a4] ss:$16 sps:$4 sm:$0xff]   ;;  %v7282_v34 = vld [vmem:[#allocation5 + $0x3c0] ss:$16 sps:$4 sm:$0xff]  }
0x277b   :  { %v3894_v53 = vadd.f32 %v3892_v3, %v3885_v18  ;;  %4259 = vmatpush1.bf16.msra.mxu1 %v7262_v23  ;;  %v7279_v18 = vld [vmem:[#allocation5 + $0x3c4] ss:$16 sps:$4 sm:$0xff]   ;;  %v7288_v55 = vld [vmem:[#allocation5 + $0x3e0] ss:$16 sps:$4 sm:$0xff]  }
0x277c   :  { %6203 = vtanh.f32 %v3918_v35  ;;  %4260 = vmatprep.subr.bf16.mxu1 %v7266_v39  ;;  %v7285_v3 = vld [vmem:[#allocation5 + $0x3e4] ss:$16 sps:$4 sm:$0xff]   ;;  %v7294_v35 = vld [vmem:[#allocation5 + $0x400] ss:$16 sps:$4 sm:$0xff]  }
0x277d   :  { %3897 = vmax.xlane.f32.xlu1 %v3894_v53  ;;  %3896 = vst [vmem:[#allocation8 + $0x18] sm:$0xff] %v3894_v53 }
0x277e   :  { %v3870_v19 = vpop.f32.mrb[72].mxu1 }
0x277f   :  { %v3871_v5 = vadd.f32 %v3870_v19, %v6717_v38  ;;  %v7254_v16 = vpop.f32.mrb[73].mxu1  ;;  %4261 = vmatpush1.bf16.msra.mxu1 %v7270_v24 }
0x2780   :  { %v3874_v10 = vpop.f32.mrb[74].mxu1  ;;  %4262 = vmatprep.subr.bf16.mxu1 %v7273_v49 }
0x2781   :  { %v3919_v52 = vadd.f32 %v7256_v54, %v3871_v5  ;;  %v3875_v6 = vpop.f32.mrb[75].mxu1 }
0x2783   :  { %6205 = vtanh.f32 %v3919_v52  ;;  %4263 = vmatpush1.bf16.msra.mxu1 %v7276_v50 }
0x2784   :  { %4264 = vmatprep.subr.bf16.mxu1 %v7279_v18 }
0x2786   :  { %v6204_v37 = vpop.eup %6203 }
0x2787   :  { %v3922_v56 = vpack.c.bf16 %v6204_v37, %v6204_v37  ;;  %4265 = vmatpush1.bf16.msra.mxu1 %v7282_v34 }
0x2788   :  { %4266 = vmatprep.subr.bf16.mxu1 %v7285_v3 }
0x278b   :  { %4267 = vmatpush1.bf16.msra.mxu1 %v7288_v55 }
0x278d   :  { %v6206_v25 = vpop.eup %6205 }
0x278e   :  { %v3923_v15 = vpack.c.bf16 %v6206_v25, %v6206_v25 }
0x2790   :  { %4084 = vmatprep.mubr.bf16.mxu0 %v3923_v15 }
0x2791   :  { %4085 = vmatmul.mubr.bf16.vlgmr.msra.gmra.mrb[72].mxu0 %v3922_v56  ;;  %v7298_v56 = vld [vmem:[#allocation5 + $0x420] ss:$16 sps:$4 sm:$0xff]  }
0x2792   :  { %4383 = vmatprep.mubr.bf16.mxu0 %v7504_v4 }
0x280a   :  { %v3898_v40 = vpop.xlane.xlu1 %3897 }
0x280b   :  { %vm3899_vm10 = vcmp.eq.f32.partialorder %v3894_v53, %v3898_v40  ;;  %v7291_v53 = vld [vmem:[#allocation5 + $0x404] ss:$16 sps:$4 sm:$0xff]  }
0x280c   :  { %v3900_v57 = vsel %vm3899_vm10, %v6803_v45, 128  ;;  %4268 = vmatprep.subr.bf16.mxu1 %v7291_v53  ;;  %v7300_v40 = vld [vmem:[#allocation5 + $0x424] ss:$16 sps:$4 sm:$0xff]  }
0x280d   :  { %v3902_v33 = vshra.s32 %v3900_v57, 16  ;;  %4269 = vmatpush1.bf16.msra.mxu1 %v7294_v35  ;;  %v3901_v19 = vand.u32 65535, %v3900_v57  ;;  %v7305_v57 = vld [vmem:[#allocation5 + $0x444] ss:$16 sps:$4 sm:$0xff]  }
0x280e   :  { %4270 = vmatprep.subr.bf16.mxu1 %v7300_v40 }
0x280f   :  { %v3904_v1 = vcvt.s32.f32 %v3902_v33  ;;  %v3903_v6 = vcvt.s32.f32 %v3901_v19  ;;  %v7326_v33 = vld [vmem:[#allocation5 + $0x480] ss:$16 sps:$4 sm:$0xff]   ;;  %v7343_v19 = vld [vmem:[#allocation5 + $0x4c4] ss:$16 sps:$4 sm:$0xff]  }
0x2811   :  { %4271 = vmatpush1.bf16.msra.mxu1 %v7298_v56 }
0x2812   :  { %4272 = vmatprep.subr.bf16.mxu1 %v7305_v57 }
0x2864   :  { %v5703_v27 = vpop.f32.mrb[72].mxu0 }
0x2865   :  { %v5704_v21 = vpop.f32.mrb[73].mxu0 }
0x2866   :  { %v5705_v43 = vadd.f32 %v5704_v21, %v5703_v27  ;;  %v5706_v20 = vpop.f32.mrb[74].mxu0  ;;  %v7307_v27 = vld [vmem:[#allocation5 + $0x440] ss:$16 sps:$4 sm:$0xff]  }
0x2867   :  { %v5707_v47 = vpop.f32.mrb[75].mxu0  ;;  %4273 = vmatpush1.bf16.msra.mxu1 %v7307_v27  ;;  %v7320_v20 = vld [vmem:[#allocation5 + $0x460] ss:$16 sps:$4 sm:$0xff]  }
0x2868   :  { %v4092_v8 = vsel %vm1412_vm8, %v5705_v43, -inf  ;;  %4476 = vmatprep.subr.bf16.mxu1 %v7210_v31  ;;  %v7324_v31 = vld [vmem:[#allocation5 + $0x484] ss:$16 sps:$4 sm:$0xff]   ;;  %v7330_v47 = vadd.f32 %v7254_v16, %v7521_v42  ;;  %v7345_v16 = vld [vmem:[#allocation5 + $0x4c0] ss:$16 sps:$4 sm:$0xff]  }
0x2869   :  { %4093 = vmax.xlane.f32.xlu0 %v4092_v8  ;;  %v7336_v8 = vld [vmem:[#allocation5 + $0x4a4] ss:$16 sps:$4 sm:$0xff]  }
0x286d   :  { %3905 = vmin.xlane.f32.xlu0 %v3904_v1 }
0x28f6   :  { %v4094_v5 = vpop.xlane.xlu0 %4093 }
0x28f7   :  { %v4095_v10 = vsub.f32 %v5705_v43, %v4094_v5  ;;  %v7318_v43 = vld [vmem:[#allocation5 + $0x464] ss:$16 sps:$4 sm:$0xff]  }
0x28f8   :  { %4351 = vmatprep.subr.bf16.mxu0 %v7318_v43 }
0x28f9   :  { %v4096_v52 = vmul.f32 1.442695, %v4095_v10  ;;  %4352 = vmatpush1.bf16.msra.mxu0 %v7320_v20 }
0x28fa   :  { %v3906_v37 = vpop.xlane.xlu0 %3905  ;;  %4353 = vmatprep.subr.bf16.mxu0 %v7324_v31 }
0x28fb   :  { %6207 = vpow2.f32 %v4096_v52  ;;  %vm3907_vm11 = vcmp.eq.f32.partialorder %v3904_v1, %v3906_v37  ;;  %v7338_v1 = vld [vmem:[#allocation5 + $0x4a0] ss:$16 sps:$4 sm:$0xff]   ;;  %v3912_v5 = vcvt.f32.s32 %v3906_v37 }
0x28fc   :  { %v3908_v25 = vsel %vm3907_vm11, %v3903_v6, inf }
0x28fd   :  { %3909 = vmin.xlane.f32.xlu0 %v3908_v25  ;;  %4354 = vmatpush1.bf16.msra.mxu0 %v7326_v33  ;;  %v3913_v52 = vshll.u32 %v3912_v5, 16 }
0x28fe   :  { %4355 = vmatprep.subr.bf16.mxu0 %v7336_v8 }
0x2901   :  { %4356 = vmatpush1.bf16.msra.mxu0 %v7338_v1 }
0x2902   :  { %4357 = vmatprep.subr.bf16.mxu0 %v7343_v19 }
0x2905   :  { %v6208_v15 = vpop.eup %6207  ;;  %4358 = vmatpush1.bf16.msra.mxu0 %v7345_v16 }
0x2906   :  { %4104 = vperm.xlu1 %5810, %v6208_v15   ;;  %v4098_v21 = vsel %vm1412_vm8, %v6208_v15, 0.0 }
0x290a   :  { %5812 = vset.pattern.permute.xlu1 %v7514_v22 }
0x290b   :  { %4116 = vperm.xlu1 %5812, %v6208_v15  }
0x290f   :  { %5813 = vset.pattern.permute.xlu1 %v7515_v41 }
0x2910   :  { %4122 = vperm.xlu1 %5813, %v6208_v15  }
0x2913   :  { %4110 = vperm.xlu0 %5811, %v6208_v15  }
0x2914   :  { %5814 = vset.pattern.permute.xlu1 %v7516_v51 }
0x2915   :  { %4128 = vperm.xlu1 %5814, %v6208_v15  }
0x2919   :  { %5815 = vset.pattern.permute.xlu1 %v7517_v14 }
0x291a   :  { %4134 = vperm.xlu1 %5815, %v6208_v15  }
0x291e   :  { %5816 = vset.pattern.permute.xlu1 %v7518_v26 }
0x291f   :  { %4140 = vperm.xlu1 %5816, %v6208_v15  }
0x2923   :  { %5817 = vset.pattern.permute.xlu1 %v7520_v13 }
0x2943   :  { %4099 = vadd.xlane.f32.xlu1 %v4098_v21 }
0x2954   :  { %4146 = vperm.xlu1 %5817, %v6208_v15  }
0x2958   :  { %4403 = vrot.lane.b32.xlu1 %v7330_v47, %s6291_s4 }
0x2959   :  { %5818 = vset.pattern.permute.xlu1 %v7504_v4 }
0x2985   :  { %v4105_v37 = vpop.permute.xlu1 %4104 }
0x298a   :  { %v3910_v10 = vpop.xlane.xlu0 %3909  ;;  %v4117_v15 = vpop.permute.xlu1 %4116 }
0x298b   :  { %v3911_v6 = vcvt.f32.s32 %v3910_v10 }
0x298d   :  { %v3914_v25 = vadd.s32 %v3913_v52, %v3911_v6 }
0x298f   :  { %vm3915_vm12 = vcmp.eq.s32.totalorder %v6803_v45, %v3914_v25  ;;  %v4123_v21 = vpop.permute.xlu1 %4122 }
0x2990   :  { %vm5514_vm13 = vmpackc.low %vm3915_vm12, %vm3915_vm12  ;;  %v4125_v42 = vmul.f32 %v4123_v21, %v7185_v62 }
0x2991   :  { %5515 = vmatmul.mubr.msk.bf16.vlgmr.msra.gmra.mrb[76].mxu1 %vm5514_vm13, %v7522_v12 }
0x2992   :  { %4477 = vmatpush1.bf16.msra.mxu1 %v7208_v32  ;;  %4508 = vmatprep.mubr.bf16.mxu1 %v7504_v4  ;;  %v4111_v6 = vpop.permute.xlu0 %4110  ;;  %v4107_v32 = vmul.f32 %v4105_v37, %v7180_v0 }
0x2993   :  { %4478 = vmatprep.subr.bf16.mxu1 %v7212_v46  ;;  %v4113_v12 = vmul.f32 %v4111_v6, %v7183_v58 }
0x2994   :  { %v4129_v5 = vpop.permute.xlu1 %4128 }
0x2995   :  { %v4150_v13 = vadd.f32 %v4113_v12, %v4107_v32  ;;  %v4131_v26 = vmul.f32 %v4129_v5, %v7195_v28 }
0x2996   :  { %4479 = vmatpush1.bf16.msra.mxu1 %v7217_v61  ;;  %v4119_v61 = vmul.f32 %v4117_v15, %v7190_v2 }
0x2997   :  { %4517 = vmatprep.subr.bf16.mxu1 %v7220_v59 }
0x2998   :  { %v4151_v41 = vadd.f32 %v4125_v42, %v4119_v61 }
0x2999   :  { %v4135_v10 = vpop.permute.xlu1 %4134 }
0x299a   :  { %v4137_v46 = vmul.f32 %v4135_v10, %v7187_v60  ;;  %v4154_v6 = vadd.f32 %v4151_v41, %v4150_v13 }
0x299c   :  { %v4152_v22 = vadd.f32 %v4137_v46, %v4131_v26 }
0x299e   :  { %v4141_v52 = vpop.permute.xlu1 %4140 }
0x299f   :  { %v4143_v51 = vmul.f32 %v4141_v52, %v7197_v30  ;;  %v7368_v30 = vld [vmem:[%s7465_s2 + $0x4] ss:$0 sm:$0xff]  ;;  %s6304_s2 = smov [#allocation8]  }
0x29a0   :  { %s5198_s24 = sshll.u32 %s6304_s2, 4  ;;  %s5199_s24 = int_to_ptr.vmem [resolvable:$true] %s5198_s24 }
0x29a1   :  { %s6261_s25 = scalar_lea.vmem %s5199_s24, 768  ;;  %p6266_p9 = scmp.lt.s32.totalorder %s5199_s24, %s5199_s24 }
0x29a2   :  { %p6262_p8 = scmp.ne.s32.totalorder %s5199_s24, %s6261_s25  ;;  %p6267_p10 = scmp.lt.s32.totalorder %s6261_s25, %s6261_s25 }
0x29a4   :  { %p6268_p11 = por %p6267_p10, %p6266_p9 }
0x29a6   :  { %p6269_p12 = pnand %p6268_p11, %p6262_p8 }
0x29d0   :  { %v4100_v25 = vpop.xlane.xlu1 %4099 }
0x29d1   :  { %6209 = vrcp.f32 %v4100_v25 }
0x29d4   :  { %v4147_v59 = vpop.permute.xlu1 %4146 }
0x29d5   :  { %v4149_v14 = vmul.f32 %v4147_v59, %v7199_v63 }
0x29d7   :  { %v4153_v58 = vadd.f32 %v4149_v14, %v4143_v51 }
0x29d8   :  { %v4404_v52 = vpop.permute.xlu1 %4403 }
0x29d9   :  { %v4155_v25 = vadd.f32 %v4153_v58, %v4152_v22 }
0x29db   :  { %v6210_v0 = vpop.eup %6209  ;;  %v4156_v37 = vadd.f32 %v4155_v25, %v4154_v6 }
0x29dd   :  { %v4158_v62 = vmul.f32 %v6210_v0, %v4156_v37  ;;  %v6077_v0 = vld [vmem:[#allocation5 + $0x260] ss:$16 sps:$4 sm:$0xff]  }
0x29de   :  { %v6078_v37 = vld [vmem:[#allocation5 + $0x160] ss:$16 sps:$4 sm:$0xff]   ;;  %5709 = vmatprep.subr.bf16.mxu0 %v6077_v0 }
0x29df   :  { %v4299_v21 = vpack.c.bf16 %v4158_v62, %v4158_v62  ;;  %v6079_v62 = vld [vmem:[#allocation5 + $0x280] ss:$16 sps:$4 sm:$0xff]  }
0x29e1   :  { %5524 = vmatmul.mubr.msk.bf16.vlgmr.msra.gmra.mrb[76].mxu0 %vm194_vm2, %v4299_v21 }
0x29e2   :  { %5710 = vmatpush3.bf16.msra.mxu0 %v6078_v37 }
0x29e3   :  { %5711 = vmatprep.subr.bf16.mxu0 %v6079_v62  ;;  %v7523_v62 = vmov 2  }
0x2a64   :  { %v4292_v60 = vpop.f32.mrb[76].mxu1 }
0x2a65   :  { %v4294_v2 = vpop.f32.mrb[77].mxu1 }
0x2a66   :  { %v4296_v12 = vpop.f32.mrb[78].mxu1 }
0x2a67   :  { %v4297_v15 = vpop.f32.mrb[79].mxu1 }
0x2ab4   :  { %v4385_v28 = vpop.f32.mrb[76].mxu0 }
0x2ab5   :  { %v4392_v26 = vadd.f32 %v4385_v28, %v4292_v60  ;;  %v4387_v51 = vpop.f32.mrb[77].mxu0 }
0x2ab6   :  { %v4389_v41 = vpop.f32.mrb[78].mxu0 }
0x2ab7   :  { %v4394_v22 = vadd.f32 %v7368_v30, %v4392_v26  ;;  %v4390_v14 = vpop.f32.mrb[79].mxu0 }
0x2ab9   :  { %v4395_v13 = vadd.f32 %v4394_v22, %v7330_v47 }
0x2abb   :  { %v5525_v42 = vmul.f32 -1.442695, %v4395_v13 }
0x2abd   :  { %6211 = vpow2.f32 %v5525_v42 }
0x2ac7   :  { %v6212_v63 = vpop.eup %6211 }
0x2ac8   :  { %v4399_v5 = vadd.f32 1.0, %v6212_v63 }
0x2aca   :  { %6213 = vrcp.f32 %v4399_v5 }
0x2ad4   :  { %v6214_v10 = vpop.eup %6213 }
0x2ad5   :  { %v4406_v32 = vmul.f32 %v6214_v10, %v4404_v52  ;;  %v4413_v47 = vsub.f32 1.0, %v6214_v10  ;;  %v4419_v6 = vmul.f32 %v6214_v10, %v7226_v7  ;;  %v6080_v7 = vld [vmem:[#allocation5 + $0x180] ss:$16 sps:$4 sm:$0xff]  }
0x2ad6   :  { %5712 = vmatpush3.bf16.msra.mxu0 %v6080_v7  ;;  %v7526_v7 = vmov 4  }
0x2ad7   :  { %4408 = vrot.lane.b32.xlu0 %v4406_v32, %s6291_s4 }
0x2b49   :  { %v4409_v46 = vpop.permute.xlu0 %4408 }
0x2b4a   :  { %v4411_v61 = vadd.f32 %v4409_v46, %v4394_v22 }
0x2b4c   :  { %6215 = vtanh.f32 %v4411_v61 }
0x2b56   :  { %v6216_v59 = vpop.eup %6215 }
0x2b57   :  { %4415 = vrot.lane.b32.xlu1 %v6216_v59, %s6292_s0 }
0x2b5b   :  { %4560 = vrot.lane.b32.xlu1 %v4292_v60, %s6295_s15 }
0x2b5f   :  { %4569 = vrot.lane.b32.xlu1 %v4385_v28, %s6295_s15 }
0x2bc9   :  { %v4416_v58 = vpop.permute.xlu1 %4415 }
0x2bca   :  { %v4418_v25 = vmul.f32 %v4416_v58, %v4413_v47 }
0x2bcc   :  { %v7377_v21 = vadd.f32 %v4419_v6, %v4418_v25 }
0x2bce   :  { %v4421_v12 = vpack.c.bf16 %v7377_v21, %v7377_v21 }
0x2bd0   :  { %4431 = vrot.lane.b32.xlu0 %v4421_v12, %s6292_s0  ;;  %v7524_v12 = vmov 3  }
0x2bd4   :  { %4562 = vrot.lane.b32.xlu0 %v4294_v2, %s6295_s15 }
0x2bd8   :  { %4571 = vrot.lane.b32.xlu0 %v4387_v51, %s6295_s15 }
0x2c42   :  { %v4432_v60 = vpop.permute.xlu0 %4431 }
0x2c43   :  { %5534 = vmatmul.mubr.msk.bf16.vlgmr.msra.gmra.mrb[80].mxu1 %vm339_vm4, %v4432_v60 }
0x2c44   :  { %4518 = vmatpush1.bf16.msra.mxu1 %v7233_v36  ;;  %4549 = vmatprep.mubr.bf16.mxu1 %v7504_v4  ;;  %v6081_v36 = vld [vmem:[#allocation5 + $0x2a0] ss:$16 sps:$4 sm:$0xff]  }
0x2c45   :  { %4519 = vmatprep.subr.bf16.mxu1 %v7235_v48  ;;  %v6082_v48 = vld [vmem:[#allocation5 + $0x1a0] ss:$16 sps:$4 sm:$0xff]   ;;  %5713 = vmatprep.subr.bf16.mxu0 %v6081_v36  ;;  %v7527_v36 = vmov 6  }
0x2c46   :  { %5714 = vmatpush3.bf16.msra.mxu0 %v6082_v48  ;;  %v7528_v48 = vmov 7  }
0x2c48   :  { %4520 = vmatpush1.bf16.msra.mxu1 %v7239_v17  ;;  %v6083_v17 = vld [vmem:[#allocation5 + $0x2c0] ss:$16 sps:$4 sm:$0xff]  }
0x2c49   :  { %4939 = vmatprep.subr.bf16.mxu1 %v7264_v9  ;;  %5715 = vmatprep.subr.bf16.mxu0 %v6083_v17  ;;  %v6085_v9 = vld [vmem:[#allocation5 + $0x2e0] ss:$16 sps:$4 sm:$0xff]  }
0x2c4b   :  { %5535 = vmatmul.mubr.msk.bf16.vlgmr.msra.gmra.mrb[84].mxu1 %vm339_vm4, %v4432_v60  ;;  %v7525_v60 = vmov 5  }
0x2c4c   :  { %4940 = vmatpush1.bf16.msra.mxu1 %v7262_v23  ;;  %4971 = vmatprep.mubr.bf16.mxu1 %v7504_v4  ;;  %v6084_v23 = vld [vmem:[#allocation5 + $0x1c0] ss:$16 sps:$4 sm:$0xff]  }
0x2c4d   :  { %4941 = vmatprep.subr.bf16.mxu1 %v7266_v39  ;;  %5716 = vmatpush3.bf16.msra.mxu0 %v6084_v23  ;;  %v6086_v39 = vld [vmem:[#allocation5 + $0x1e0] ss:$16 sps:$4 sm:$0xff]  }
0x2c4e   :  { %5717 = vmatprep.subr.bf16.mxu0 %v6085_v9  ;;  %v7529_v23 = vld [vmem:[#allocation11_spill] sm:$0xff] }
0x2c50   :  { %4942 = vmatpush1.bf16.msra.mxu1 %v7270_v24  ;;  %v6087_v24 = vld [vmem:[#allocation5 + $0x300] ss:$16 sps:$4 sm:$0xff]  }
0x2c51   :  { %4943 = vmatprep.subr.bf16.mxu1 %v7273_v49  ;;  %5718 = vmatpush3.bf16.msra.mxu0 %v6086_v39  ;;  %v6088_v49 = vld [vmem:[#allocation5 + $0x200] ss:$16 sps:$4 sm:$0xff]  }
0x2c52   :  { %5719 = vmatprep.subr.bf16.mxu0 %v6087_v24 }
0x2c54   :  { %4944 = vmatpush1.bf16.msra.mxu1 %v7276_v50  ;;  %v6089_v50 = vld [vmem:[#allocation5 + $0x320] ss:$16 sps:$4 sm:$0xff]  }
0x2c55   :  { %4945 = vmatprep.subr.bf16.mxu1 %v7279_v18  ;;  %5720 = vmatpush3.bf16.msra.mxu0 %v6088_v49  ;;  %v6090_v18 = vld [vmem:[#allocation5 + $0x220] ss:$16 sps:$4 sm:$0xff]  }
0x2c56   :  { %5721 = vmatprep.subr.bf16.mxu0 %v6089_v50 }
0x2c58   :  { %4946 = vmatpush1.bf16.msra.mxu1 %v7282_v34  ;;  %v6091_v34 = vld [vmem:[#allocation5 + $0x340] ss:$16 sps:$4 sm:$0xff]  }
0x2c59   :  { %4947 = vmatprep.subr.bf16.mxu1 %v7285_v3  ;;  %5722 = vmatpush3.bf16.msra.mxu0 %v6090_v18  ;;  %v6092_v3 = vld [vmem:[#allocation5 + $0x240] ss:$16 sps:$4 sm:$0xff]  }
0x2c5a   :  { %5723 = vmatprep.subr.bf16.mxu0 %v6091_v34  ;;  %v7530_v34 = vmov 1.0|1.0  }
0x2c5c   :  { %4948 = vmatpush1.bf16.msra.mxu1 %v7288_v55  ;;  %v4563_v55 = vpop.permute.xlu0 %4562 }
0x2c5d   :  { %4949 = vmatprep.subr.bf16.mxu1 %v7291_v53  ;;  %5724 = vmatpush3.bf16.msra.mxu0 %v6092_v3  ;;  %v4561_v53 = vpop.permute.xlu1 %4560 }
0x2c5e   :  { %5032 = vmatprep.subr.bf16.mxu0 %v7318_v43 }
0x2c60   :  { %4950 = vmatpush1.bf16.msra.mxu1 %v7294_v35 }
0x2c61   :  { %4951 = vmatprep.subr.bf16.mxu1 %v7300_v40  ;;  %v4570_v15 = vpop.permute.xlu1 %4569 }
0x2c64   :  { %4952 = vmatpush1.bf16.msra.mxu1 %v7298_v56  ;;  %v4572_v56 = vpop.permute.xlu0 %4571 }
0x2c65   :  { %4953 = vmatprep.subr.bf16.mxu1 %v7305_v57  ;;  %v4573_v51 = vsel %vm339_vm4, %v4570_v15, %v4572_v56  ;;  %v4782_v15 = vld [vmem:[#allocation3] sm:$0xff] }
0x2c68   :  { %4954 = vmatpush1.bf16.msra.mxu1 %v7307_v27  ;;  %v4564_v27 = vsel %vm339_vm4, %v4561_v53, %v4563_v55 }
0x2d16   :  { %v4510_v35 = vpop.f32.mrb[80].mxu1 }
0x2d17   :  { %v4511_v40 = vadd.f32 %v4510_v35, %v6885_v29  ;;  %v4512_v57 = vpop.f32.mrb[81].mxu1 }
0x2d18   :  { %v4514_v2 = vpop.f32.mrb[82].mxu1  ;;  %v4513_v41 = vadd.f32 %v4512_v57, %v6712_v11  ;;  %v4789_v57 = vld [vmem:[#allocation3 + $0x8] sm:$0xff] }
0x2d19   :  { %v4566_v28 = vadd.f32 %v4564_v27, %v4511_v40  ;;  %v4515_v26 = vpop.f32.mrb[83].mxu1 }
0x2d1a   :  { %v4599_v43 = vadd.f32 %v4513_v41, %v7250_v44  ;;  %v4807_v26 = vld [vmem:[#allocation3 + $0x20] sm:$0xff]  ;;  %v4795_v41 = vld [vmem:[#allocation3 + $0x10] sm:$0xff] }
0x2d1b   :  { %v4575_v22 = vadd.f32 %v4573_v51, %v4566_v28  ;;  %v4801_v28 = vld [vmem:[#allocation3 + $0x18] sm:$0xff] }
0x2d1c   :  { %6217 = vtanh.f32 %v4599_v43 }
0x2d1d   :  { %4578 = vmax.xlane.f32.xlu1 %v4575_v22  ;;  %4577 = vst [vmem:[#allocation8 + $0x20] sm:$0xff] %v4575_v22 }
0x2d1e   :  { %v4551_v14 = vpop.f32.mrb[84].mxu1 }
0x2d1f   :  { %v4552_v13 = vadd.f32 %v4551_v14, %v6717_v38  ;;  %v4553_v42 = vpop.f32.mrb[85].mxu1 }
0x2d20   :  { %v4555_v63 = vpop.f32.mrb[86].mxu1  ;;  %v4554_v9 = vadd.f32 %v4553_v42, %v7529_v23  ;;  %v4819_v42 = vld [vmem:[#allocation3 + $0x30] sm:$0xff] }
0x2d21   :  { %v4600_v5 = vadd.f32 %v4552_v13, %v7256_v54  ;;  %v4556_v10 = vpop.f32.mrb[87].mxu1  ;;  %v4825_v13 = vld [vmem:[#allocation3 + $0x38] sm:$0xff] }
0x2d23   :  { %6219 = vtanh.f32 %v4600_v5 }
0x2d26   :  { %v6218_v52 = vpop.eup %6217 }
0x2d27   :  { %v4603_v61 = vpack.c.bf16 %v6218_v52, %v6218_v52 }
0x2d2d   :  { %v6220_v32 = vpop.eup %6219 }
0x2d2e   :  { %v4604_v46 = vpack.c.bf16 %v6220_v32, %v6220_v32 }
0x2d30   :  { %4765 = vmatprep.mubr.bf16.mxu0 %v4604_v46 }
0x2d31   :  { %4766 = vmatmul.mubr.bf16.vlgmr.msra.gmra.mrb[80].mxu0 %v4603_v61 }
0x2d32   :  { %5033 = vmatpush1.bf16.msra.mxu0 %v7320_v20  ;;  %5064 = vmatprep.mubr.bf16.mxu0 %v7504_v4 }
0x2d33   :  { %5034 = vmatprep.subr.bf16.mxu0 %v7324_v31 }
0x2d36   :  { %5035 = vmatpush1.bf16.msra.mxu0 %v7326_v33 }
0x2d37   :  { %5036 = vmatprep.subr.bf16.mxu0 %v7336_v8 }
0x2d3a   :  { %5037 = vmatpush1.bf16.msra.mxu0 %v7338_v1 }
0x2d3b   :  { %5038 = vmatprep.subr.bf16.mxu0 %v7343_v19 }
0x2d3e   :  { %5039 = vmatpush1.bf16.msra.mxu0 %v7345_v16 }
0x2daa   :  { %v4579_v11 = vpop.xlane.xlu1 %4578 }
0x2dab   :  { %vm4580_vm14 = vcmp.eq.f32.partialorder %v4575_v22, %v4579_v11 }
0x2dac   :  { %v4581_v38 = vsel %vm4580_vm14, %v6803_v45, 128 }
0x2dad   :  { %v4583_v47 = vshra.s32 %v4581_v38, 16  ;;  %v4582_v1 = vand.u32 65535, %v4581_v38 }
0x2daf   :  { %v4585_v8 = vcvt.s32.f32 %v4583_v47  ;;  %v4584_v16 = vcvt.s32.f32 %v4582_v1 }
0x2e04   :  { %v5725_v44 = vpop.f32.mrb[80].mxu0 }
0x2e05   :  { %v5726_v54 = vpop.f32.mrb[81].mxu0 }
0x2e06   :  { %v5727_v20 = vadd.f32 %v5726_v54, %v5725_v44  ;;  %v5728_v59 = vpop.f32.mrb[82].mxu0 }
0x2e07   :  { %v5729_v31 = vpop.f32.mrb[83].mxu0 }
0x2e08   :  { %v4773_v33 = vsel %vm1412_vm8, %v5727_v20, -inf }
0x2e09   :  { %4774 = vmax.xlane.f32.xlu0 %v4773_v33 }
0x2e0d   :  { %4586 = vmin.xlane.f32.xlu0 %v4585_v8 }
0x2e96   :  { %v4775_v58 = vpop.xlane.xlu0 %4774 }
0x2e97   :  { %v4776_v19 = vsub.f32 %v5727_v20, %v4775_v58 }
0x2e99   :  { %v4777_v6 = vmul.f32 1.442695, %v4776_v19 }
0x2e9a   :  { %v4587_v25 = vpop.xlane.xlu0 %4586 }
0x2e9b   :  { %6221 = vpow2.f32 %v4777_v6  ;;  %vm4588_vm15 = vcmp.eq.f32.partialorder %v4585_v8, %v4587_v25  ;;  %v4593_v39 = vcvt.f32.s32 %v4587_v25 }
0x2e9c   :  { %v4589_v0 = vsel %vm4588_vm15, %v4584_v16, inf }
0x2e9d   :  { %4590 = vmin.xlane.f32.xlu0 %v4589_v0  ;;  %v4594_v49 = vshll.u32 %v4593_v39, 16 }
0x2ea5   :  { %v6222_v37 = vpop.eup %6221 }
0x2ea6   :  { %4785 = vperm.xlu1 %5818, %v6222_v37   ;;  %v4779_v17 = vsel %vm1412_vm8, %v6222_v37, 0.0 }
0x2eaa   :  { %5819 = vset.pattern.permute.xlu1 %v7523_v62 }
0x2eab   :  { %4797 = vperm.xlu1 %5819, %v6222_v37  }
0x2eaf   :  { %5820 = vset.pattern.permute.xlu1 %v7524_v12 }
0x2eb0   :  { %4803 = vperm.xlu1 %5820, %v6222_v37  }
0x2eb3   :  { %4791 = vperm.xlu0 %5811, %v6222_v37  }
0x2eb4   :  { %5822 = vset.pattern.permute.xlu1 %v7525_v60 }
0x2eb5   :  { %4815 = vperm.xlu1 %5822, %v6222_v37  }
0x2eb7   :  { %5821 = vset.pattern.permute.xlu0 %v7526_v7 }
0x2eb8   :  { %4809 = vperm.xlu0 %5821, %v6222_v37  }
0x2eb9   :  { %5823 = vset.pattern.permute.xlu1 %v7527_v36 }
0x2ebc   :  { %5824 = vset.pattern.permute.xlu0 %v7528_v48 }
0x2ebd   :  { %4827 = vperm.xlu0 %5824, %v6222_v37  }
0x2ed9   :  { %4780 = vadd.xlane.f32.xlu1 %v4779_v17 }
0x2eea   :  { %4821 = vperm.xlu1 %5823, %v6222_v37  }
0x2eee   :  { %5084 = vrot.lane.b32.xlu1 %v4554_v9, %s6291_s4 }
0x2f25   :  { %v4786_v3 = vpop.permute.xlu1 %4785 }
0x2f2a   :  { %v4591_v24 = vpop.xlane.xlu0 %4590  ;;  %v4798_v55 = vpop.permute.xlu1 %4797 }
0x2f2b   :  { %v4592_v50 = vcvt.f32.s32 %v4591_v24  ;;  %v4800_v14 = vmul.f32 %v4798_v55, %v4795_v41  ;;  %v6093_v24 = vld [vmem:[#allocation5 + $0x4e0] ss:$16 sps:$4 sm:$0xff]  }
0x2f2d   :  { %v4595_v18 = vadd.s32 %v4594_v49, %v4592_v50  ;;  %v6098_v49 = vld [vmem:[#allocation5 + $0x504] ss:$16 sps:$4 sm:$0xff]  }
0x2f2f   :  { %vm4596_vm0 = vcmp.eq.s32.totalorder %v6803_v45, %v4595_v18  ;;  %v4804_v53 = vpop.permute.xlu1 %4803  ;;  %v4788_v45 = vmul.f32 %v4786_v3, %v4782_v15 }
0x2f30   :  { %vm5569_vm1 = vmpackc.low %vm4596_vm0, %vm4596_vm0  ;;  %v4806_v22 = vmul.f32 %v4804_v53, %v4801_v28 }
0x2f31   :  { %5570 = vmatmul.mubr.msk.bf16.vlgmr.msra.gmra.mrb[88].mxu1 %vm5569_vm1, %v7530_v34 }
0x2f32   :  { %5165 = vmatprep.mubr.bf16.mxu1 %v7504_v4  ;;  %v4792_v35 = vpop.permute.xlu0 %4791  ;;  %v4813_v4 = vld [vmem:[#allocation3 + $0x28] sm:$0xff]  ;;  %v4832_v46 = vadd.f32 %v4806_v22, %v4800_v14 }
0x2f33   :  { %v4794_v2 = vmul.f32 %v4792_v35, %v4789_v57 }
0x2f34   :  { %v4816_v56 = vpop.permute.xlu1 %4815 }
0x2f35   :  { %v4831_v5 = vadd.f32 %v4794_v2, %v4788_v45  ;;  %v4818_v10 = vmul.f32 %v4816_v56, %v4813_v4 }
0x2f37   :  { %v4810_v40 = vpop.permute.xlu0 %4809  ;;  %v4835_v38 = vadd.f32 %v4832_v46, %v4831_v5 }
0x2f38   :  { %v4812_v43 = vmul.f32 %v4810_v40, %v4807_v26 }
0x2f3a   :  { %v4833_v61 = vadd.f32 %v4818_v10, %v4812_v43 }
0x2f3c   :  { %v4828_v51 = vpop.permute.xlu0 %4827 }
0x2f3d   :  { %v4830_v52 = vmul.f32 %v4828_v51, %v4825_v13 }
0x2f66   :  { %v4781_v27 = vpop.xlane.xlu1 %4780 }
0x2f67   :  { %6223 = vrcp.f32 %v4781_v27 }
0x2f6a   :  { %v4822_v63 = vpop.permute.xlu1 %4821 }
0x2f6b   :  { %v4824_v32 = vmul.f32 %v4822_v63, %v4819_v42 }
0x2f6d   :  { %v4834_v11 = vadd.f32 %v4830_v52, %v4824_v32 }
0x2f6e   :  { %v5085_v36 = vpop.permute.xlu1 %5084 }
0x2f6f   :  { %v4836_v44 = vadd.f32 %v4834_v11, %v4833_v61 }
0x2f71   :  { %v6224_v54 = vpop.eup %6223  ;;  %v4837_v20 = vadd.f32 %v4836_v44, %v4835_v38 }
0x2f73   :  { %v4839_v59 = vmul.f32 %v6224_v54, %v4837_v20 }
0x2f75   :  { %v4980_v47 = vpack.c.bf16 %v4839_v59, %v4839_v59 }
0x2f77   :  { %5579 = vmatmul.mubr.msk.bf16.vlgmr.msra.gmra.mrb[84].mxu0 %vm194_vm2, %v4980_v47 }
0x3004   :  { %v4973_v31 = vpop.f32.mrb[88].mxu1 }
0x3005   :  { %v4975_v33 = vpop.f32.mrb[89].mxu1 }
0x3006   :  { %v4977_v8 = vpop.f32.mrb[90].mxu1 }
0x3007   :  { %v4978_v1 = vpop.f32.mrb[91].mxu1 }
0x304a   :  { %v5066_v58 = vpop.f32.mrb[84].mxu0 }
0x304b   :  { %v5073_v19 = vadd.f32 %v5066_v58, %v4973_v31  ;;  %v5068_v6 = vpop.f32.mrb[85].mxu0 }
0x304c   :  { %v5070_v16 = vpop.f32.mrb[86].mxu0 }
0x304d   :  { %v5075_v25 = vadd.f32 %v5073_v19, %v7368_v30  ;;  %v5071_v0 = vpop.f32.mrb[87].mxu0  ;;  %v6095_v30 = vld [vmem:[#allocation5 + $0x4e4] ss:$16 sps:$4 sm:$0xff]  }
0x304e   :  { %5133 = vmatprep.subr.bf16.mxu1 %v6095_v30 }
0x304f   :  { %v5076_v37 = vadd.f32 %v5075_v25, %v4554_v9  ;;  %5134 = vmatpush1.bf16.msra.mxu1 %v6093_v24  ;;  %v6096_v9 = vld [vmem:[#allocation5 + $0x500] ss:$16 sps:$4 sm:$0xff]  }
0x3050   :  { %5135 = vmatprep.subr.bf16.mxu1 %v6098_v49 }
0x3051   :  { %v5580_v62 = vmul.f32 -1.442695, %v5076_v37 }
0x3053   :  { %6225 = vpow2.f32 %v5580_v62  ;;  %5136 = vmatpush1.bf16.msra.mxu1 %v6096_v9 }
0x305d   :  { %v6226_v12 = vpop.eup %6225 }
0x305e   :  { %v5080_v60 = vadd.f32 1.0, %v6226_v12 }
0x3060   :  { %6227 = vrcp.f32 %v5080_v60 }
0x306a   :  { %v6228_v7 = vpop.eup %6227 }
0x306b   :  { %v5087_v48 = vmul.f32 %v6228_v7, %v5085_v36  ;;  %v5094_v50 = vsub.f32 1.0, %v6228_v7  ;;  %v5100_v34 = vmul.f32 %v6228_v7, %v7377_v21 }
0x306d   :  { %5089 = vrot.lane.b32.xlu1 %v5087_v48, %s6291_s4 }
0x30df   :  { %v5090_v17 = vpop.permute.xlu1 %5089 }
0x30e0   :  { %v5092_v23 = vadd.f32 %v5090_v17, %v5075_v25 }
0x30e2   :  { %6229 = vtanh.f32 %v5092_v23 }
0x30ec   :  { %v6230_v39 = vpop.eup %6229 }
0x30ed   :  { %5096 = vrot.lane.b32.xlu0 %v6230_v39, %s6292_s0 }
0x30f1   :  { %5175 = vrot.lane.b32.xlu0 %v4973_v31, %s6295_s15 }
0x30f5   :  { %5184 = vrot.lane.b32.xlu0 %v5066_v58, %s6295_s15 }
0x315f   :  { %v5097_v18 = vpop.permute.xlu0 %5096 }
0x3160   :  { %v5099_v3 = vmul.f32 %v5097_v18, %v5094_v50 }
0x3162   :  { %v5101_v55 = vadd.f32 %v5100_v34, %v5099_v3 }
0x3163   :  { %v5176_v40 = vpop.permute.xlu0 %5175 }
0x3164   :  { %v5102_v53 = vpack.c.bf16 %v5101_v55, %v5101_v55 }
0x3166   :  { %5108 = vrot.lane.b32.xlu1 %v5102_v53, %s6292_s0 }
0x3167   :  { %v5185_v26 = vpop.permute.xlu0 %5184 }
0x316a   :  { %5177 = vrot.lane.b32.xlu1 %v4975_v33, %s6295_s15 }
0x316e   :  { %5186 = vrot.lane.b32.xlu1 %v5068_v6, %s6295_s15 }
0x31d8   :  { %v5109_v35 = vpop.permute.xlu1 %5108 }
0x31d9   :  { %5585 = vmatmul.mubr.msk.bf16.vlgmr.msra.gmra.mrb[92].mxu1 %vm339_vm4, %v5109_v35 }
0x31dc   :  { %v5178_v56 = vpop.permute.xlu1 %5177 }
0x31dd   :  { %v5179_v21 = vsel %vm339_vm4, %v5176_v40, %v5178_v56 }
0x31e0   :  { %v5187_v27 = vpop.permute.xlu1 %5186 }
0x31e1   :  { %v5188_v41 = vsel %vm339_vm4, %v5185_v26, %v5187_v27 }
0x32ac   :  { %v5167_v57 = vpop.f32.mrb[92].mxu1 }
0x32ad   :  { %v5168_v2 = vadd.f32 %v5167_v57, %v6885_v29  ;;  %v5169_v15 = vpop.f32.mrb[93].mxu1 }
0x32ae   :  { %v5170_v28 = vpop.f32.mrb[94].mxu1 }
0x32af   :  { %v5181_v51 = vadd.f32 %v5179_v21, %v5168_v2  ;;  %v5171_v45 = vpop.f32.mrb[95].mxu1 }
0x32b1   :  { %v5190_v22 = vadd.f32 %v5188_v41, %v5181_v51 }
0x32b3   :  { %5192 = vst [vmem:[#allocation8 + $0x28] sm:$0xff] %v5190_v22 }
0x32b4   :  { %6272 = shalt.err (!%p6269_p12)
}
0x32b5   :  { %s6273_s27 = scalar_lea.hbm %s7466_s3, 768 }
0x32b6   :  { %p6274_p13 = scmp.ne.s32.totalorder %s7466_s3, %s6273_s27  ;;  %p6277_p0 = scmp.lt.u32.totalorder %s6273_s27, %s7466_s3 }
0x32b8   :  { %p6279_p1 = pnand %p6277_p0, %p6274_p13 }
0x32ba   :  { %6282 = shalt.err (!%p6279_p1)
}
0x32bb   :  { %s6305_s5 = smov 128   ;;  %s6306_s6 = smov 8  }
0x32bc   :  { %5204 = dma.vmem_to_hbm [thread:$0]  %s5199_s24, 768, %s7466_s3, [#allocation7], %s6305_s5, %s6305_s5, %s6306_s6  }
0x32bd   :  { %6285 = dma.done.wait [#allocation7], 768  }
0x32be   :  { %6286 = vsyncadd [#allocation7], 4294966528 }
0x32bf   :  { %5208 = vsyncpa [#allocation6], 1 }
0x32c0   :  { %5209 = vsyncpa [#allocation7], 1 }

</bundles_post_ra>
